<compile_context>
chip_gen: v7x
topology: tpu7x:2x2x1
jax: 0.10.0
libtpu: 0.0.40
codegen_flags: <defaults>
</compile_context>

<pallas_src>
import functools
import itertools

import jax
import jax.numpy as jnp
import numpy as np
from jax import lax
from jax.experimental import pallas as pl
from jax.experimental.pallas import tpu as pltpu


# ----------------------------- Pallas kernels ------------------------------

def _matmul_bias_act_kernel(x_ref, w_ref, b_ref, o_ref, *, activation):
    """o = act(x @ w + b); b broadcasts over rows (BN scale pre-folded into w)."""
    y = jnp.dot(x_ref[...], w_ref[...], preferred_element_type=jnp.float32)
    y = y + b_ref[...]
    if activation == "leaky_relu":
        y = jnp.where(y > 0, y, 0.2 * y)
    o_ref[...] = y.astype(o_ref.dtype)


def matmul_bias_act(x, w, bias, activation, out_dtype=jnp.bfloat16):
    """x: [M, K], w: [K, N] (bf16), bias: [1, N] f32 -> [M, N] out_dtype.

    K and N use full-array blocks (exempt from the (8,128) divisibility rule);
    M is tiled in 256-row blocks when large so v7x can shard the "parallel"
    grid axis across its two TensorCores.  No host-side padding or slicing.
    """
    M, K = x.shape
    Kw, N = w.shape
    assert K == Kw
    bias2 = bias.reshape(1, N).astype(jnp.float32)
    tm = M if M <= 256 else 256
    grid_m = pl.cdiv(M, tm)
    cost = pl.CostEstimate(
        flops=2 * M * K * N,
        transcendentals=0,
        bytes_accessed=2 * (M * K + K * N) + 4 * N
        + M * N * np.dtype(out_dtype).itemsize)
    return pl.pallas_call(
        functools.partial(_matmul_bias_act_kernel, activation=activation),
        out_shape=jax.ShapeDtypeStruct((M, N), out_dtype),
        grid=(grid_m,),
        in_specs=[
            pl.BlockSpec((tm, K), lambda i: (i, 0)),
            pl.BlockSpec((K, N), lambda i: (0, 0)),
            pl.BlockSpec((1, N), lambda i: (0, 0)),
        ],
        out_specs=pl.BlockSpec((tm, N), lambda i: (i, 0)),
        compiler_params=pltpu.CompilerParams(
            dimension_semantics=("parallel",)),
        cost_estimate=cost,
    )(x.astype(jnp.bfloat16), w.astype(jnp.bfloat16), bias2)


def _sync_tail_kernel(xv_ref, xa_ref, wv_ref, bv_ref, wa_ref, ba_ref,
                      wd_ref, bd_ref, o_ref, *, n_frames, n_audio):
    """Fused tail: video/audio Linear -> zero-pad shorter embedding ->
    (f - a)^2 -> 256->1 lane reduction -> sigmoid."""
    f = jnp.dot(xv_ref[...], wv_ref[...], preferred_element_type=jnp.float32)
    f = f + bv_ref[...]
    a = jnp.dot(xa_ref[...], wa_ref[...], preferred_element_type=jnp.float32)
    a = a + ba_ref[...]
    if n_frames != n_audio:  # replicate torch pad(): zero rows past each count
        rows = f.shape[0]
        row_idx = lax.broadcasted_iota(jnp.int32, (rows, 1), 0)
        f = jnp.where(row_idx < n_frames, f, 0.0)
        a = jnp.where(row_idx < n_audio, a, 0.0)
    d = f - a
    sim = d * d
    logit = jnp.sum(sim * wd_ref[...], axis=-1, keepdims=True) + bd_ref[...]
    o_ref[...] = 1.0 / (1.0 + jnp.exp(-logit))


def sync_tail(xv, xa, wv, bv, wa, ba, wd, bd):
    """Single pallas_call for both Linears + pad + similarity head."""
    nf, kv = xv.shape
    na, ka = xa.shape
    n = max(nf, na)
    if nf < n:
        xv = jnp.pad(xv, ((0, n - nf), (0, 0)))
    if na < n:
        xa = jnp.pad(xa, ((0, n - na), (0, 0)))
    d_emb = wv.shape[1]
    xv = xv.astype(jnp.bfloat16)
    xa = xa.astype(jnp.bfloat16)
    cost = pl.CostEstimate(
        flops=2 * n * (kv + ka) * d_emb + 4 * n * d_emb,
        transcendentals=n,
        bytes_accessed=2 * (n * (kv + ka) + (kv + ka) * d_emb)
        + 4 * (3 * d_emb + 1 + n))
    return pl.pallas_call(
        functools.partial(_sync_tail_kernel, n_frames=nf, n_audio=na),
        out_shape=jax.ShapeDtypeStruct((n, 1), jnp.float32),
        grid=(1,),
        in_specs=[
            pl.BlockSpec((n, kv), lambda i: (0, 0)),
            pl.BlockSpec((n, ka), lambda i: (0, 0)),
            pl.BlockSpec((kv, d_emb), lambda i: (0, 0)),
            pl.BlockSpec((1, d_emb), lambda i: (0, 0)),
            pl.BlockSpec((ka, d_emb), lambda i: (0, 0)),
            pl.BlockSpec((1, d_emb), lambda i: (0, 0)),
            pl.BlockSpec((1, d_emb), lambda i: (0, 0)),
            pl.BlockSpec((1, 1), lambda i: (0, 0)),
        ],
        out_specs=pl.BlockSpec((n, 1), lambda i: (0, 0)),
        compiler_params=pltpu.CompilerParams(
            dimension_semantics=("arbitrary",),
            vmem_limit_bytes=32 * 1024 * 1024),
        cost_estimate=cost,
    )(xv, xa, wv, bv, wa, ba, wd, bd)


# ------------------------------ conv helpers --------------------------------

def _im2col_cl(x, kernel, stride):
    """x: [N, *spatial, C] channels-last.

    Returns ([N*prod(out_sp), C*prod(kernel)], out_sp) with column order
    (C major, kernel-offset minor) to match PyTorch weight.reshape(Cout, -1).
    Patch matrices here are < 0.5 MB, so im2col stays in (jit-fused) XLA.
    """
    n, c = x.shape[0], x.shape[-1]
    spatial = x.shape[1:-1]
    out_sp = tuple((s - k) // st + 1 for s, k, st in zip(spatial, kernel, stride))
    cols = []
    for offs in itertools.product(*[range(k) for k in kernel]):
        slc = tuple(slice(o, o + st * osz, st)
                    for o, st, osz in zip(offs, stride, out_sp))
        cols.append(x[(slice(None),) + slc + (slice(None),)])    # [N, *out_sp, C]
    p = jnp.stack(cols, axis=-1)                                 # [N, *out_sp, C, K]
    kprod = int(np.prod(kernel))
    p = p.reshape((n,) + out_sp + (c * kprod,))
    return p.reshape(-1, c * kprod), out_sp


def conv_bn_lrelu_cl(x, w2, shift, kernel, stride):
    """ConvNd (valid) + BN(eval, scale folded) + LeakyReLU(0.2), channels-last.

    x: [N, *spatial, Cin]; w2: [Cin*prod(kernel), Cout] bf16; shift: [1, Cout].
    Returns [N, *out_spatial, Cout] bf16.
    """
    patches, out_sp = _im2col_cl(x, kernel, stride)
    out = matmul_bias_act(patches, w2, shift, "leaky_relu")
    return out.reshape((x.shape[0],) + out_sp + (w2.shape[1],))


# ------------------------------- parameters ---------------------------------

def init_params(key, config):
    """Random parameters in PyTorch layout (conv: [Cout, Cin, *K]; linear: [out, in])."""
    vfs = config["video_feature_sizes"]
    afs = config["audio_feature_sizes"]
    keys = iter(jax.random.split(key, 64))

    def conv_block(cin, cout, kernel):
        return {
            "w": 0.05 * jax.random.normal(next(keys), (cout, cin) + tuple(kernel), jnp.float32),
            "b": 0.05 * jax.random.normal(next(keys), (cout,), jnp.float32),
            "gamma": 1.0 + 0.1 * jax.random.normal(next(keys), (cout,), jnp.float32),
            "beta": 0.1 * jax.random.normal(next(keys), (cout,), jnp.float32),
            "mean": 0.1 * jax.random.normal(next(keys), (cout,), jnp.float32),
            "var": jnp.abs(1.0 + 0.1 * jax.random.normal(next(keys), (cout,), jnp.float32)),
        }

    def linear(fin, fout):
        return {"w": 0.02 * jax.random.normal(next(keys), (fout, fin), jnp.float32),
                "b": 0.02 * jax.random.normal(next(keys), (fout,), jnp.float32)}

    params = {"video": [conv_block(3, vfs[0], (5, 4, 4))]}
    for i in range(len(vfs) - 1):
        k = config["video_kernel_sizes"][i]
        params["video"].append(conv_block(vfs[i], vfs[i + 1], (k, k)))
    params["video_linear"] = linear(6144, 256)
    params["audio"] = []
    for i in range(len(afs) - 1):
        cin = 1 if i == 0 else afs[i]
        params["audio"].append(conv_block(cin, afs[i + 1], (config["audio_kernel_sizes"][i],)))
    params["audio_linear"] = linear(1280, 256)
    params["disc"] = linear(256, 1)
    return params


def _video_out_shape(config, img_size):
    h, w = img_size[0] // 2, img_size[1]
    h, w = (h - 4) // 2 + 1, (w - 4) // 2 + 1            # Conv3d spatial part
    for i in range(len(config["video_feature_sizes"]) - 1):
        k, s = config["video_kernel_sizes"][i], config["video_stride"]
        h, w = (h - k) // s + 1, (w - k) // s + 1
    return h, w, config["video_feature_sizes"][-1]


def _audio_out_shape(config):
    length = config["audio_length"]
    for i in range(len(config["audio_feature_sizes"]) - 1):
        length = (length - config["audio_kernel_sizes"][i]) // config["audio_stride"][i] + 1
    return length, config["audio_feature_sizes"][-1]


def fold_params(params, config, img_size, eps=1e-5):
    """Fold BN(eval) into conv weights, reorder/transpose Linear weights for the
    channels-last flatten order, and cast matmul weights to bf16 (biases f32)."""

    def fold_conv(blk):
        w = blk["w"]                                      # [Cout, Cin, *K]
        c_out = w.shape[0]
        scale = blk["gamma"] / jnp.sqrt(blk["var"] + eps)
        shift = blk["beta"] + (blk["b"] - blk["mean"]) * scale
        w2 = (w.reshape(c_out, -1).T * scale[None, :]).astype(jnp.bfloat16)
        return {"w": w2, "shift": shift.reshape(1, -1).astype(jnp.float32)}

    folded = {
        "video": [fold_conv(b) for b in params["video"]],
        "audio": [fold_conv(b) for b in params["audio"]],
    }

    # PyTorch flattens conv features C-major; our activations are channels-last,
    # so permute the Linear weight rows once here (no per-forward transposes).
    h, w, c = _video_out_shape(config, img_size)
    vw = params["video_linear"]["w"]                      # [256, C*H*W]
    assert vw.shape[1] == c * h * w
    vperm = np.arange(c * h * w).reshape(c, h, w).transpose(1, 2, 0).ravel()
    folded["video_linear"] = {
        "w": vw[:, vperm].T.astype(jnp.bfloat16),         # [H*W*C, 256]
        "b": params["video_linear"]["b"].reshape(1, -1).astype(jnp.float32),
    }

    length, ca = _audio_out_shape(config)
    aw = params["audio_linear"]["w"]                      # [256, C*L]
    assert aw.shape[1] == ca * length
    aperm = np.arange(ca * length).reshape(ca, length).T.ravel()
    folded["audio_linear"] = {
        "w": aw[:, aperm].T.astype(jnp.bfloat16),         # [L*C, 256]
        "b": params["audio_linear"]["b"].reshape(1, -1).astype(jnp.float32),
    }

    folded["disc"] = {
        "w": params["disc"]["w"].astype(jnp.float32),     # [1, 256] (lane reduce)
        "b": params["disc"]["b"].reshape(1, 1).astype(jnp.float32),
    }
    return folded


# -------------------------------- forward -----------------------------------

def sync_discriminator_forward(params, config, frames, audio):
    """frames: [Chunks, 5, 3, H//2, W]; audio: [Chunks, 1, audio_length] -> [Chunks, 1]."""
    vstride = config["video_stride"]

    # --- video branch, channels-last [N, T, H, W, C] ---
    x = jnp.transpose(frames, (0, 1, 3, 4, 2)).astype(jnp.bfloat16)
    for i, blk in enumerate(params["video"]):
        if i == 0:
            kernel, stride = (5, 4, 4), (1, 2, 2)
        else:
            k = config["video_kernel_sizes"][i - 1]
            kernel, stride = (k, k), (vstride, vstride)
        x = conv_bn_lrelu_cl(x, blk["w"], blk["shift"], kernel, stride)
        if i == 0:
            x = jnp.squeeze(x, axis=1)                    # T dim collapsed to 1
    xv = x.reshape(x.shape[0], -1)                        # [Chunks, H*W*C]

    # --- audio branch, channels-last [N, L, C] ---
    # TODO(synk): torch's audio.squeeze(0) unbatched corner case (Chunks == 1)
    # is not reproduced; the batched Chunks > 1 path matches.
    a = jnp.transpose(audio, (0, 2, 1)).astype(jnp.bfloat16)
    for i, blk in enumerate(params["audio"]):
        a = conv_bn_lrelu_cl(a, blk["w"], blk["shift"],
                             (config["audio_kernel_sizes"][i],),
                             (config["audio_stride"][i],))
    xa = a.reshape(a.shape[0], -1)                        # [Chunks, L*C]

    # --- fused tail: Linears + pad + (f-a)^2 + disc Linear + sigmoid ---
    vl, al, d = params["video_linear"], params["audio_linear"], params["disc"]
    return sync_tail(xv, xa, vl["w"], vl["b"], al["w"], al["b"], d["w"], d["b"])


# ---------------------------------- main -------------------------------------

if __name__ == "__main__":
    config = {
        "video_feature_sizes": [16, 96],
        "video_kernel_sizes": [4, 4],
        "video_stride": 2,
        "audio_feature_sizes": [1, 32, 128],
        "audio_kernel_sizes": [16, 4],
        "audio_stride": [8, 2],
        "audio_length": 184,
    }
    img_size = (76, 38)   # => flattened video features = 96 * 8 * 8 = 6144
    chunks = 2

    key = jax.random.PRNGKey(0)
    kp, kf, ka = jax.random.split(key, 3)
    params = fold_params(init_params(kp, config), config, img_size)

    frames = jax.random.normal(
        kf, (chunks, 5, 3, img_size[0] // 2, img_size[1]), jnp.float32)
    audio = jax.random.normal(ka, (chunks, 1, config["audio_length"]), jnp.float32)

    fwd = jax.jit(lambda p, f, a: sync_discriminator_forward(p, config, f, a))
    out = jax.block_until_ready(fwd(params, frames, audio))

    assert out.shape == (chunks, 1), out.shape
    assert out.dtype == jnp.float32
    assert bool(jnp.all((out >= 0.0) & (out <= 1.0)))
    print("KERNEL_OK")
</pallas_src>

<mosaic_0001>
module attributes {stable_mosaic.version = 11 : i64} {
  func.func @_matmul_bias_act_kernel(%arg0: i32, %arg1: memref<256x240xbf16, #tpu.memory_space<vmem>>, %arg2: memref<240x16xbf16, #tpu.memory_space<vmem>>, %arg3: memref<1x16xf32, #tpu.memory_space<vmem>>, %arg4: memref<256x16xbf16, #tpu.memory_space<vmem>>) attributes {dimension_semantics = [#tpu.dimension_semantics<parallel>], iteration_bounds = array<i64: 3>, scalar_prefetch = 0 : i64, scratch_operands = 0 : i64, tpu.core_type = #tpu.core_type<tc>, window_params = [{transform_indices = @transform_0, window_bounds = array<i64: 256, 240>}, {pipeline_mode = #tpu.pipeline_mode<synchronous>, transform_indices = @transform_1, window_bounds = array<i64: 240, 16>}, {pipeline_mode = #tpu.pipeline_mode<synchronous>, transform_indices = @transform_2, window_bounds = array<i64: 1, 16>}, {transform_indices = @transform_3, window_bounds = array<i64: 256, 16>}]} {
    %c0 = arith.constant 0 : index
    %c0_0 = arith.constant 0 : index
    %0 = vector.load %arg1[%c0, %c0_0] : memref<256x240xbf16, #tpu.memory_space<vmem>>, vector<256x240xbf16>
    %c0_1 = arith.constant 0 : index
    %c0_2 = arith.constant 0 : index
    %1 = vector.load %arg2[%c0_1, %c0_2] : memref<240x16xbf16, #tpu.memory_space<vmem>>, vector<240x16xbf16>
    %cst = arith.constant dense<0.000000e+00> : vector<256x16xf32>
    %2 = tpu.matmul %0, %1, %cst {dimension_numbers = #tpu.dot_dimension_numbers<[1], [0], [0], [1], [0, 0, 1, 1], [], []>} : vector<256x240xbf16>, vector<240x16xbf16>, vector<256x16xf32> -> vector<256x16xf32>
    %c0_3 = arith.constant 0 : index
    %c0_4 = arith.constant 0 : index
    %3 = vector.load %arg3[%c0_3, %c0_4] : memref<1x16xf32, #tpu.memory_space<vmem>>, vector<1x16xf32>
    %4 = vector.broadcast %3 : vector<1x16xf32> to vector<256x16xf32>
    %5 = arith.addf %2, %4 : vector<256x16xf32>
    %cst_5 = arith.constant 0.000000e+00 : f32
    %6 = vector.broadcast %cst_5 : f32 to vector<256x16xf32>
    %7 = arith.cmpf ogt, %5, %6 : vector<256x16xf32>
    %cst_6 = arith.constant 2.000000e-01 : f32
    %8 = vector.broadcast %cst_6 : f32 to vector<256x16xf32>
    %9 = arith.mulf %8, %5 : vector<256x16xf32>
    %10 = arith.select %7, %5, %9 : vector<256x16xi1>, vector<256x16xf32>
    %11 = arith.truncf %10 : vector<256x16xf32> to vector<256x16xbf16>
    %c0_7 = arith.constant 0 : index
    %c0_8 = arith.constant 0 : index
    %12 = vector.load %arg4[%c0_7, %c0_8] : memref<256x16xbf16, #tpu.memory_space<vmem>>, vector<256x16xbf16>
    tpu.vector_store %arg4[%c0_7, %c0_8], %11 {strides = array<i32>} : memref<256x16xbf16, #tpu.memory_space<vmem>>, vector<256x16xbf16>,
    return
  }
  func.func @transform_0(%arg0: i32) -> (i32, i32) {
    %c0_i32 = arith.constant 0 : i32
    %c0_i32_0 = arith.constant 0 : i32
    return %arg0, %c0_i32 : i32, i32
  }
  func.func @transform_1(%arg0: i32) -> (i32, i32) {
    %c0_i32 = arith.constant 0 : i32
    %c0_i32_0 = arith.constant 0 : i32
    %c0_i32_1 = arith.constant 0 : i32
    return %c0_i32, %c0_i32_0 : i32, i32
  }
  func.func @transform_2(%arg0: i32) -> (i32, i32) {
    %c0_i32 = arith.constant 0 : i32
    %c0_i32_0 = arith.constant 0 : i32
    %c0_i32_1 = arith.constant 0 : i32
    return %c0_i32, %c0_i32_0 : i32, i32
  }
  func.func @transform_3(%arg0: i32) -> (i32, i32) {
    %c0_i32 = arith.constant 0 : i32
    %c0_i32_0 = arith.constant 0 : i32
    return %arg0, %c0_i32 : i32, i32
  }
}

module attributes {stable_mosaic.version = 11 : i64} {
  func.func @_matmul_bias_act_kernel(%arg0: i32, %arg1: memref<128x256xbf16, #tpu.memory_space<vmem>>, %arg2: memref<256x96xbf16, #tpu.memory_space<vmem>>, %arg3: memref<1x96xf32, #tpu.memory_space<vmem>>, %arg4: memref<128x96xbf16, #tpu.memory_space<vmem>>) attributes {dimension_semantics = [#tpu.dimension_semantics<parallel>], iteration_bounds = array<i64: 1>, scalar_prefetch = 0 : i64, scratch_operands = 0 : i64, tpu.core_type = #tpu.core_type<tc>, window_params = [{transform_indices = @transform_0, window_bounds = array<i64: 128, 256>}, {pipeline_mode = #tpu.pipeline_mode<synchronous>, transform_indices = @transform_1, window_bounds = array<i64: 256, 96>}, {pipeline_mode = #tpu.pipeline_mode<synchronous>, transform_indices = @transform_2, window_bounds = array<i64: 1, 96>}, {transform_indices = @transform_3, window_bounds = array<i64: 128, 96>}]} {
    %c0 = arith.constant 0 : index
    %c0_0 = arith.constant 0 : index
    %0 = vector.load %arg1[%c0, %c0_0] : memref<128x256xbf16, #tpu.memory_space<vmem>>, vector<128x256xbf16>
    %c0_1 = arith.constant 0 : index
    %c0_2 = arith.constant 0 : index
    %1 = vector.load %arg2[%c0_1, %c0_2] : memref<256x96xbf16, #tpu.memory_space<vmem>>, vector<256x96xbf16>
    %cst = arith.constant dense<0.000000e+00> : vector<128x96xf32>
    %2 = tpu.matmul %0, %1, %cst {dimension_numbers = #tpu.dot_dimension_numbers<[1], [0], [0], [1], [0, 0, 1, 1], [], []>} : vector<128x256xbf16>, vector<256x96xbf16>, vector<128x96xf32> -> vector<128x96xf32>
    %c0_3 = arith.constant 0 : index
    %c0_4 = arith.constant 0 : index
    %3 = vector.load %arg3[%c0_3, %c0_4] : memref<1x96xf32, #tpu.memory_space<vmem>>, vector<1x96xf32>
    %4 = vector.broadcast %3 : vector<1x96xf32> to vector<128x96xf32>
    %5 = arith.addf %2, %4 : vector<128x96xf32>
    %cst_5 = arith.constant 0.000000e+00 : f32
    %6 = vector.broadcast %cst_5 : f32 to vector<128x96xf32>
    %7 = arith.cmpf ogt, %5, %6 : vector<128x96xf32>
    %cst_6 = arith.constant 2.000000e-01 : f32
    %8 = vector.broadcast %cst_6 : f32 to vector<128x96xf32>
    %9 = arith.mulf %8, %5 : vector<128x96xf32>
    %10 = arith.select %7, %5, %9 : vector<128x96xi1>, vector<128x96xf32>
    %11 = arith.truncf %10 : vector<128x96xf32> to vector<128x96xbf16>
    %c0_7 = arith.constant 0 : index
    %c0_8 = arith.constant 0 : index
    %12 = vector.load %arg4[%c0_7, %c0_8] : memref<128x96xbf16, #tpu.memory_space<vmem>>, vector<128x96xbf16>
    tpu.vector_store %arg4[%c0_7, %c0_8], %11 {strides = array<i32>} : memref<128x96xbf16, #tpu.memory_space<vmem>>, vector<128x96xbf16>,
    return
  }
  func.func @transform_0(%arg0: i32) -> (i32, i32) {
    %c0_i32 = arith.constant 0 : i32
    %c0_i32_0 = arith.constant 0 : i32
    return %arg0, %c0_i32 : i32, i32
  }
  func.func @transform_1(%arg0: i32) -> (i32, i32) {
    %c0_i32 = arith.constant 0 : i32
    %c0_i32_0 = arith.constant 0 : i32
    %c0_i32_1 = arith.constant 0 : i32
    return %c0_i32, %c0_i32_0 : i32, i32
  }
  func.func @transform_2(%arg0: i32) -> (i32, i32) {
    %c0_i32 = arith.constant 0 : i32
    %c0_i32_0 = arith.constant 0 : i32
    %c0_i32_1 = arith.constant 0 : i32
    return %c0_i32, %c0_i32_0 : i32, i32
  }
  func.func @transform_3(%arg0: i32) -> (i32, i32) {
    %c0_i32 = arith.constant 0 : i32
    %c0_i32_0 = arith.constant 0 : i32
    return %arg0, %c0_i32 : i32, i32
  }
}

module attributes {stable_mosaic.version = 11 : i64} {
  func.func @_matmul_bias_act_kernel(%arg0: i32, %arg1: memref<44x16xbf16, #tpu.memory_space<vmem>>, %arg2: memref<16x32xbf16, #tpu.memory_space<vmem>>, %arg3: memref<1x32xf32, #tpu.memory_space<vmem>>, %arg4: memref<44x32xbf16, #tpu.memory_space<vmem>>) attributes {dimension_semantics = [#tpu.dimension_semantics<parallel>], iteration_bounds = array<i64: 1>, scalar_prefetch = 0 : i64, scratch_operands = 0 : i64, tpu.core_type = #tpu.core_type<tc>, window_params = [{transform_indices = @transform_0, window_bounds = array<i64: 44, 16>}, {pipeline_mode = #tpu.pipeline_mode<synchronous>, transform_indices = @transform_1, window_bounds = array<i64: 16, 32>}, {pipeline_mode = #tpu.pipeline_mode<synchronous>, transform_indices = @transform_2, window_bounds = array<i64: 1, 32>}, {transform_indices = @transform_3, window_bounds = array<i64: 44, 32>}]} {
    %c0 = arith.constant 0 : index
    %c0_0 = arith.constant 0 : index
    %0 = vector.load %arg1[%c0, %c0_0] : memref<44x16xbf16, #tpu.memory_space<vmem>>, vector<44x16xbf16>
    %c0_1 = arith.constant 0 : index
    %c0_2 = arith.constant 0 : index
    %1 = vector.load %arg2[%c0_1, %c0_2] : memref<16x32xbf16, #tpu.memory_space<vmem>>, vector<16x32xbf16>
    %cst = arith.constant dense<0.000000e+00> : vector<44x32xf32>
    %2 = tpu.matmul %0, %1, %cst {dimension_numbers = #tpu.dot_dimension_numbers<[1], [0], [0], [1], [0, 0, 1, 1], [], []>} : vector<44x16xbf16>, vector<16x32xbf16>, vector<44x32xf32> -> vector<44x32xf32>
    %c0_3 = arith.constant 0 : index
    %c0_4 = arith.constant 0 : index
    %3 = vector.load %arg3[%c0_3, %c0_4] : memref<1x32xf32, #tpu.memory_space<vmem>>, vector<1x32xf32>
    %4 = vector.broadcast %3 : vector<1x32xf32> to vector<44x32xf32>
    %5 = arith.addf %2, %4 : vector<44x32xf32>
    %cst_5 = arith.constant 0.000000e+00 : f32
    %6 = vector.broadcast %cst_5 : f32 to vector<44x32xf32>
    %7 = arith.cmpf ogt, %5, %6 : vector<44x32xf32>
    %cst_6 = arith.constant 2.000000e-01 : f32
    %8 = vector.broadcast %cst_6 : f32 to vector<44x32xf32>
    %9 = arith.mulf %8, %5 : vector<44x32xf32>
    %10 = arith.select %7, %5, %9 : vector<44x32xi1>, vector<44x32xf32>
    %11 = arith.truncf %10 : vector<44x32xf32> to vector<44x32xbf16>
    %c0_7 = arith.constant 0 : index
    %c0_8 = arith.constant 0 : index
    %12 = vector.load %arg4[%c0_7, %c0_8] : memref<44x32xbf16, #tpu.memory_space<vmem>>, vector<44x32xbf16>
    tpu.vector_store %arg4[%c0_7, %c0_8], %11 {strides = array<i32>} : memref<44x32xbf16, #tpu.memory_space<vmem>>, vector<44x32xbf16>,
    return
  }
  func.func @transform_0(%arg0: i32) -> (i32, i32) {
    %c0_i32 = arith.constant 0 : i32
    %c0_i32_0 = arith.constant 0 : i32
    return %arg0, %c0_i32 : i32, i32
  }
  func.func @transform_1(%arg0: i32) -> (i32, i32) {
    %c0_i32 = arith.constant 0 : i32
    %c0_i32_0 = arith.constant 0 : i32
    %c0_i32_1 = arith.constant 0 : i32
    return %c0_i32, %c0_i32_0 : i32, i32
  }
  func.func @transform_2(%arg0: i32) -> (i32, i32) {
    %c0_i32 = arith.constant 0 : i32
    %c0_i32_0 = arith.constant 0 : i32
    %c0_i32_1 = arith.constant 0 : i32
    return %c0_i32, %c0_i32_0 : i32, i32
  }
  func.func @transform_3(%arg0: i32) -> (i32, i32) {
    %c0_i32 = arith.constant 0 : i32
    %c0_i32_0 = arith.constant 0 : i32
    return %arg0, %c0_i32 : i32, i32
  }
}

module attributes {stable_mosaic.version = 11 : i64} {
  func.func @_sync_tail_kernel(%arg0: i32, %arg1: memref<2x6144xbf16, #tpu.memory_space<vmem>>, %arg2: memref<2x1280xbf16, #tpu.memory_space<vmem>>, %arg3: memref<6144x256xbf16, #tpu.memory_space<vmem>>, %arg4: memref<1x256xf32, #tpu.memory_space<vmem>>, %arg5: memref<1280x256xbf16, #tpu.memory_space<vmem>>, %arg6: memref<1x256xf32, #tpu.memory_space<vmem>>, %arg7: memref<1x256xf32, #tpu.memory_space<vmem>>, %arg8: memref<1x1xf32, #tpu.memory_space<vmem>>, %arg9: memref<2x1xf32, #tpu.memory_space<vmem>>) attributes {dimension_semantics = [#tpu.dimension_semantics<arbitrary>], iteration_bounds = array<i64: 1>, scalar_prefetch = 0 : i64, scratch_operands = 0 : i64, tpu.core_type = #tpu.core_type<tc>, window_params = [{pipeline_mode = #tpu.pipeline_mode<synchronous>, transform_indices = @transform_0, window_bounds = array<i64: 2, 6144>}, {pipeline_mode = #tpu.pipeline_mode<synchronous>, transform_indices = @transform_1, window_bounds = array<i64: 2, 1280>}, {pipeline_mode = #tpu.pipeline_mode<synchronous>, transform_indices = @transform_2, window_bounds = array<i64: 6144, 256>}, {pipeline_mode = #tpu.pipeline_mode<synchronous>, transform_indices = @transform_3, window_bounds = array<i64: 1, 256>}, {pipeline_mode = #tpu.pipeline_mode<synchronous>, transform_indices = @transform_4, window_bounds = array<i64: 1280, 256>}, {pipeline_mode = #tpu.pipeline_mode<synchronous>, transform_indices = @transform_5, window_bounds = array<i64: 1, 256>}, {pipeline_mode = #tpu.pipeline_mode<synchronous>, transform_indices = @transform_6, window_bounds = array<i64: 1, 256>}, {pipeline_mode = #tpu.pipeline_mode<synchronous>, transform_indices = @transform_7, window_bounds = array<i64: 1, 1>}, {pipeline_mode = #tpu.pipeline_mode<synchronous>, transform_indices = @transform_8, window_bounds = array<i64: 2, 1>}]} {
    %c0 = arith.constant 0 : index
    %c0_0 = arith.constant 0 : index
    %0 = vector.load %arg1[%c0, %c0_0] : memref<2x6144xbf16, #tpu.memory_space<vmem>>, vector<2x6144xbf16>
    %c0_1 = arith.constant 0 : index
    %c0_2 = arith.constant 0 : index
    %1 = vector.load %arg3[%c0_1, %c0_2] : memref<6144x256xbf16, #tpu.memory_space<vmem>>, vector<6144x256xbf16>
    %cst = arith.constant dense<0.000000e+00> : vector<2x256xf32>
    %2 = tpu.matmul %0, %1, %cst {dimension_numbers = #tpu.dot_dimension_numbers<[1], [0], [0], [1], [0, 0, 1, 1], [], []>} : vector<2x6144xbf16>, vector<6144x256xbf16>, vector<2x256xf32> -> vector<2x256xf32>
    %c0_3 = arith.constant 0 : index
    %c0_4 = arith.constant 0 : index
    %3 = vector.load %arg4[%c0_3, %c0_4] : memref<1x256xf32, #tpu.memory_space<vmem>>, vector<1x256xf32>
    %4 = vector.broadcast %3 : vector<1x256xf32> to vector<2x256xf32>
    %5 = arith.addf %2, %4 : vector<2x256xf32>
    %c0_5 = arith.constant 0 : index
    %c0_6 = arith.constant 0 : index
    %6 = vector.load %arg2[%c0_5, %c0_6] : memref<2x1280xbf16, #tpu.memory_space<vmem>>, vector<2x1280xbf16>
    %c0_7 = arith.constant 0 : index
    %c0_8 = arith.constant 0 : index
    %7 = vector.load %arg5[%c0_7, %c0_8] : memref<1280x256xbf16, #tpu.memory_space<vmem>>, vector<1280x256xbf16>
    %cst_9 = arith.constant dense<0.000000e+00> : vector<2x256xf32>
    %8 = tpu.matmul %6, %7, %cst_9 {dimension_numbers = #tpu.dot_dimension_numbers<[1], [0], [0], [1], [0, 0, 1, 1], [], []>} : vector<2x1280xbf16>, vector<1280x256xbf16>, vector<2x256xf32> -> vector<2x256xf32>
    %c0_10 = arith.constant 0 : index
    %c0_11 = arith.constant 0 : index
    %9 = vector.load %arg6[%c0_10, %c0_11] : memref<1x256xf32, #tpu.memory_space<vmem>>, vector<1x256xf32>
    %10 = vector.broadcast %9 : vector<1x256xf32> to vector<2x256xf32>
    %11 = arith.addf %8, %10 : vector<2x256xf32>
    %12 = arith.subf %5, %11 : vector<2x256xf32>
    %13 = arith.mulf %12, %12 : vector<2x256xf32>
    %c0_12 = arith.constant 0 : index
    %c0_13 = arith.constant 0 : index
    %14 = vector.load %arg7[%c0_12, %c0_13] : memref<1x256xf32, #tpu.memory_space<vmem>>, vector<1x256xf32>
    %15 = vector.broadcast %14 : vector<1x256xf32> to vector<2x256xf32>
    %16 = arith.mulf %13, %15 : vector<2x256xf32>
    %cst_14 = arith.constant dense<0.000000e+00> : vector<2xf32>
    %17 = vector.multi_reduction <add>, %16, %cst_14 [1] : vector<2x256xf32> to vector<2xf32>
    %18 = vector.shape_cast %17 : vector<2xf32> to vector<2x1xf32>
    %c0_15 = arith.constant 0 : index
    %c0_16 = arith.constant 0 : index
    %19 = vector.load %arg8[%c0_15, %c0_16] : memref<1x1xf32, #tpu.memory_space<vmem>>, vector<1x1xf32>
    %20 = vector.broadcast %19 : vector<1x1xf32> to vector<2x1xf32>
    %21 = arith.addf %18, %20 : vector<2x1xf32>
    %cst_17 = arith.constant 0.000000e+00 : f32
    %22 = vector.broadcast %cst_17 : f32 to vector<2x1xf32>
    %23 = arith.subf %22, %21 : vector<2x1xf32>
    %24 = math.exp %23 : vector<2x1xf32>
    %cst_18 = arith.constant 1.000000e+00 : f32
    %25 = vector.broadcast %cst_18 : f32 to vector<2x1xf32>
    %26 = arith.addf %25, %24 : vector<2x1xf32>
    %cst_19 = arith.constant 1.000000e+00 : f32
    %27 = vector.broadcast %cst_19 : f32 to vector<2x1xf32>
    %28 = arith.divf %27, %26 : vector<2x1xf32>
    %c0_20 = arith.constant 0 : index
    %c0_21 = arith.constant 0 : index
    %29 = vector.load %arg9[%c0_20, %c0_21] : memref<2x1xf32, #tpu.memory_space<vmem>>, vector<2x1xf32>
    tpu.vector_store %arg9[%c0_20, %c0_21], %28 {strides = array<i32>} : memref<2x1xf32, #tpu.memory_space<vmem>>, vector<2x1xf32>,
    return
  }
  func.func @transform_0(%arg0: i32) -> (i32, i32) {
    %c0_i32 = arith.constant 0 : i32
    %c0_i32_0 = arith.constant 0 : i32
    %c0_i32_1 = arith.constant 0 : i32
    return %c0_i32, %c0_i32_0 : i32, i32
  }
  func.func @transform_1(%arg0: i32) -> (i32, i32) {
    %c0_i32 = arith.constant 0 : i32
    %c0_i32_0 = arith.constant 0 : i32
    %c0_i32_1 = arith.constant 0 : i32
    return %c0_i32, %c0_i32_0 : i32, i32
  }
  func.func @transform_2(%arg0: i32) -> (i32, i32) {
    %c0_i32 = arith.constant 0 : i32
    %c0_i32_0 = arith.constant 0 : i32
    %c0_i32_1 = arith.constant 0 : i32
    return %c0_i32, %c0_i32_0 : i32, i32
  }
  func.func @transform_3(%arg0: i32) -> (i32, i32) {
    %c0_i32 = arith.constant 0 : i32
    %c0_i32_0 = arith.constant 0 : i32
    %c0_i32_1 = arith.constant 0 : i32
    return %c0_i32, %c0_i32_0 : i32, i32
  }
  func.func @transform_4(%arg0: i32) -> (i32, i32) {
    %c0_i32 = arith.constant 0 : i32
    %c0_i32_0 = arith.constant 0 : i32
    %c0_i32_1 = arith.constant 0 : i32
    return %c0_i32, %c0_i32_0 : i32, i32
  }
  func.func @transform_5(%arg0: i32) -> (i32, i32) {
    %c0_i32 = arith.constant 0 : i32
    %c0_i32_0 = arith.constant 0 : i32
    %c0_i32_1 = arith.constant 0 : i32
    return %c0_i32, %c0_i32_0 : i32, i32
  }
  func.func @transform_6(%arg0: i32) -> (i32, i32) {
    %c0_i32 = arith.constant 0 : i32
    %c0_i32_0 = arith.constant 0 : i32
    %c0_i32_1 = arith.constant 0 : i32
    return %c0_i32, %c0_i32_0 : i32, i32
  }
  func.func @transform_7(%arg0: i32) -> (i32, i32) {
    %c0_i32 = arith.constant 0 : i32
    %c0_i32_0 = arith.constant 0 : i32
    %c0_i32_1 = arith.constant 0 : i32
    return %c0_i32, %c0_i32_0 : i32, i32
  }
  func.func @transform_8(%arg0: i32) -> (i32, i32) {
    %c0_i32 = arith.constant 0 : i32
    %c0_i32_0 = arith.constant 0 : i32
    %c0_i32_1 = arith.constant 0 : i32
    return %c0_i32, %c0_i32_0 : i32, i32
  }
}

module attributes {stable_mosaic.version = 11 : i64} {
  func.func @_matmul_bias_act_kernel(%arg0: i32, %arg1: memref<20x128xbf16, #tpu.memory_space<vmem>>, %arg2: memref<128x128xbf16, #tpu.memory_space<vmem>>, %arg3: memref<1x128xf32, #tpu.memory_space<vmem>>, %arg4: memref<20x128xbf16, #tpu.memory_space<vmem>>) attributes {dimension_semantics = [#tpu.dimension_semantics<parallel>], iteration_bounds = array<i64: 1>, scalar_prefetch = 0 : i64, scratch_operands = 0 : i64, tpu.core_type = #tpu.core_type<tc>, window_params = [{transform_indices = @transform_0, window_bounds = array<i64: 20, 128>}, {pipeline_mode = #tpu.pipeline_mode<synchronous>, transform_indices = @transform_1, window_bounds = array<i64: 128, 128>}, {pipeline_mode = #tpu.pipeline_mode<synchronous>, transform_indices = @transform_2, window_bounds = array<i64: 1, 128>}, {transform_indices = @transform_3, window_bounds = array<i64: 20, 128>}]} {
    %c0 = arith.constant 0 : index
    %c0_0 = arith.constant 0 : index
    %0 = vector.load %arg1[%c0, %c0_0] : memref<20x128xbf16, #tpu.memory_space<vmem>>, vector<20x128xbf16>
    %c0_1 = arith.constant 0 : index
    %c0_2 = arith.constant 0 : index
    %1 = vector.load %arg2[%c0_1, %c0_2] : memref<128x128xbf16, #tpu.memory_space<vmem>>, vector<128x128xbf16>
    %cst = arith.constant dense<0.000000e+00> : vector<20x128xf32>
    %2 = tpu.matmul %0, %1, %cst {dimension_numbers = #tpu.dot_dimension_numbers<[1], [0], [0], [1], [0, 0, 1, 1], [], []>} : vector<20x128xbf16>, vector<128x128xbf16>, vector<20x128xf32> -> vector<20x128xf32>
    %c0_3 = arith.constant 0 : index
    %c0_4 = arith.constant 0 : index
    %3 = vector.load %arg3[%c0_3, %c0_4] : memref<1x128xf32, #tpu.memory_space<vmem>>, vector<1x128xf32>
    %4 = vector.broadcast %3 : vector<1x128xf32> to vector<20x128xf32>
    %5 = arith.addf %2, %4 : vector<20x128xf32>
    %cst_5 = arith.constant 0.000000e+00 : f32
    %6 = vector.broadcast %cst_5 : f32 to vector<20x128xf32>
    %7 = arith.cmpf ogt, %5, %6 : vector<20x128xf32>
    %cst_6 = arith.constant 2.000000e-01 : f32
    %8 = vector.broadcast %cst_6 : f32 to vector<20x128xf32>
    %9 = arith.mulf %8, %5 : vector<20x128xf32>
    %10 = arith.select %7, %5, %9 : vector<20x128xi1>, vector<20x128xf32>
    %11 = arith.truncf %10 : vector<20x128xf32> to vector<20x128xbf16>
    %c0_7 = arith.constant 0 : index
    %c0_8 = arith.constant 0 : index
    %12 = vector.load %arg4[%c0_7, %c0_8] : memref<20x128xbf16, #tpu.memory_space<vmem>>, vector<20x128xbf16>
    tpu.vector_store %arg4[%c0_7, %c0_8], %11 {strides = array<i32>} : memref<20x128xbf16, #tpu.memory_space<vmem>>, vector<20x128xbf16>,
    return
  }
  func.func @transform_0(%arg0: i32) -> (i32, i32) {
    %c0_i32 = arith.constant 0 : i32
    %c0_i32_0 = arith.constant 0 : i32
    return %arg0, %c0_i32 : i32, i32
  }
  func.func @transform_1(%arg0: i32) -> (i32, i32) {
    %c0_i32 = arith.constant 0 : i32
    %c0_i32_0 = arith.constant 0 : i32
    %c0_i32_1 = arith.constant 0 : i32
    return %c0_i32, %c0_i32_0 : i32, i32
  }
  func.func @transform_2(%arg0: i32) -> (i32, i32) {
    %c0_i32 = arith.constant 0 : i32
    %c0_i32_0 = arith.constant 0 : i32
    %c0_i32_1 = arith.constant 0 : i32
    return %c0_i32, %c0_i32_0 : i32, i32
  }
  func.func @transform_3(%arg0: i32) -> (i32, i32) {
    %c0_i32 = arith.constant 0 : i32
    %c0_i32_0 = arith.constant 0 : i32
    return %arg0, %c0_i32 : i32, i32
  }
}

</mosaic_0001>

<bundles_post_ra>
// kernel: _lambda_.5
= control target key start
LH: loop header
LB: loop body
LE: loop exit
PB: predicated region body
PF: predicated region fallthrough
CT: control target
= control target key end

     0   :  { %s1757_s12 = smov 0   ;;  %s1759_s13 = smov 0   ;;  %s2158_s0 = inlined_call_operand.vmem [shape: bf16[648,240], index: 0, kind: input, shape index: {}]   ;;  %s2159_s1 = inlined_call_operand.vmem [shape: bf16[240,16], index: 1, kind: input, shape index: {}]   ;;  %s2160_s2 = inlined_call_operand.vmem [shape: f32[1,16], index: 2, kind: input, shape index: {}]   ;;  %s2161_s3 = inlined_call_operand.vmem [shape: bf16[648,16], index: 3, kind: output, shape index: {}]  }
   0x1   :  { %s1761_s14 = smov 0  }
   0x2 LB: > { %s1770_s15 = sadd.s32 4294967295, %s1702_s14   ;;  %s1772_s16 = sadd.s32 1, %s1702_s14   ;;  %s1702_s14 = sphi %s1761_s14, %s2168_s14   ;;  %s1698_s13 = sphi %s1759_s13, %s2167_s13   ;;  %s1694_s12 = sphi %s1757_s12, %s2166_s12  }
   0x3   : > { %s85_s17 = ssub.s32 %s1702_s14, %s1772_s16  ;;  %s88_s18 = sadd.s32 1, %s1698_s13 }
   0x4   : > { %p86_p0 = scmp.eq.s32.totalorder %s85_s17, 0  ;;  %p98_p1 = scmp.ne.s32.totalorder %s1698_s13, %s1694_s12 }
   0x5   : > { %p99_p2 = scmp.eq.s32.totalorder %s1770_s15, 2  ;;  %p1312_p3 = scmp.ge.s32.totalorder %s1702_s14, 1 }
   0x6   : > { %s1780_s19 = scalar_select %p86_p0, %s1698_s13, %s88_s18  }
   0x7   : > { %p1782_p4 = por %p99_p2, %p98_p1  ;;  %p149_p5 = scmp.lt.s32.totalorder %s1702_s14, 4 }
   0x9   : > { %p150_p6 = pnand %p1312_p3, %p149_p5 }
   0xa   : > { %v1585_v0 = vld [vmem:[%s2159_s1] sm:$0xff] (!%p150_p6)   ;;  %v1736_v1 = vmov (!%p150_p6), 0   ;;  %s1792_s23 = sshll.u32 (!%p150_p6), %s1770_s15, 5  ;;  %v1586_v2 = vld [vmem:[%s2159_s1 + $0x8] sm:$0xff] (!%p150_p6)   ;;  %v1587_v3 = vld [vmem:[%s2159_s1 + $0x10] sm:$0xff] (!%p150_p6)   ;;  %vm504_vm0 = vcmask (!%p150_p6), 916480  }
   0xb   : > { %153 = sbr.rel (%p150_p6) target bundleno = 420 (0x1a4), region = 32  ;;  %553 = vmatprep.subr.bf16.mxu0 (!%p150_p6), %v1736_v1  ;;  %1466 = vmatprep.subr.bf16.mxu1 (!%p150_p6), %v1736_v1  ;;  %p184_p7 = scmp.lt.s32.totalorder (!%p150_p6), %s1792_s23, 80  ;;  %v1588_v4 = vld [vmem:[%s2159_s1 + $0x18] sm:$0xff] (!%p150_p6)   ;;  %v1589_v5 = vld [vmem:[%s2159_s1 + $0x20] sm:$0xff] (!%p150_p6)   ;;  %v1590_v8 = vld [vmem:[%s2159_s1 + $0x28] sm:$0xff] (!%p150_p6)   ;;  %vm938_vm3 = vcmask (!%p150_p6), 125952  }
   0xc   : > { %554 = vmatpush1.bf16.msra.mxu0 (!%p150_p6), %v1585_v0  ;;  %1481 = vmatpush1.bf16.msra.mxu1 (!%p150_p6), %v1585_v0  ;;  %v1591_v9 = vld [vmem:[%s2159_s1 + $0x30] sm:$0xff] (!%p150_p6)   ;;  %v1592_v10 = vld [vmem:[%s2159_s1 + $0x38] sm:$0xff] (!%p150_p6)   ;;  %v1593_v11 = vld [vmem:[%s2159_s1 + $0x40] sm:$0xff] (!%p150_p6)   ;;  %s175_s17 = sand.u32 (!%p150_p6), 1, %s1694_s12  }
   0xd   : > { %555 = vmatprep.subr.bf16.mxu0 (!%p150_p6), %v1736_v1  ;;  %1467 = vmatprep.subr.bf16.mxu1 (!%p150_p6), %v1736_v1  ;;  %v1594_v12 = vld [vmem:[%s2159_s1 + $0x48] sm:$0xff] (!%p150_p6)   ;;  %v1595_v13 = vld [vmem:[%s2159_s1 + $0x50] sm:$0xff] (!%p150_p6)   ;;  %v1596_v14 = vld [vmem:[%s2159_s1 + $0x58] sm:$0xff] (!%p150_p6)   ;;  %s1313_s18 = sshll.u32 (!%p150_p6), %s175_s17, 7 }
   0xe   : > { %v1597_v15 = vld [vmem:[%s2159_s1 + $0x60] sm:$0xff] (!%p150_p6)   ;;  %v1598_v16 = vld [vmem:[%s2159_s1 + $0x68] sm:$0xff] (!%p150_p6)   ;;  %v1599_v17 = vld [vmem:[%s2159_s1 + $0x70] sm:$0xff] (!%p150_p6)   ;;  %s1929_s12 = scalar_lea.vmem (!%p150_p6), [#allocation2], %s1313_s18  }
   0xf   : > { %v1922_v48 = vld [vmem:[%s2160_s2] ss:$0 sm:$0xff] (!%p150_p6) }
  0x10   : > { %556 = vmatpush1.bf16.msra.mxu0 (!%p150_p6), %v1586_v2  ;;  %1482 = vmatpush1.bf16.msra.mxu1 (!%p150_p6), %v1586_v2 }
  0x11   : > { %557 = vmatprep.subr.bf16.mxu0 (!%p150_p6), %v1736_v1  ;;  %1468 = vmatprep.subr.bf16.mxu1 (!%p150_p6), %v1736_v1 }
  0x12   : > { %s185_s28 = scalar_select %p184_p7, %s1792_s23, 80 }
  0x13   : > { %s1463_s21 = sshll.u32 (%p1782_p4), %s1770_s15, 7 }
  0x14   : > { %558 = vmatpush1.bf16.msra.mxu0 %v1587_v3  ;;  %1483 = vmatpush1.bf16.msra.mxu1 %v1587_v3  ;;  %s1430_s4 = sshll.u32 %s185_s28, 3  ;;  %s2030_s25 = scalar_lea.vmem (%p1782_p4), %s2161_s3, %s1463_s21  }
  0x15   : > { %559 = vmatprep.subr.bf16.mxu0 %v1736_v1  ;;  %1469 = vmatprep.subr.bf16.mxu1 %v1736_v1  ;;  %s1814_s7 = scalar_lea.vmem %s2158_s0, %s1430_s4 }
  0x16   : > { %v1602_v6 = vld [vmem:[%s1814_s7 + $0x4] ss:$8 sps:$4 sm:$0xff]   ;;  %v1600_v18 = vld [vmem:[%s1814_s7] ss:$8 sps:$4 sm:$0xff]   ;;  %v1606_v20 = vld [vmem:[%s1814_s7 + $0x14] ss:$8 sps:$4 sm:$0xff]  }
  0x17   : > { %v1605_v7 = vld [vmem:[%s1814_s7 + $0x84] ss:$8 sps:$4 sm:$0xff]   ;;  %1365 = vmatprep.mubr.msk.bf16.mxu0 %vm504_vm0, %v1602_v6  ;;  %v1603_v19 = vld [vmem:[%s1814_s7 + $0x80] ss:$8 sps:$4 sm:$0xff]   ;;  %v1608_v21 = vld [vmem:[%s1814_s7 + $0x94] ss:$8 sps:$4 sm:$0xff]  }
  0x18   : > { %560 = vmatpush1.bf16.msra.mxu0 %v1588_v4  ;;  %1484 = vmatpush1.bf16.msra.mxu1 %v1588_v4  ;;  %v1610_v22 = vld [vmem:[%s1814_s7 + $0x10] ss:$8 sps:$4 sm:$0xff]   ;;  %v1612_v24 = vld [vmem:[%s1814_s7 + $0x24] ss:$8 sps:$4 sm:$0xff]   ;;  %v1616_v26 = vld [vmem:[%s1814_s7 + $0x20] ss:$8 sps:$4 sm:$0xff]  }
  0x19   : > { %561 = vmatprep.subr.bf16.mxu0 %v1736_v1  ;;  %1470 = vmatprep.subr.bf16.mxu1 %v1736_v1  ;;  %v1611_v23 = vld [vmem:[%s1814_s7 + $0x90] ss:$8 sps:$4 sm:$0xff]   ;;  %v1614_v25 = vld [vmem:[%s1814_s7 + $0xa4] ss:$8 sps:$4 sm:$0xff]   ;;  %v1617_v27 = vld [vmem:[%s1814_s7 + $0xa0] ss:$8 sps:$4 sm:$0xff]  }
  0x1a   : > { %1373 = vmatprep.mubr.msk.bf16.mxu1 %vm504_vm0, %v1605_v7  ;;  %v1618_v28 = vld [vmem:[%s1814_s7 + $0x34] ss:$8 sps:$4 sm:$0xff]   ;;  %v1622_v30 = vld [vmem:[%s1814_s7 + $0x30] ss:$8 sps:$4 sm:$0xff]   ;;  %v1624_v32 = vld [vmem:[%s1814_s7 + $0x44] ss:$8 sps:$4 sm:$0xff]  }
  0x1b   : > { %v1620_v29 = vld [vmem:[%s1814_s7 + $0xb4] ss:$8 sps:$4 sm:$0xff]   ;;  %v1623_v31 = vld [vmem:[%s1814_s7 + $0xb0] ss:$8 sps:$4 sm:$0xff]   ;;  %v1626_v33 = vld [vmem:[%s1814_s7 + $0xc4] ss:$8 sps:$4 sm:$0xff]  }
  0x1c   : > { %562 = vmatpush1.bf16.msra.mxu0 %v1589_v5  ;;  %1485 = vmatpush1.bf16.msra.mxu1 %v1589_v5  ;;  %v1628_v34 = vld [vmem:[%s1814_s7 + $0x40] ss:$8 sps:$4 sm:$0xff]   ;;  %v1630_v36 = vld [vmem:[%s1814_s7 + $0x54] ss:$8 sps:$4 sm:$0xff]   ;;  %v1634_v38 = vld [vmem:[%s1814_s7 + $0x50] ss:$8 sps:$4 sm:$0xff]  }
  0x1d   : > { %563 = vmatprep.subr.bf16.mxu0 %v1736_v1  ;;  %1471 = vmatprep.subr.bf16.mxu1 %v1736_v1  ;;  %v1629_v35 = vld [vmem:[%s1814_s7 + $0xc0] ss:$8 sps:$4 sm:$0xff]   ;;  %v1632_v37 = vld [vmem:[%s1814_s7 + $0xd4] ss:$8 sps:$4 sm:$0xff]   ;;  %v1635_v39 = vld [vmem:[%s1814_s7 + $0xd0] ss:$8 sps:$4 sm:$0xff]  }
  0x1e   : > { %v1636_v40 = vld [vmem:[%s1814_s7 + $0x64] ss:$8 sps:$4 sm:$0xff]   ;;  %v1640_v42 = vld [vmem:[%s1814_s7 + $0x60] ss:$8 sps:$4 sm:$0xff]   ;;  %v1642_v44 = vld [vmem:[%s1814_s7 + $0x74] ss:$8 sps:$4 sm:$0xff]  }
  0x1f   : > { %v1638_v41 = vld [vmem:[%s1814_s7 + $0xe4] ss:$8 sps:$4 sm:$0xff]   ;;  %v1641_v43 = vld [vmem:[%s1814_s7 + $0xe0] ss:$8 sps:$4 sm:$0xff]   ;;  %v1644_v45 = vld [vmem:[%s1814_s7 + $0xf4] ss:$8 sps:$4 sm:$0xff]  }
  0x20   : > { %564 = vmatpush1.bf16.msra.mxu0 %v1590_v8  ;;  %1486 = vmatpush1.bf16.msra.mxu1 %v1590_v8  ;;  %v1646_v46 = vld [vmem:[%s1814_s7 + $0x70] ss:$8 sps:$4 sm:$0xff]  }
  0x21   : > { %565 = vmatprep.subr.bf16.mxu0 %v1736_v1  ;;  %1472 = vmatprep.subr.bf16.mxu1 %v1736_v1  ;;  %v1647_v47 = vld [vmem:[%s1814_s7 + $0xf0] ss:$8 sps:$4 sm:$0xff]   ;;  %s979_s7 = ssub.s32 (%p1782_p4), 81, %s1792_s23 }
  0x22   : > { %p980_p8 = scmp.lt.s32.totalorder (%p1782_p4), %s979_s7, 32 }
  0x24   : > { %566 = vmatpush1.bf16.msra.mxu0 %v1591_v9  ;;  %1487 = vmatpush1.bf16.msra.mxu1 %v1591_v9 }
  0x25   : > { %567 = vmatprep.subr.bf16.mxu0 %v1736_v1  ;;  %1473 = vmatprep.subr.bf16.mxu1 %v1736_v1 }
  0x28   : > { %568 = vmatpush1.bf16.msra.mxu0 %v1592_v10  ;;  %1488 = vmatpush1.bf16.msra.mxu1 %v1592_v10 }
  0x29   : > { %569 = vmatprep.subr.bf16.mxu0 %v1736_v1  ;;  %1474 = vmatprep.subr.bf16.mxu1 %v1736_v1 }
  0x2c   : > { %570 = vmatpush1.bf16.msra.mxu0 %v1593_v11  ;;  %1489 = vmatpush1.bf16.msra.mxu1 %v1593_v11 }
  0x2d   : > { %571 = vmatprep.subr.bf16.mxu0 %v1736_v1  ;;  %1475 = vmatprep.subr.bf16.mxu1 %v1736_v1 }
  0x30   : > { %572 = vmatpush1.bf16.msra.mxu0 %v1594_v12  ;;  %1490 = vmatpush1.bf16.msra.mxu1 %v1594_v12 }
  0x31   : > { %573 = vmatprep.subr.bf16.mxu0 %v1736_v1  ;;  %1476 = vmatprep.subr.bf16.mxu1 %v1736_v1 }
  0x34   : > { %574 = vmatpush1.bf16.msra.mxu0 %v1595_v13  ;;  %1491 = vmatpush1.bf16.msra.mxu1 %v1595_v13 }
  0x35   : > { %575 = vmatprep.subr.bf16.mxu0 %v1736_v1  ;;  %1477 = vmatprep.subr.bf16.mxu1 %v1736_v1 }
  0x38   : > { %576 = vmatpush1.bf16.msra.mxu0 %v1596_v14  ;;  %1492 = vmatpush1.bf16.msra.mxu1 %v1596_v14 }
  0x39   : > { %577 = vmatprep.subr.bf16.mxu0 %v1736_v1  ;;  %1478 = vmatprep.subr.bf16.mxu1 %v1736_v1 }
  0x3c   : > { %578 = vmatpush1.bf16.msra.mxu0 %v1597_v15  ;;  %1493 = vmatpush1.bf16.msra.mxu1 %v1597_v15 }
  0x3d   : > { %579 = vmatprep.subr.bf16.mxu0 %v1736_v1  ;;  %1479 = vmatprep.subr.bf16.mxu1 %v1736_v1 }
  0x40   : > { %580 = vmatpush1.bf16.msra.mxu0 %v1598_v16  ;;  %1494 = vmatpush1.bf16.msra.mxu1 %v1598_v16 }
  0x41   : > { %581 = vmatprep.subr.bf16.mxu0 %v1736_v1  ;;  %1480 = vmatprep.subr.bf16.mxu1 %v1736_v1 }
  0x44   : > { %582 = vmatpush1.bf16.msra.mxu0 %v1599_v17  ;;  %1495 = vmatpush1.bf16.msra.mxu1 %v1599_v17 }
  0x47   : > { %586 = vmatmul.mubr.bf16.vlgmr.msra.gmra.mrb[0].mxu0 %v1600_v18  ;;  %650 = vmatmul.mubr.bf16.vlgmr.msra.gmra.mrb[0].mxu1 %v1603_v19 }
  0x48   : > { %1366 = vmatprep.mubr.msk.bf16.mxu0 %vm504_vm0, %v1606_v20  ;;  %1374 = vmatprep.mubr.msk.bf16.mxu1 %vm504_vm0, %v1608_v21 }
  0x4f   : > { %594 = vmatmul.mubr.bf16.gmra.mrb[4].mxu0 %v1610_v22  ;;  %658 = vmatmul.mubr.bf16.gmra.mrb[4].mxu1 %v1611_v23 }
  0x50   : > { %1367 = vmatprep.mubr.msk.bf16.mxu0 %vm504_vm0, %v1612_v24  ;;  %1375 = vmatprep.mubr.msk.bf16.mxu1 %vm504_vm0, %v1614_v25 }
  0x57   : > { %602 = vmatmul.mubr.bf16.gmra.mrb[8].mxu0 %v1616_v26  ;;  %666 = vmatmul.mubr.bf16.gmra.mrb[8].mxu1 %v1617_v27 }
  0x58   : > { %1368 = vmatprep.mubr.msk.bf16.mxu0 %vm504_vm0, %v1618_v28  ;;  %1376 = vmatprep.mubr.msk.bf16.mxu1 %vm504_vm0, %v1620_v29 }
  0x5f   : > { %610 = vmatmul.mubr.bf16.gmra.mrb[12].mxu0 %v1622_v30  ;;  %674 = vmatmul.mubr.bf16.gmra.mrb[12].mxu1 %v1623_v31 }
  0x60   : > { %1369 = vmatprep.mubr.msk.bf16.mxu0 %vm504_vm0, %v1624_v32  ;;  %1377 = vmatprep.mubr.msk.bf16.mxu1 %vm504_vm0, %v1626_v33 }
  0x67   : > { %618 = vmatmul.mubr.bf16.gmra.mrb[16].mxu0 %v1628_v34  ;;  %682 = vmatmul.mubr.bf16.gmra.mrb[16].mxu1 %v1629_v35 }
  0x68   : > { %1370 = vmatprep.mubr.msk.bf16.mxu0 %vm504_vm0, %v1630_v36  ;;  %1378 = vmatprep.mubr.msk.bf16.mxu1 %vm504_vm0, %v1632_v37 }
  0x6f   : > { %626 = vmatmul.mubr.bf16.gmra.mrb[20].mxu0 %v1634_v38  ;;  %690 = vmatmul.mubr.bf16.gmra.mrb[20].mxu1 %v1635_v39 }
  0x70   : > { %1371 = vmatprep.mubr.msk.bf16.mxu0 %vm504_vm0, %v1636_v40  ;;  %1379 = vmatprep.mubr.msk.bf16.mxu1 %vm504_vm0, %v1638_v41 }
  0x77   : > { %634 = vmatmul.mubr.bf16.gmra.mrb[24].mxu0 %v1640_v42  ;;  %698 = vmatmul.mubr.bf16.gmra.mrb[24].mxu1 %v1641_v43 }
  0x78   : > { %1372 = vmatprep.mubr.msk.bf16.mxu0 %vm504_vm0, %v1642_v44  ;;  %1380 = vmatprep.mubr.msk.bf16.mxu1 %vm504_vm0, %v1644_v45 }
  0x7f   : > { %642 = vmatmul.mubr.bf16.gmra.mrb[28].mxu0 %v1646_v46  ;;  %706 = vmatmul.mubr.bf16.gmra.mrb[28].mxu1 %v1647_v47 }
 0x11a   : > { %v587_v49 = vpop.f32.mrb[0].mxu0  ;;  %v651_v50 = vpop.f32.mrb[0].mxu1 }
 0x11b   : > { %v588_v51 = vadd.f32 %v1922_v48, %v587_v49  ;;  %v652_v52 = vadd.f32 %v1922_v48, %v651_v50  ;;  %v589_v53 = vpop.f32.mrb[1].mxu0  ;;  %v653_v54 = vpop.f32.mrb[1].mxu1 }
 0x11c   : > { %v590_v55 = vpop.f32.mrb[2].mxu0  ;;  %v654_v56 = vpop.f32.mrb[2].mxu1 }
 0x11d   : > { %vm714_vm1 = vcmp.gt.f32.partialorder %v588_v51, 0.0  ;;  %v746_v57 = vmul.f32 0.2, %v588_v51  ;;  %vm730_vm2 = vcmp.gt.f32.partialorder %v652_v52, 0.0  ;;  %v762_v58 = vmul.f32 0.2, %v652_v52 }
 0x11e   : > { %v591_v59 = vadd.f32 %v1922_v48, %v590_v55  ;;  %v655_v60 = vadd.f32 %v1922_v48, %v654_v56  ;;  %v592_v61 = vpop.f32.mrb[3].mxu0  ;;  %v656_v62 = vpop.f32.mrb[3].mxu1 }
 0x11f   : > { %v778_v63 = vsel %vm714_vm1, %v588_v51, %v746_v57  ;;  %v794_v0 = vsel %vm730_vm2, %v652_v52, %v762_v58 }
 0x120   : > { %v1431_v1 = vpack.c.bf16 %v778_v63, %v778_v63  ;;  %v1447_v2 = vpack.c.bf16 %v794_v0, %v794_v0  ;;  %vm715_vm4 = vcmp.gt.f32.partialorder %v591_v59, 0.0  ;;  %v747_v3 = vmul.f32 0.2, %v591_v59 }
 0x121   : > { %vm731_vm5 = vcmp.gt.f32.partialorder %v655_v60, 0.0  ;;  %v763_v4 = vmul.f32 0.2, %v655_v60 }
 0x122   : > { %939 = vst.msk [vmem:[%s1929_s12] sm:$0xf] %vm938_vm3, %v1431_v1  ;;  %955 = vst.msk [vmem:[%s1929_s12 + $0x40] sm:$0xf] %vm938_vm3, %v1447_v2  ;;  %v779_v5 = vsel %vm715_vm4, %v591_v59, %v747_v3  ;;  %v595_v6 = vpop.f32.mrb[4].mxu0  ;;  %v659_v7 = vpop.f32.mrb[4].mxu1 }
 0x123   : > { %v1432_v8 = vpack.c.bf16 %v779_v5, %v779_v5  ;;  %v795_v9 = vsel %vm731_vm5, %v655_v60, %v763_v4  ;;  %v596_v10 = vadd.f32 %v1922_v48, %v595_v6  ;;  %v660_v11 = vadd.f32 %v1922_v48, %v659_v7  ;;  %v597_v12 = vpop.f32.mrb[5].mxu0  ;;  %v661_v13 = vpop.f32.mrb[5].mxu1 }
 0x124   : > { %v1448_v14 = vpack.c.bf16 %v795_v9, %v795_v9  ;;  %v598_v15 = vpop.f32.mrb[6].mxu0  ;;  %v662_v16 = vpop.f32.mrb[6].mxu1 }
 0x125   : > { %940 = vst.msk [vmem:[%s1929_s12 + $0x4] sm:$0xf] %vm938_vm3, %v1432_v8  ;;  %vm716_vm6 = vcmp.gt.f32.partialorder %v596_v10, 0.0  ;;  %v748_v17 = vmul.f32 0.2, %v596_v10  ;;  %vm732_vm7 = vcmp.gt.f32.partialorder %v660_v11, 0.0  ;;  %v599_v19 = vadd.f32 %v1922_v48, %v598_v15 }
 0x126   : > { %v764_v18 = vmul.f32 0.2, %v660_v11  ;;  %956 = vst.msk [vmem:[%s1929_s12 + $0x44] sm:$0xf] %vm938_vm3, %v1448_v14  ;;  %v663_v20 = vadd.f32 %v1922_v48, %v662_v16  ;;  %v600_v21 = vpop.f32.mrb[7].mxu0  ;;  %v664_v22 = vpop.f32.mrb[7].mxu1 }
 0x127   : > { %v780_v23 = vsel %vm716_vm6, %v596_v10, %v748_v17  ;;  %vm717_vm8 = vcmp.gt.f32.partialorder %v599_v19, 0.0  ;;  %v749_v27 = vmul.f32 0.2, %v599_v19 }
 0x128   : > { %v796_v24 = vsel %vm732_vm7, %v660_v11, %v764_v18  ;;  %v1433_v25 = vpack.c.bf16 %v780_v23, %v780_v23  ;;  %vm733_vm9 = vcmp.gt.f32.partialorder %v663_v20, 0.0  ;;  %v765_v28 = vmul.f32 0.2, %v663_v20 }
 0x129   : > { %v1449_v26 = vpack.c.bf16 %v796_v24, %v796_v24  ;;  %v781_v29 = vsel %vm717_vm8, %v599_v19, %v749_v27 }
 0x12a   : > { %941 = vst.msk [vmem:[%s1929_s12 + $0x8] sm:$0xf] %vm938_vm3, %v1433_v25  ;;  %v603_v30 = vpop.f32.mrb[8].mxu0  ;;  %v667_v31 = vpop.f32.mrb[8].mxu1  ;;  %v1434_v32 = vpack.c.bf16 %v781_v29, %v781_v29  ;;  %v797_v33 = vsel %vm733_vm9, %v663_v20, %v765_v28 }
 0x12b   : > { %957 = vst.msk [vmem:[%s1929_s12 + $0x48] sm:$0xf] %vm938_vm3, %v1449_v26  ;;  %v604_v34 = vadd.f32 %v1922_v48, %v603_v30  ;;  %v668_v35 = vadd.f32 %v1922_v48, %v667_v31  ;;  %v605_v36 = vpop.f32.mrb[9].mxu0  ;;  %v669_v37 = vpop.f32.mrb[9].mxu1  ;;  %v1450_v38 = vpack.c.bf16 %v797_v33, %v797_v33 }
 0x12c   : > { %v606_v39 = vpop.f32.mrb[10].mxu0  ;;  %v670_v40 = vpop.f32.mrb[10].mxu1  ;;  %942 = vst.msk [vmem:[%s1929_s12 + $0xc] sm:$0xf] %vm938_vm3, %v1434_v32 }
 0x12d   : > { %vm718_vm10 = vcmp.gt.f32.partialorder %v604_v34, 0.0  ;;  %v750_v41 = vmul.f32 0.2, %v604_v34  ;;  %vm734_vm11 = vcmp.gt.f32.partialorder %v668_v35, 0.0  ;;  %v766_v42 = vmul.f32 0.2, %v668_v35 }
 0x12e   : > { %958 = vst.msk [vmem:[%s1929_s12 + $0x4c] sm:$0xf] %vm938_vm3, %v1450_v38  ;;  %v607_v43 = vadd.f32 %v1922_v48, %v606_v39  ;;  %v671_v44 = vadd.f32 %v1922_v48, %v670_v40  ;;  %v608_v45 = vpop.f32.mrb[11].mxu0  ;;  %v672_v46 = vpop.f32.mrb[11].mxu1 }
 0x12f   : > { %v782_v47 = vsel %vm718_vm10, %v604_v34, %v750_v41  ;;  %v798_v49 = vsel %vm734_vm11, %v668_v35, %v766_v42 }
 0x130   : > { %v1435_v50 = vpack.c.bf16 %v782_v47, %v782_v47  ;;  %v1451_v51 = vpack.c.bf16 %v798_v49, %v798_v49  ;;  %vm719_vm12 = vcmp.gt.f32.partialorder %v607_v43, 0.0  ;;  %v751_v52 = vmul.f32 0.2, %v607_v43 }
 0x131   : > { %vm735_vm13 = vcmp.gt.f32.partialorder %v671_v44, 0.0  ;;  %v767_v53 = vmul.f32 0.2, %v671_v44 }
 0x132   : > { %943 = vst.msk [vmem:[%s1929_s12 + $0x10] sm:$0xf] %vm938_vm3, %v1435_v50  ;;  %959 = vst.msk [vmem:[%s1929_s12 + $0x50] sm:$0xf] %vm938_vm3, %v1451_v51  ;;  %v783_v54 = vsel %vm719_vm12, %v607_v43, %v751_v52  ;;  %v611_v55 = vpop.f32.mrb[12].mxu0  ;;  %v675_v56 = vpop.f32.mrb[12].mxu1 }
 0x133   : > { %v1436_v57 = vpack.c.bf16 %v783_v54, %v783_v54  ;;  %v799_v58 = vsel %vm735_vm13, %v671_v44, %v767_v53  ;;  %v612_v59 = vadd.f32 %v1922_v48, %v611_v55  ;;  %v676_v60 = vadd.f32 %v1922_v48, %v675_v56  ;;  %v613_v61 = vpop.f32.mrb[13].mxu0  ;;  %v677_v62 = vpop.f32.mrb[13].mxu1 }
 0x134   : > { %v1452_v63 = vpack.c.bf16 %v799_v58, %v799_v58  ;;  %v614_v0 = vpop.f32.mrb[14].mxu0  ;;  %v678_v1 = vpop.f32.mrb[14].mxu1 }
 0x135   : > { %944 = vst.msk [vmem:[%s1929_s12 + $0x14] sm:$0xf] %vm938_vm3, %v1436_v57  ;;  %vm720_vm14 = vcmp.gt.f32.partialorder %v612_v59, 0.0  ;;  %v752_v2 = vmul.f32 0.2, %v612_v59  ;;  %vm736_vm15 = vcmp.gt.f32.partialorder %v676_v60, 0.0  ;;  %v615_v4 = vadd.f32 %v1922_v48, %v614_v0 }
 0x136   : > { %v768_v3 = vmul.f32 0.2, %v676_v60  ;;  %960 = vst.msk [vmem:[%s1929_s12 + $0x54] sm:$0xf] %vm938_vm3, %v1452_v63  ;;  %v679_v5 = vadd.f32 %v1922_v48, %v678_v1  ;;  %v616_v6 = vpop.f32.mrb[15].mxu0  ;;  %v680_v7 = vpop.f32.mrb[15].mxu1 }
 0x137   : > { %v784_v8 = vsel %vm720_vm14, %v612_v59, %v752_v2  ;;  %vm721_vm0 = vcmp.gt.f32.partialorder %v615_v4, 0.0  ;;  %v753_v12 = vmul.f32 0.2, %v615_v4 }
 0x138   : > { %v800_v9 = vsel %vm736_vm15, %v676_v60, %v768_v3  ;;  %v1437_v10 = vpack.c.bf16 %v784_v8, %v784_v8  ;;  %vm737_vm1 = vcmp.gt.f32.partialorder %v679_v5, 0.0  ;;  %v769_v13 = vmul.f32 0.2, %v679_v5 }
 0x139   : > { %v1453_v11 = vpack.c.bf16 %v800_v9, %v800_v9  ;;  %v785_v14 = vsel %vm721_vm0, %v615_v4, %v753_v12 }
 0x13a   : > { %945 = vst.msk [vmem:[%s1929_s12 + $0x18] sm:$0xf] %vm938_vm3, %v1437_v10  ;;  %v619_v15 = vpop.f32.mrb[16].mxu0  ;;  %v683_v16 = vpop.f32.mrb[16].mxu1  ;;  %v1438_v17 = vpack.c.bf16 %v785_v14, %v785_v14  ;;  %v801_v18 = vsel %vm737_vm1, %v679_v5, %v769_v13 }
 0x13b   : > { %961 = vst.msk [vmem:[%s1929_s12 + $0x58] sm:$0xf] %vm938_vm3, %v1453_v11  ;;  %v620_v19 = vadd.f32 %v1922_v48, %v619_v15  ;;  %v684_v20 = vadd.f32 %v1922_v48, %v683_v16  ;;  %v621_v21 = vpop.f32.mrb[17].mxu0  ;;  %v685_v22 = vpop.f32.mrb[17].mxu1  ;;  %v1454_v23 = vpack.c.bf16 %v801_v18, %v801_v18 }
 0x13c   : > { %v622_v24 = vpop.f32.mrb[18].mxu0  ;;  %v686_v25 = vpop.f32.mrb[18].mxu1  ;;  %946 = vst.msk [vmem:[%s1929_s12 + $0x1c] sm:$0xf] %vm938_vm3, %v1438_v17 }
 0x13d   : > { %vm722_vm2 = vcmp.gt.f32.partialorder %v620_v19, 0.0  ;;  %v754_v26 = vmul.f32 0.2, %v620_v19  ;;  %vm738_vm4 = vcmp.gt.f32.partialorder %v684_v20, 0.0  ;;  %v770_v27 = vmul.f32 0.2, %v684_v20 }
 0x13e   : > { %962 = vst.msk [vmem:[%s1929_s12 + $0x5c] sm:$0xf] %vm938_vm3, %v1454_v23  ;;  %v623_v28 = vadd.f32 %v1922_v48, %v622_v24  ;;  %v687_v29 = vadd.f32 %v1922_v48, %v686_v25  ;;  %v624_v30 = vpop.f32.mrb[19].mxu0  ;;  %v688_v31 = vpop.f32.mrb[19].mxu1 }
 0x13f   : > { %v786_v32 = vsel %vm722_vm2, %v620_v19, %v754_v26  ;;  %v802_v33 = vsel %vm738_vm4, %v684_v20, %v770_v27 }
 0x140   : > { %v1439_v34 = vpack.c.bf16 %v786_v32, %v786_v32  ;;  %v1455_v35 = vpack.c.bf16 %v802_v33, %v802_v33  ;;  %vm723_vm5 = vcmp.gt.f32.partialorder %v623_v28, 0.0  ;;  %v755_v36 = vmul.f32 0.2, %v623_v28 }
 0x141   : > { %vm739_vm6 = vcmp.gt.f32.partialorder %v687_v29, 0.0  ;;  %v771_v37 = vmul.f32 0.2, %v687_v29 }
 0x142   : > { %947 = vst.msk [vmem:[%s1929_s12 + $0x20] sm:$0xf] %vm938_vm3, %v1439_v34  ;;  %963 = vst.msk [vmem:[%s1929_s12 + $0x60] sm:$0xf] %vm938_vm3, %v1455_v35  ;;  %v787_v38 = vsel %vm723_vm5, %v623_v28, %v755_v36  ;;  %v627_v39 = vpop.f32.mrb[20].mxu0  ;;  %v691_v40 = vpop.f32.mrb[20].mxu1 }
 0x143   : > { %v1440_v41 = vpack.c.bf16 %v787_v38, %v787_v38  ;;  %v803_v42 = vsel %vm739_vm6, %v687_v29, %v771_v37  ;;  %v628_v43 = vadd.f32 %v1922_v48, %v627_v39  ;;  %v692_v44 = vadd.f32 %v1922_v48, %v691_v40  ;;  %v629_v45 = vpop.f32.mrb[21].mxu0  ;;  %v693_v46 = vpop.f32.mrb[21].mxu1 }
 0x144   : > { %v1456_v47 = vpack.c.bf16 %v803_v42, %v803_v42  ;;  %v630_v49 = vpop.f32.mrb[22].mxu0  ;;  %v694_v50 = vpop.f32.mrb[22].mxu1 }
 0x145   : > { %948 = vst.msk [vmem:[%s1929_s12 + $0x24] sm:$0xf] %vm938_vm3, %v1440_v41  ;;  %vm724_vm7 = vcmp.gt.f32.partialorder %v628_v43, 0.0  ;;  %v756_v51 = vmul.f32 0.2, %v628_v43  ;;  %vm740_vm8 = vcmp.gt.f32.partialorder %v692_v44, 0.0  ;;  %v631_v53 = vadd.f32 %v1922_v48, %v630_v49 }
 0x146   : > { %v772_v52 = vmul.f32 0.2, %v692_v44  ;;  %964 = vst.msk [vmem:[%s1929_s12 + $0x64] sm:$0xf] %vm938_vm3, %v1456_v47  ;;  %v695_v54 = vadd.f32 %v1922_v48, %v694_v50  ;;  %v632_v55 = vpop.f32.mrb[23].mxu0  ;;  %v696_v56 = vpop.f32.mrb[23].mxu1 }
 0x147   : > { %v788_v57 = vsel %vm724_vm7, %v628_v43, %v756_v51  ;;  %vm725_vm9 = vcmp.gt.f32.partialorder %v631_v53, 0.0  ;;  %v757_v61 = vmul.f32 0.2, %v631_v53 }
 0x148   : > { %v804_v58 = vsel %vm740_vm8, %v692_v44, %v772_v52  ;;  %v1441_v59 = vpack.c.bf16 %v788_v57, %v788_v57  ;;  %vm741_vm10 = vcmp.gt.f32.partialorder %v695_v54, 0.0  ;;  %v773_v62 = vmul.f32 0.2, %v695_v54 }
 0x149   : > { %v1457_v60 = vpack.c.bf16 %v804_v58, %v804_v58  ;;  %v789_v63 = vsel %vm725_vm9, %v631_v53, %v757_v61 }
 0x14a   : > { %949 = vst.msk [vmem:[%s1929_s12 + $0x28] sm:$0xf] %vm938_vm3, %v1441_v59  ;;  %v635_v0 = vpop.f32.mrb[24].mxu0  ;;  %v699_v1 = vpop.f32.mrb[24].mxu1  ;;  %v1442_v2 = vpack.c.bf16 %v789_v63, %v789_v63  ;;  %v805_v3 = vsel %vm741_vm10, %v695_v54, %v773_v62 }
 0x14b   : > { %965 = vst.msk [vmem:[%s1929_s12 + $0x68] sm:$0xf] %vm938_vm3, %v1457_v60  ;;  %v636_v4 = vadd.f32 %v1922_v48, %v635_v0  ;;  %v700_v5 = vadd.f32 %v1922_v48, %v699_v1  ;;  %v637_v6 = vpop.f32.mrb[25].mxu0  ;;  %v701_v7 = vpop.f32.mrb[25].mxu1  ;;  %v1458_v8 = vpack.c.bf16 %v805_v3, %v805_v3 }
 0x14c   : > { %v638_v9 = vpop.f32.mrb[26].mxu0  ;;  %v702_v10 = vpop.f32.mrb[26].mxu1  ;;  %950 = vst.msk [vmem:[%s1929_s12 + $0x2c] sm:$0xf] %vm938_vm3, %v1442_v2 }
 0x14d   : > { %vm726_vm11 = vcmp.gt.f32.partialorder %v636_v4, 0.0  ;;  %v758_v11 = vmul.f32 0.2, %v636_v4  ;;  %vm742_vm12 = vcmp.gt.f32.partialorder %v700_v5, 0.0  ;;  %v774_v12 = vmul.f32 0.2, %v700_v5 }
 0x14e   : > { %966 = vst.msk [vmem:[%s1929_s12 + $0x6c] sm:$0xf] %vm938_vm3, %v1458_v8  ;;  %v639_v13 = vadd.f32 %v1922_v48, %v638_v9  ;;  %v703_v14 = vadd.f32 %v1922_v48, %v702_v10  ;;  %v640_v15 = vpop.f32.mrb[27].mxu0  ;;  %v704_v16 = vpop.f32.mrb[27].mxu1 }
 0x14f   : > { %v790_v17 = vsel %vm726_vm11, %v636_v4, %v758_v11  ;;  %v806_v18 = vsel %vm742_vm12, %v700_v5, %v774_v12 }
 0x150   : > { %v1443_v19 = vpack.c.bf16 %v790_v17, %v790_v17  ;;  %v1459_v20 = vpack.c.bf16 %v806_v18, %v806_v18  ;;  %vm727_vm13 = vcmp.gt.f32.partialorder %v639_v13, 0.0  ;;  %v759_v21 = vmul.f32 0.2, %v639_v13 }
 0x151   : > { %vm743_vm14 = vcmp.gt.f32.partialorder %v703_v14, 0.0  ;;  %v775_v22 = vmul.f32 0.2, %v703_v14 }
 0x152   : > { %951 = vst.msk [vmem:[%s1929_s12 + $0x30] sm:$0xf] %vm938_vm3, %v1443_v19  ;;  %967 = vst.msk [vmem:[%s1929_s12 + $0x70] sm:$0xf] %vm938_vm3, %v1459_v20  ;;  %v791_v23 = vsel %vm727_vm13, %v639_v13, %v759_v21  ;;  %v643_v24 = vpop.f32.mrb[28].mxu0  ;;  %v707_v25 = vpop.f32.mrb[28].mxu1 }
 0x153   : > { %v1444_v26 = vpack.c.bf16 %v791_v23, %v791_v23  ;;  %v807_v27 = vsel %vm743_vm14, %v703_v14, %v775_v22  ;;  %v644_v28 = vadd.f32 %v1922_v48, %v643_v24  ;;  %v708_v29 = vadd.f32 %v1922_v48, %v707_v25  ;;  %v645_v30 = vpop.f32.mrb[29].mxu0  ;;  %v709_v31 = vpop.f32.mrb[29].mxu1 }
 0x154   : > { %v1460_v32 = vpack.c.bf16 %v807_v27, %v807_v27  ;;  %v646_v33 = vpop.f32.mrb[30].mxu0  ;;  %v710_v34 = vpop.f32.mrb[30].mxu1 }
 0x155   : > { %952 = vst.msk [vmem:[%s1929_s12 + $0x34] sm:$0xf] %vm938_vm3, %v1444_v26  ;;  %vm728_vm15 = vcmp.gt.f32.partialorder %v644_v28, 0.0  ;;  %v760_v35 = vmul.f32 0.2, %v644_v28  ;;  %vm744_vm0 = vcmp.gt.f32.partialorder %v708_v29, 0.0  ;;  %v647_v37 = vadd.f32 %v1922_v48, %v646_v33 }
 0x156   : > { %v776_v36 = vmul.f32 0.2, %v708_v29  ;;  %968 = vst.msk [vmem:[%s1929_s12 + $0x74] sm:$0xf] %vm938_vm3, %v1460_v32  ;;  %v711_v38 = vadd.f32 %v1922_v48, %v710_v34  ;;  %v648_v39 = vpop.f32.mrb[31].mxu0  ;;  %v712_v40 = vpop.f32.mrb[31].mxu1 }
 0x157   : > { %v792_v41 = vsel %vm728_vm15, %v644_v28, %v760_v35  ;;  %vm729_vm1 = vcmp.gt.f32.partialorder %v647_v37, 0.0  ;;  %v761_v45 = vmul.f32 0.2, %v647_v37  ;;  %977 = sbr.rel (!%p1782_p4) target bundleno = 420 (0x1a4), region = 36 }
 0x158   : > { %v808_v42 = vsel %vm744_vm0, %v708_v29, %v776_v36  ;;  %v1445_v43 = vpack.c.bf16 %v792_v41, %v792_v41  ;;  %vm745_vm2 = vcmp.gt.f32.partialorder %v711_v38, 0.0  ;;  %v777_v46 = vmul.f32 0.2, %v711_v38 }
 0x159   : > { %v1461_v44 = vpack.c.bf16 %v808_v42, %v808_v42  ;;  %v793_v47 = vsel %vm729_vm1, %v647_v37, %v761_v45 }
 0x15a   : > { %953 = vst.msk [vmem:[%s1929_s12 + $0x38] sm:$0xf] %vm938_vm3, %v1445_v43  ;;  %v1446_v49 = vpack.c.bf16 %v793_v47, %v793_v47  ;;  %v809_v50 = vsel %vm745_vm2, %v711_v38, %v777_v46 }
 0x15b   : > { %969 = vst.msk [vmem:[%s1929_s12 + $0x78] sm:$0xf] %vm938_vm3, %v1461_v44  ;;  %v1462_v48 = vpack.c.bf16 %v809_v50, %v809_v50 }
 0x15c   : > { %954 = vst.msk [vmem:[%s1929_s12 + $0x3c] sm:$0xf] %vm938_vm3, %v1446_v49 }
 0x15d   : > { %970 = vst.msk [vmem:[%s1929_s12 + $0x7c] sm:$0xf] %vm938_vm3, %v1462_v48 }
 0x15e   : > { %s2170_s7 = smov (!%p980_p8, %s979_s7), 32 }
 0x15f   : > { %s1415_s26 = sshll.u32 %s2170_s7, 6 }
 0x160   : > { %p1418_p9 = scmp.eq.s32.totalorder %s1415_s26, 0 }
 0x161   : > { %s2036_s27 = sshrl.u32 (!%p1418_p9), %s2170_s7, 5 }
 0x162   : > { %988 = sbr.rel (%p1418_p9) target bundleno = 420 (0x1a4), region = 40  ;;  %p1419_p10 = scmp.le.s32.totalorder (!%p1418_p9), %s2036_s27, 0 }
 0x169   : > { %1265 = sbr.rel (%p1419_p10) target bundleno = 399 (0x18f), region = 112  ;;  %s2163_s15 = smov (!%p1419_p10), %s2030_s25 }
 0x16a   : > { %s2164_s20 = smov (!%p1419_p10), %s1929_s12  ;;  %s2045_s23 = smov (!%p1419_p10), 0  }
 0x16b   : > { %s2047_s28 = smov (!%p1419_p10), 0  }
 0x170 LB: >> { %v1004_v51 = vld [vmem:[%s1710_s20] sm:$0xf]  ;;  %v1006_v52 = vld [vmem:[%s1710_s20 + $0x4] sm:$0xf]  ;;  %v1008_v53 = vld [vmem:[%s1710_s20 + $0x8] sm:$0xf]  ;;  %s1718_s28 = sphi %s2047_s28, %s998_s28   ;;  %s1714_s23 = sphi %s2045_s23, %s2165_s23   ;;  %s1710_s20 = sphi %s2164_s20, %s1073_s20   ;;  %s1706_s15 = sphi %s2163_s15, %s1074_s15  }
 0x171   : >> { %1005 = vst [vmem:[%s1706_s15] sm:$0xf] %v1004_v51  ;;  %1007 = vst [vmem:[%s1706_s15 + $0x4] sm:$0xf] %v1006_v52  ;;  %v1010_v54 = vld [vmem:[%s1710_s20 + $0xc] sm:$0xf]  ;;  %s1068_s29 = sadd.s32 1, %s1714_s23 }
 0x172   : >> { %1009 = vst [vmem:[%s1706_s15 + $0x8] sm:$0xf] %v1008_v53  ;;  %v1012_v55 = vld [vmem:[%s1710_s20 + $0x10] sm:$0xf]  ;;  %v1014_v56 = vld [vmem:[%s1710_s20 + $0x14] sm:$0xf]  ;;  %p1069_p11 = scmp.ge.s32.totalorder %s1068_s29, %s2036_s27 }
 0x173   : >> { %1011 = vst [vmem:[%s1706_s15 + $0xc] sm:$0xf] %v1010_v54  ;;  %1013 = vst [vmem:[%s1706_s15 + $0x10] sm:$0xf] %v1012_v55  ;;  %v1016_v57 = vld [vmem:[%s1710_s20 + $0x18] sm:$0xf] }
 0x174   : >> { %1015 = vst [vmem:[%s1706_s15 + $0x14] sm:$0xf] %v1014_v56  ;;  %v1018_v58 = vld [vmem:[%s1710_s20 + $0x1c] sm:$0xf]  ;;  %v1020_v59 = vld [vmem:[%s1710_s20 + $0x20] sm:$0xf] }
 0x175   : >> { %1017 = vst [vmem:[%s1706_s15 + $0x18] sm:$0xf] %v1016_v57  ;;  %1019 = vst [vmem:[%s1706_s15 + $0x1c] sm:$0xf] %v1018_v58  ;;  %v1022_v60 = vld [vmem:[%s1710_s20 + $0x24] sm:$0xf] }
 0x176   : >> { %1021 = vst [vmem:[%s1706_s15 + $0x20] sm:$0xf] %v1020_v59  ;;  %v1024_v61 = vld [vmem:[%s1710_s20 + $0x28] sm:$0xf]  ;;  %v1026_v62 = vld [vmem:[%s1710_s20 + $0x2c] sm:$0xf] }
 0x177   : >> { %1023 = vst [vmem:[%s1706_s15 + $0x24] sm:$0xf] %v1022_v60  ;;  %1025 = vst [vmem:[%s1706_s15 + $0x28] sm:$0xf] %v1024_v61  ;;  %v1028_v63 = vld [vmem:[%s1710_s20 + $0x30] sm:$0xf] }
 0x178   : >> { %1027 = vst [vmem:[%s1706_s15 + $0x2c] sm:$0xf] %v1026_v62  ;;  %v1030_v0 = vld [vmem:[%s1710_s20 + $0x34] sm:$0xf]  ;;  %v1032_v1 = vld [vmem:[%s1710_s20 + $0x38] sm:$0xf] }
 0x179   : >> { %1029 = vst [vmem:[%s1706_s15 + $0x30] sm:$0xf] %v1028_v63  ;;  %1031 = vst [vmem:[%s1706_s15 + $0x34] sm:$0xf] %v1030_v0  ;;  %v1034_v2 = vld [vmem:[%s1710_s20 + $0x3c] sm:$0xf] }
 0x17a   : >> { %1033 = vst [vmem:[%s1706_s15 + $0x38] sm:$0xf] %v1032_v1  ;;  %v1036_v3 = vld [vmem:[%s1710_s20 + $0x40] sm:$0xf]  ;;  %v1038_v4 = vld [vmem:[%s1710_s20 + $0x44] sm:$0xf] }
 0x17b   : >> { %1035 = vst [vmem:[%s1706_s15 + $0x3c] sm:$0xf] %v1034_v2  ;;  %1037 = vst [vmem:[%s1706_s15 + $0x40] sm:$0xf] %v1036_v3  ;;  %v1040_v5 = vld [vmem:[%s1710_s20 + $0x48] sm:$0xf] }
 0x17c   : >> { %1039 = vst [vmem:[%s1706_s15 + $0x44] sm:$0xf] %v1038_v4  ;;  %v1042_v6 = vld [vmem:[%s1710_s20 + $0x4c] sm:$0xf]  ;;  %v1044_v7 = vld [vmem:[%s1710_s20 + $0x50] sm:$0xf] }
 0x17d   : >> { %1041 = vst [vmem:[%s1706_s15 + $0x48] sm:$0xf] %v1040_v5  ;;  %1043 = vst [vmem:[%s1706_s15 + $0x4c] sm:$0xf] %v1042_v6  ;;  %v1046_v8 = vld [vmem:[%s1710_s20 + $0x54] sm:$0xf] }
 0x17e   : >> { %1045 = vst [vmem:[%s1706_s15 + $0x50] sm:$0xf] %v1044_v7  ;;  %v1048_v9 = vld [vmem:[%s1710_s20 + $0x58] sm:$0xf]  ;;  %v1050_v10 = vld [vmem:[%s1710_s20 + $0x5c] sm:$0xf] }
 0x17f   : >> { %1047 = vst [vmem:[%s1706_s15 + $0x54] sm:$0xf] %v1046_v8  ;;  %1049 = vst [vmem:[%s1706_s15 + $0x58] sm:$0xf] %v1048_v9  ;;  %v1052_v11 = vld [vmem:[%s1710_s20 + $0x60] sm:$0xf] }
 0x180   : >> { %1051 = vst [vmem:[%s1706_s15 + $0x5c] sm:$0xf] %v1050_v10  ;;  %v1054_v12 = vld [vmem:[%s1710_s20 + $0x64] sm:$0xf]  ;;  %v1056_v13 = vld [vmem:[%s1710_s20 + $0x68] sm:$0xf] }
 0x181   : >> { %1053 = vst [vmem:[%s1706_s15 + $0x60] sm:$0xf] %v1052_v11  ;;  %1055 = vst [vmem:[%s1706_s15 + $0x64] sm:$0xf] %v1054_v12  ;;  %v1058_v14 = vld [vmem:[%s1710_s20 + $0x6c] sm:$0xf] }
 0x182   : >> { %1057 = vst [vmem:[%s1706_s15 + $0x68] sm:$0xf] %v1056_v13  ;;  %v1060_v15 = vld [vmem:[%s1710_s20 + $0x70] sm:$0xf]  ;;  %v1062_v16 = vld [vmem:[%s1710_s20 + $0x74] sm:$0xf] }
 0x183   : >> { %1059 = vst [vmem:[%s1706_s15 + $0x6c] sm:$0xf] %v1058_v14  ;;  %1061 = vst [vmem:[%s1706_s15 + $0x70] sm:$0xf] %v1060_v15  ;;  %v1064_v17 = vld [vmem:[%s1710_s20 + $0x78] sm:$0xf] }
 0x184   : >> { %1063 = vst [vmem:[%s1706_s15 + $0x74] sm:$0xf] %v1062_v16  ;;  %v1066_v18 = vld [vmem:[%s1710_s20 + $0x7c] sm:$0xf]  ;;  %1065 = vst [vmem:[%s1706_s15 + $0x78] sm:$0xf] %v1064_v17 }
 0x185   : >> { %1067 = vst [vmem:[%s1706_s15 + $0x7c] sm:$0xf] %v1066_v18  ;;  %s2172_s29 = smov (%p1069_p11, %s1068_s29), 0  ;;  %s998_s28 = sadd.s32 1, %s1718_s28  }
 0x186   : >> { %s1420_s30 = sshll.u32 %s2172_s29, 7  ;;  %p997_p12 = scmp.ge.s32.totalorder %s998_s28, %s2036_s27 }
 0x187   : >> { %s1073_s20 = scalar_lea.vmem %s1929_s12, %s1420_s30 [#allocation2]   ;;  %s1074_s15 = scalar_lea.vmem %s2030_s25, %s1420_s30  }
 0x188   : >> { %s2165_s23 = smov %s2172_s29  ;;  %1000 = sbr.rel (!%p997_p12) target bundleno = 368 (0x170), region = 118 }
 0x18f PF: > { %s2140_s4 = sand.u32 31, %s2170_s7   ;;  %s1464_s5 = sshll.u32 %s2036_s27, 7 }
 0x190   : > { %s1079_s6 = scalar_lea.vmem %s1929_s12, %s1464_s5 [#allocation2]   ;;  %s1081_s8 = scalar_lea.vmem %s2030_s25, %s1464_s5  }
 0x191   : > { %p1425_p13 = scmp.le.s32.totalorder %s2140_s4, 0 }
 0x192   : > { %s1720_s9 = smov (!%p1425_p13), %s1081_s8   ;;  %s1724_s10 = smov (!%p1425_p13), %s1079_s6  }
 0x193   : > { %1279 = sbr.rel (%p1425_p13) target bundleno = 420 (0x1a4), region = 123  ;;  %s1728_s11 = smov (!%p1425_p13), 0  }
 0x194   : > { %s1732_s14 = smov (!%p1425_p13), 0  }
 0x19a LB: >> { %v1091_v19 = vld [vmem:[%s1726_s10] sm:$0xf]  ;;  %s1093_s17 = sadd.s32 1, %s1730_s11  ;;  %s1085_s14 = sadd.s32 1, %s1734_s14   ;;  %s1734_s14 = sphi %s1732_s14, %s1085_s14   ;;  %s1730_s11 = sphi %s1728_s11, %s1729_s11   ;;  %s1726_s10 = sphi %s1724_s10, %s1098_s10   ;;  %s1722_s9 = sphi %s1720_s9, %s1099_s9  }
 0x19b   : >> { %1092 = vst [vmem:[%s1722_s9] sm:$0xf] %v1091_v19  ;;  %p1094_p0 = scmp.ge.s32.totalorder %s1093_s17, %s2140_s4  ;;  %p1084_p1 = scmp.ge.s32.totalorder %s1085_s14, %s2140_s4 }
 0x19d   : >> { %s2174_s17 = smov (%p1094_p0, %s1093_s17), 0  ;;  %1087 = sbr.rel (!%p1084_p1) target bundleno = 410 (0x19a), region = 129 }
 0x19e   : >> { %s1426_s18 = sshll.u32 %s2174_s17, 2  ;;  %s1729_s11 = smov %s2174_s17  }
 0x19f   : >> { %s1098_s10 = scalar_lea.vmem %s1079_s6, %s1426_s18 [#allocation2]   ;;  %s1099_s9 = scalar_lea.vmem %s1081_s8, %s1426_s18  }
 0x1a4 PF: > { %p10_p2 = scmp.ge.s32.totalorder %s1772_s16, 5   ;;  %s2166_s12 = smov %s1698_s13 }
 0x1a5   : > { %s2167_s13 = smov %s1780_s19  ;;  %s2168_s14 = smov %s1772_s16 }
 0x1a6   :  { %12 = sbr.rel (!%p10_p2) target bundleno = 2 (0x2), region = 140 }

// kernel: _lambda_.6
= control target key start
LH: loop header
LB: loop body
LE: loop exit
PB: predicated region body
PF: predicated region fallthrough
CT: control target
= control target key end

     0   :  { %vm455_vm2 = vcmask 781312   ;;  %s862_s1 = inlined_call_operand.vmem [shape: bf16[256,96], index: 1, kind: input, shape index: {}]   ;;  %s863_s0 = inlined_call_operand.vmem [shape: bf16[128,256], index: 0, kind: input, shape index: {}]   ;;  %s864_s2 = inlined_call_operand.vmem [shape: f32[1,96], index: 2, kind: input, shape index: {}]   ;;  %s865_s3 = inlined_call_operand.vmem [shape: bf16[128,96], index: 3, kind: output, shape index: {}]  }
   0x1   :  { %v621_v0 = vld [vmem:[%s862_s1 + $0x40] sm:$0xff]   ;;  %v623_v2 = vld [vmem:[%s862_s1 + $0x48] sm:$0xff]   ;;  %v625_v4 = vld [vmem:[%s862_s1 + $0x50] sm:$0xff]  }
   0x2   :  { %v622_v1 = vld [vmem:[%s862_s1] sm:$0xff]   ;;  %541 = vmatprep.subr.bf16.mxu0 %v621_v0  ;;  %605 = vmatprep.subr.bf16.mxu1 %v621_v0  ;;  %v624_v3 = vld [vmem:[%s862_s1 + $0x8] sm:$0xff]   ;;  %v626_v5 = vld [vmem:[%s862_s1 + $0x10] sm:$0xff]  }
   0x3   :  { %542 = vmatpush3.bf16.msra.mxu0 %v622_v1  ;;  %613 = vmatpush3.bf16.msra.mxu1 %v622_v1  ;;  %v627_v6 = vld [vmem:[%s862_s1 + $0x58] sm:$0xff]   ;;  %v629_v8 = vld [vmem:[%s862_s1 + $0x60] sm:$0xff]   ;;  %v631_v10 = vld [vmem:[%s862_s1 + $0x68] sm:$0xff]  }
   0x4   :  { %543 = vmatprep.subr.bf16.mxu0 %v623_v2  ;;  %606 = vmatprep.subr.bf16.mxu1 %v623_v2  ;;  %v628_v7 = vld [vmem:[%s862_s1 + $0x18] sm:$0xff]   ;;  %v630_v9 = vld [vmem:[%s862_s1 + $0x20] sm:$0xff]   ;;  %v632_v13 = vld [vmem:[%s862_s1 + $0x28] sm:$0xff]  }
   0x5   :  { %v639_v11 = vld [vmem:[%s863_s0 + $0x4] ss:$8 sps:$4 sm:$0xff]   ;;  %v633_v14 = vld [vmem:[%s862_s1 + $0x70] sm:$0xff]   ;;  %v635_v16 = vld [vmem:[%s862_s1 + $0x78] sm:$0xff]  }
   0x6   :  { %v642_v12 = vld [vmem:[%s863_s0 + $0x44] ss:$8 sps:$4 sm:$0xff]   ;;  %278 = vmatprep.mubr.bf16.mxu0 %v639_v11  ;;  %v634_v15 = vld [vmem:[%s862_s1 + $0x30] sm:$0xff]   ;;  %v636_v17 = vld [vmem:[%s862_s1 + $0x38] sm:$0xff]  }
   0x7   :  { %544 = vmatpush3.bf16.msra.mxu0 %v624_v3  ;;  %614 = vmatpush3.bf16.msra.mxu1 %v624_v3  ;;  %v637_v18 = vld [vmem:[%s863_s0] ss:$8 sps:$4 sm:$0xff]   ;;  %v643_v20 = vld [vmem:[%s863_s0 + $0x14] ss:$8 sps:$4 sm:$0xff]   ;;  %v647_v22 = vld [vmem:[%s863_s0 + $0x10] ss:$8 sps:$4 sm:$0xff]  }
   0x8   :  { %545 = vmatprep.subr.bf16.mxu0 %v625_v4  ;;  %607 = vmatprep.subr.bf16.mxu1 %v625_v4  ;;  %v640_v19 = vld [vmem:[%s863_s0 + $0x40] ss:$8 sps:$4 sm:$0xff]   ;;  %v645_v21 = vld [vmem:[%s863_s0 + $0x54] ss:$8 sps:$4 sm:$0xff]   ;;  %v648_v23 = vld [vmem:[%s863_s0 + $0x50] ss:$8 sps:$4 sm:$0xff]  }
   0x9   :  { %310 = vmatprep.mubr.bf16.mxu1 %v642_v12  ;;  %v649_v24 = vld [vmem:[%s863_s0 + $0x24] ss:$8 sps:$4 sm:$0xff]   ;;  %v653_v26 = vld [vmem:[%s863_s0 + $0x20] ss:$8 sps:$4 sm:$0xff]   ;;  %v655_v28 = vld [vmem:[%s863_s0 + $0x34] ss:$8 sps:$4 sm:$0xff]  }
   0xa   :  { %v651_v25 = vld [vmem:[%s863_s0 + $0x64] ss:$8 sps:$4 sm:$0xff]   ;;  %v654_v27 = vld [vmem:[%s863_s0 + $0x60] ss:$8 sps:$4 sm:$0xff]   ;;  %v657_v29 = vld [vmem:[%s863_s0 + $0x74] ss:$8 sps:$4 sm:$0xff]  }
   0xb   :  { %546 = vmatpush3.bf16.msra.mxu0 %v626_v5  ;;  %615 = vmatpush3.bf16.msra.mxu1 %v626_v5  ;;  %v659_v30 = vld [vmem:[%s863_s0 + $0x30] ss:$8 sps:$4 sm:$0xff]   ;;  %v780_v34 = vld [vmem:[%s864_s2] ss:$0 sm:$0xff] }
   0xc   :  { %547 = vmatprep.subr.bf16.mxu0 %v627_v6  ;;  %608 = vmatprep.subr.bf16.mxu1 %v627_v6  ;;  %v660_v31 = vld [vmem:[%s863_s0 + $0x70] ss:$8 sps:$4 sm:$0xff]  }
   0xf   :  { %548 = vmatpush3.bf16.msra.mxu0 %v628_v7  ;;  %616 = vmatpush3.bf16.msra.mxu1 %v628_v7 }
  0x10   :  { %549 = vmatprep.subr.bf16.mxu0 %v629_v8  ;;  %609 = vmatprep.subr.bf16.mxu1 %v629_v8 }
  0x13   :  { %550 = vmatpush3.bf16.msra.mxu0 %v630_v9  ;;  %617 = vmatpush3.bf16.msra.mxu1 %v630_v9 }
  0x14   :  { %551 = vmatprep.subr.bf16.mxu0 %v631_v10  ;;  %610 = vmatprep.subr.bf16.mxu1 %v631_v10 }
  0x17   :  { %552 = vmatpush3.bf16.msra.mxu0 %v632_v13  ;;  %618 = vmatpush3.bf16.msra.mxu1 %v632_v13 }
  0x18   :  { %553 = vmatprep.subr.bf16.mxu0 %v633_v14  ;;  %611 = vmatprep.subr.bf16.mxu1 %v633_v14 }
  0x1b   :  { %554 = vmatpush3.bf16.msra.mxu0 %v634_v15  ;;  %619 = vmatpush3.bf16.msra.mxu1 %v634_v15 }
  0x1c   :  { %555 = vmatprep.subr.bf16.mxu0 %v635_v16  ;;  %612 = vmatprep.subr.bf16.mxu1 %v635_v16 }
  0x1f   :  { %556 = vmatpush3.bf16.msra.mxu0 %v636_v17  ;;  %620 = vmatpush3.bf16.msra.mxu1 %v636_v17 }
  0x22   :  { %279 = vmatmul.mubr.bf16.vlgmr.msra.gmra.mrb[0].mxu0 %v637_v18  ;;  %311 = vmatmul.mubr.bf16.vlgmr.msra.gmra.mrb[0].mxu1 %v640_v19 }
  0x23   :  { %286 = vmatprep.mubr.bf16.mxu0 %v643_v20  ;;  %318 = vmatprep.mubr.bf16.mxu1 %v645_v21 }
  0x2a   :  { %287 = vmatmul.mubr.bf16.gmra.mrb[4].mxu0 %v647_v22  ;;  %319 = vmatmul.mubr.bf16.gmra.mrb[4].mxu1 %v648_v23 }
  0x2b   :  { %294 = vmatprep.mubr.bf16.mxu0 %v649_v24  ;;  %326 = vmatprep.mubr.bf16.mxu1 %v651_v25 }
  0x32   :  { %295 = vmatmul.mubr.bf16.gmra.mrb[8].mxu0 %v653_v26  ;;  %327 = vmatmul.mubr.bf16.gmra.mrb[8].mxu1 %v654_v27 }
  0x33   :  { %302 = vmatprep.mubr.bf16.mxu0 %v655_v28  ;;  %334 = vmatprep.mubr.bf16.mxu1 %v657_v29 }
  0x3a   :  { %303 = vmatmul.mubr.bf16.gmra.mrb[12].mxu0 %v659_v30  ;;  %335 = vmatmul.mubr.bf16.gmra.mrb[12].mxu1 %v660_v31 }
  0xf5   :  { %v557_v32 = vpop.f32.mrb[0].mxu0  ;;  %v581_v33 = vpop.f32.mrb[0].mxu1 }
  0xf6   :  { %v558_v35 = vpop.f32.mrb[1].mxu0  ;;  %v582_v36 = vpop.f32.mrb[1].mxu1 }
  0xf7   :  { %v559_v37 = vadd.f32 %v558_v35, %v557_v32  ;;  %v583_v38 = vadd.f32 %v582_v36, %v581_v33  ;;  %v560_v39 = vpop.f32.mrb[2].mxu0  ;;  %v584_v40 = vpop.f32.mrb[2].mxu1 }
  0xf8   :  { %v561_v41 = vpop.f32.mrb[3].mxu0  ;;  %v585_v42 = vpop.f32.mrb[3].mxu1 }
  0xf9   :  { %v281_v43 = vadd.f32 %v559_v37, %v780_v34  ;;  %v313_v44 = vadd.f32 %v583_v38, %v780_v34  ;;  %v562_v45 = vadd.f32 %v561_v41, %v560_v39  ;;  %v586_v46 = vadd.f32 %v585_v42, %v584_v40 }
  0xfb   :  { %vm343_vm0 = vcmp.gt.f32.partialorder %v281_v43, 0.0  ;;  %v359_v47 = vmul.f32 0.2, %v281_v43  ;;  %vm351_vm1 = vcmp.gt.f32.partialorder %v313_v44, 0.0  ;;  %v367_v48 = vmul.f32 0.2, %v313_v44 }
  0xfc   :  { %v284_v49 = vadd.f32 %v562_v45, %v780_v34  ;;  %v316_v50 = vadd.f32 %v586_v46, %v780_v34 }
  0xfd   :  { %v375_v51 = vsel %vm343_vm0, %v281_v43, %v359_v47  ;;  %v383_v52 = vsel %vm351_vm1, %v313_v44, %v367_v48  ;;  %v563_v53 = vpop.f32.mrb[4].mxu0  ;;  %v587_v54 = vpop.f32.mrb[4].mxu1 }
  0xfe   :  { %v525_v55 = vpack.c.bf16 %v375_v51, %v375_v51  ;;  %v533_v56 = vpack.c.bf16 %v383_v52, %v383_v52  ;;  %vm344_vm3 = vcmp.gt.f32.partialorder %v284_v49, 0.0  ;;  %v360_v57 = vmul.f32 0.2, %v284_v49  ;;  %v564_v58 = vpop.f32.mrb[5].mxu0  ;;  %v588_v59 = vpop.f32.mrb[5].mxu1 }
  0xff   :  { %vm352_vm4 = vcmp.gt.f32.partialorder %v316_v50, 0.0  ;;  %v368_v60 = vmul.f32 0.2, %v316_v50  ;;  %v565_v61 = vadd.f32 %v564_v58, %v563_v53  ;;  %v589_v62 = vadd.f32 %v588_v59, %v587_v54  ;;  %v566_v63 = vpop.f32.mrb[6].mxu0  ;;  %v590_v0 = vpop.f32.mrb[6].mxu1 }
 0x100   :  { %456 = vst.msk [vmem:[%s865_s3] sm:$0xf] %vm455_vm2, %v525_v55  ;;  %464 = vst.msk [vmem:[%s865_s3 + $0x20] sm:$0xf] %vm455_vm2, %v533_v56  ;;  %v376_v1 = vsel %vm344_vm3, %v284_v49, %v360_v57  ;;  %v567_v2 = vpop.f32.mrb[7].mxu0  ;;  %v591_v3 = vpop.f32.mrb[7].mxu1 }
 0x101   :  { %v526_v4 = vpack.c.bf16 %v376_v1, %v376_v1  ;;  %v384_v5 = vsel %vm352_vm4, %v316_v50, %v368_v60  ;;  %v289_v6 = vadd.f32 %v565_v61, %v780_v34  ;;  %v321_v7 = vadd.f32 %v589_v62, %v780_v34 }
 0x102   :  { %v534_v8 = vpack.c.bf16 %v384_v5, %v384_v5  ;;  %v568_v9 = vadd.f32 %v567_v2, %v566_v63  ;;  %v592_v10 = vadd.f32 %v591_v3, %v590_v0 }
 0x103   :  { %457 = vst.msk [vmem:[%s865_s3 + $0x4] sm:$0xf] %vm455_vm2, %v526_v4  ;;  %vm345_vm5 = vcmp.gt.f32.partialorder %v289_v6, 0.0  ;;  %v361_v11 = vmul.f32 0.2, %v289_v6  ;;  %vm353_vm6 = vcmp.gt.f32.partialorder %v321_v7, 0.0 }
 0x104   :  { %v369_v12 = vmul.f32 0.2, %v321_v7  ;;  %465 = vst.msk [vmem:[%s865_s3 + $0x24] sm:$0xf] %vm455_vm2, %v534_v8  ;;  %v292_v13 = vadd.f32 %v568_v9, %v780_v34  ;;  %v324_v14 = vadd.f32 %v592_v10, %v780_v34 }
 0x105   :  { %v377_v15 = vsel %vm345_vm5, %v289_v6, %v361_v11  ;;  %v569_v17 = vpop.f32.mrb[8].mxu0  ;;  %v593_v18 = vpop.f32.mrb[8].mxu1 }
 0x106   :  { %v385_v16 = vsel %vm353_vm6, %v321_v7, %v369_v12  ;;  %v527_v19 = vpack.c.bf16 %v377_v15, %v377_v15  ;;  %vm346_vm7 = vcmp.gt.f32.partialorder %v292_v13, 0.0  ;;  %v362_v21 = vmul.f32 0.2, %v292_v13  ;;  %v570_v22 = vpop.f32.mrb[9].mxu0  ;;  %v594_v23 = vpop.f32.mrb[9].mxu1 }
 0x107   :  { %v535_v20 = vpack.c.bf16 %v385_v16, %v385_v16  ;;  %vm354_vm8 = vcmp.gt.f32.partialorder %v324_v14, 0.0  ;;  %v370_v24 = vmul.f32 0.2, %v324_v14  ;;  %v571_v25 = vadd.f32 %v570_v22, %v569_v17  ;;  %v572_v27 = vpop.f32.mrb[10].mxu0  ;;  %v596_v28 = vpop.f32.mrb[10].mxu1 }
 0x108   :  { %v595_v26 = vadd.f32 %v594_v23, %v593_v18  ;;  %458 = vst.msk [vmem:[%s865_s3 + $0x8] sm:$0xf] %vm455_vm2, %v527_v19  ;;  %v378_v29 = vsel %vm346_vm7, %v292_v13, %v362_v21  ;;  %v573_v30 = vpop.f32.mrb[11].mxu0  ;;  %v597_v31 = vpop.f32.mrb[11].mxu1 }
 0x109   :  { %466 = vst.msk [vmem:[%s865_s3 + $0x28] sm:$0xf] %vm455_vm2, %v535_v20  ;;  %v528_v32 = vpack.c.bf16 %v378_v29, %v378_v29  ;;  %v386_v33 = vsel %vm354_vm8, %v324_v14, %v370_v24  ;;  %v297_v35 = vadd.f32 %v571_v25, %v780_v34  ;;  %v574_v38 = vadd.f32 %v573_v30, %v572_v27 }
 0x10a   :  { %v329_v36 = vadd.f32 %v595_v26, %v780_v34  ;;  %v536_v37 = vpack.c.bf16 %v386_v33, %v386_v33  ;;  %v598_v39 = vadd.f32 %v597_v31, %v596_v28 }
 0x10b   :  { %459 = vst.msk [vmem:[%s865_s3 + $0xc] sm:$0xf] %vm455_vm2, %v528_v32  ;;  %vm347_vm9 = vcmp.gt.f32.partialorder %v297_v35, 0.0  ;;  %v363_v40 = vmul.f32 0.2, %v297_v35  ;;  %v300_v42 = vadd.f32 %v574_v38, %v780_v34 }
 0x10c   :  { %vm355_vm10 = vcmp.gt.f32.partialorder %v329_v36, 0.0  ;;  %v371_v41 = vmul.f32 0.2, %v329_v36  ;;  %467 = vst.msk [vmem:[%s865_s3 + $0x2c] sm:$0xf] %vm455_vm2, %v536_v37  ;;  %v332_v43 = vadd.f32 %v598_v39, %v780_v34 }
 0x10d   :  { %v379_v44 = vsel %vm347_vm9, %v297_v35, %v363_v40  ;;  %v575_v46 = vpop.f32.mrb[12].mxu0  ;;  %v599_v47 = vpop.f32.mrb[12].mxu1  ;;  %vm348_vm11 = vcmp.gt.f32.partialorder %v300_v42, 0.0  ;;  %v364_v50 = vmul.f32 0.2, %v300_v42 }
 0x10e   :  { %v387_v45 = vsel %vm355_vm10, %v329_v36, %v371_v41  ;;  %v529_v48 = vpack.c.bf16 %v379_v44, %v379_v44  ;;  %v576_v51 = vpop.f32.mrb[13].mxu0  ;;  %v600_v52 = vpop.f32.mrb[13].mxu1  ;;  %vm356_vm12 = vcmp.gt.f32.partialorder %v332_v43, 0.0  ;;  %v372_v53 = vmul.f32 0.2, %v332_v43 }
 0x10f   :  { %v537_v49 = vpack.c.bf16 %v387_v45, %v387_v45  ;;  %v577_v54 = vadd.f32 %v576_v51, %v575_v46  ;;  %v601_v55 = vadd.f32 %v600_v52, %v599_v47  ;;  %v578_v56 = vpop.f32.mrb[14].mxu0  ;;  %v602_v57 = vpop.f32.mrb[14].mxu1  ;;  %v380_v58 = vsel %vm348_vm11, %v300_v42, %v364_v50 }
 0x110   :  { %460 = vst.msk [vmem:[%s865_s3 + $0x10] sm:$0xf] %vm455_vm2, %v529_v48  ;;  %v579_v59 = vpop.f32.mrb[15].mxu0  ;;  %v603_v60 = vpop.f32.mrb[15].mxu1  ;;  %v530_v61 = vpack.c.bf16 %v380_v58, %v380_v58  ;;  %v388_v62 = vsel %vm356_vm12, %v332_v43, %v372_v53 }
 0x111   :  { %468 = vst.msk [vmem:[%s865_s3 + $0x30] sm:$0xf] %vm455_vm2, %v537_v49  ;;  %v305_v63 = vadd.f32 %v577_v54, %v780_v34  ;;  %v337_v0 = vadd.f32 %v601_v55, %v780_v34  ;;  %v538_v1 = vpack.c.bf16 %v388_v62, %v388_v62  ;;  %v580_v2 = vadd.f32 %v579_v59, %v578_v56 }
 0x112   :  { %v604_v3 = vadd.f32 %v603_v60, %v602_v57  ;;  %461 = vst.msk [vmem:[%s865_s3 + $0x14] sm:$0xf] %vm455_vm2, %v530_v61 }
 0x113   :  { %vm349_vm13 = vcmp.gt.f32.partialorder %v305_v63, 0.0  ;;  %v365_v4 = vmul.f32 0.2, %v305_v63  ;;  %vm357_vm14 = vcmp.gt.f32.partialorder %v337_v0, 0.0  ;;  %v373_v5 = vmul.f32 0.2, %v337_v0 }
 0x114   :  { %469 = vst.msk [vmem:[%s865_s3 + $0x34] sm:$0xf] %vm455_vm2, %v538_v1  ;;  %v308_v6 = vadd.f32 %v580_v2, %v780_v34  ;;  %v340_v7 = vadd.f32 %v604_v3, %v780_v34 }
 0x115   :  { %v381_v8 = vsel %vm349_vm13, %v305_v63, %v365_v4  ;;  %v389_v9 = vsel %vm357_vm14, %v337_v0, %v373_v5 }
 0x116   :  { %v531_v10 = vpack.c.bf16 %v381_v8, %v381_v8  ;;  %v539_v11 = vpack.c.bf16 %v389_v9, %v389_v9  ;;  %vm350_vm15 = vcmp.gt.f32.partialorder %v308_v6, 0.0  ;;  %v366_v12 = vmul.f32 0.2, %v308_v6 }
 0x117   :  { %vm358_vm0 = vcmp.gt.f32.partialorder %v340_v7, 0.0  ;;  %v374_v13 = vmul.f32 0.2, %v340_v7 }
 0x118   :  { %462 = vst.msk [vmem:[%s865_s3 + $0x18] sm:$0xf] %vm455_vm2, %v531_v10  ;;  %470 = vst.msk [vmem:[%s865_s3 + $0x38] sm:$0xf] %vm455_vm2, %v539_v11  ;;  %v382_v14 = vsel %vm350_vm15, %v308_v6, %v366_v12 }
 0x119   :  { %v532_v34 = vpack.c.bf16 %v382_v14, %v382_v14  ;;  %v390_v15 = vsel %vm358_vm0, %v340_v7, %v374_v13 }
 0x11a   :  { %v540_v16 = vpack.c.bf16 %v390_v15, %v390_v15 }
 0x11b   :  { %463 = vst.msk [vmem:[%s865_s3 + $0x1c] sm:$0xf] %vm455_vm2, %v532_v34 }
 0x11c   :  { %471 = vst.msk [vmem:[%s865_s3 + $0x3c] sm:$0xf] %vm455_vm2, %v540_v16 }

// kernel: _lambda_.7
= control target key start
LH: loop header
LB: loop body
LE: loop exit
PB: predicated region body
PF: predicated region fallthrough
CT: control target
= control target key end

     0   :  { %v218_v0 = vmov 0.0   ;;  %vm219_vm0 = vmmov 0   ;;  %vm51_vm1 = vcmask 130048   ;;  %vm160_vm4 = vcmask 257024   ;;  %s278_s1 = inlined_call_operand.vmem [shape: bf16[16,32], index: 1, kind: input, shape index: {}]   ;;  %s279_s0 = inlined_call_operand.vmem [shape: bf16[44,16], index: 0, kind: input, shape index: {}]   ;;  %s280_s2 = inlined_call_operand.vmem [shape: f32[1,32], index: 2, kind: input, shape index: {}]   ;;  %s281_s3 = inlined_call_operand.vmem [shape: bf16[44,32], index: 3, kind: output, shape index: {}]  }
   0x1   :  { %210 = vmatprep.subr.bf16.mxu1 %v218_v0  ;;  %v214_v1 = vld [vmem:[%s278_s1] sm:$0xff]   ;;  %202 = vmatprep.mubr.msk.bf16.mxu1 %vm219_vm0, %v218_v0  ;;  %v215_v2 = vld [vmem:[%s279_s0 + $0x8] sm:$0xff]   ;;  %v217_v4 = vld [vmem:[%s279_s0 + $0x10] sm:$0x3f]   ;;  %vm166_vm9 = vcmask 254976  }
   0x2   :  { %196 = vmatprep.subr.bf16.mxu0 %v218_v0  ;;  %198 = vmatprep.mubr.msk.bf16.mxu0 %vm219_vm0, %v218_v0  ;;  %v216_v3 = vld [vmem:[%s279_s0] sm:$0xff]  }
   0x3   :  { %211 = vmatpush3.bf16.msra.mxu1 %v214_v1  ;;  %197 = vmatpush3.bf16.msra.mxu0 %v214_v1  ;;  %v172_v5 = vld [vmem:[%s280_s2] ss:$0 sm:$0xff] }
   0x6   :  { %203 = vmatmul.mubr.msk.bf16.vlgmr.msra.gmra.mrb[0].mxu1 %vm51_vm1, %v215_v2  ;;  %199 = vmatmul.mubr.msk.bf16.vlgmr.msra.gmra.mrb[0].mxu0 %vm51_vm1, %v216_v3 }
   0x7   :  { %206 = vmatprep.mubr.msk.bf16.mxu1 %vm219_vm0, %v218_v0 }
   0xe   :  { %207 = vmatmul.mubr.msk.bf16.gmra.mrb[4].mxu1 %vm51_vm1, %v217_v4 }
  0xd9   :  { %v103_v6 = vpop.f32.mrb[0].mxu1  ;;  %v95_v7 = vpop.f32.mrb[0].mxu0 }
  0xda   :  { %v104_v8 = vadd.f32 %v172_v5, %v103_v6  ;;  %v204_v9 = vpop.f32.mrb[1].mxu1  ;;  %v96_v10 = vadd.f32 %v172_v5, %v95_v7  ;;  %v200_v11 = vpop.f32.mrb[1].mxu0 }
  0xdb   :  { %v106_v12 = vpop.f32.mrb[2].mxu1  ;;  %v98_v13 = vpop.f32.mrb[2].mxu0 }
  0xdc   :  { %vm120_vm2 = vcmp.gt.f32.partialorder %v104_v8, 0.0  ;;  %v126_v14 = vmul.f32 0.2, %v104_v8  ;;  %v107_v15 = vadd.f32 %v172_v5, %v106_v12  ;;  %v205_v16 = vpop.f32.mrb[3].mxu1  ;;  %vm118_vm3 = vcmp.gt.f32.partialorder %v96_v10, 0.0  ;;  %v201_v17 = vpop.f32.mrb[3].mxu0 }
  0xdd   :  { %v124_v18 = vmul.f32 0.2, %v96_v10  ;;  %v99_v19 = vadd.f32 %v172_v5, %v98_v13 }
  0xde   :  { %v132_v20 = vsel %vm120_vm2, %v104_v8, %v126_v14  ;;  %vm121_vm5 = vcmp.gt.f32.partialorder %v107_v15, 0.0  ;;  %v127_v21 = vmul.f32 0.2, %v107_v15 }
  0xdf   :  { %v188_v22 = vpack.c.bf16 %v132_v20, %v132_v20  ;;  %v130_v23 = vsel %vm118_vm3, %v96_v10, %v124_v18  ;;  %vm119_vm6 = vcmp.gt.f32.partialorder %v99_v19, 0.0  ;;  %v125_v24 = vmul.f32 0.2, %v99_v19 }
  0xe0   :  { %v133_v25 = vsel %vm121_vm5, %v107_v15, %v127_v21  ;;  %v186_v26 = vpack.c.bf16 %v130_v23, %v130_v23 }
  0xe1   :  { %163 = vst.msk [vmem:[%s281_s3 + $0x8] sm:$0xf] %vm160_vm4, %v188_v22  ;;  %v189_v27 = vpack.c.bf16 %v133_v25, %v133_v25  ;;  %v131_v28 = vsel %vm119_vm6, %v99_v19, %v125_v24  ;;  %v111_v29 = vpop.f32.mrb[4].mxu1 }
  0xe2   :  { %161 = vst.msk [vmem:[%s281_s3] sm:$0xf] %vm160_vm4, %v186_v26  ;;  %v187_v30 = vpack.c.bf16 %v131_v28, %v131_v28  ;;  %v112_v31 = vadd.f32 %v172_v5, %v111_v29  ;;  %v208_v32 = vpop.f32.mrb[5].mxu1 }
  0xe3   :  { %164 = vst.msk [vmem:[%s281_s3 + $0xc] sm:$0xf] %vm160_vm4, %v189_v27  ;;  %v114_v33 = vpop.f32.mrb[6].mxu1 }
  0xe4   :  { %162 = vst.msk [vmem:[%s281_s3 + $0x4] sm:$0xf] %vm160_vm4, %v187_v30  ;;  %vm122_vm7 = vcmp.gt.f32.partialorder %v112_v31, 0.0  ;;  %v128_v34 = vmul.f32 0.2, %v112_v31  ;;  %v115_v35 = vadd.f32 %v172_v5, %v114_v33  ;;  %v209_v36 = vpop.f32.mrb[7].mxu1 }
  0xe6   :  { %v134_v37 = vsel %vm122_vm7, %v112_v31, %v128_v34  ;;  %vm123_vm8 = vcmp.gt.f32.partialorder %v115_v35, 0.0  ;;  %v129_v38 = vmul.f32 0.2, %v115_v35 }
  0xe7   :  { %v190_v39 = vpack.c.bf16 %v134_v37, %v134_v37 }
  0xe8   :  { %v135_v40 = vsel %vm123_vm8, %v115_v35, %v129_v38 }
  0xe9   :  { %165 = vst.msk [vmem:[%s281_s3 + $0x10] sm:$0xf] %vm160_vm4, %v190_v39  ;;  %v191_v41 = vpack.c.bf16 %v135_v40, %v135_v40 }
  0xeb   :  { %167 = vst.msk [vmem:[%s281_s3 + $0x14] sm:$0x3] %vm166_vm9, %v191_v41 }

// kernel: _lambda_.8
= control target key start
LH: loop header
LB: loop body
LE: loop exit
PB: predicated region body
PF: predicated region fallthrough
CT: control target
= control target key end

     0   :  { %s297_s1 = inlined_call_operand.vmem [shape: bf16[128,128], index: 1, kind: input, shape index: {}]   ;;  %s298_s0 = inlined_call_operand.vmem [shape: bf16[20,128], index: 0, kind: input, shape index: {}]   ;;  %s299_s2 = inlined_call_operand.vmem [shape: f32[1,128], index: 2, kind: input, shape index: {}]   ;;  %s300_s3 = inlined_call_operand.vmem [shape: bf16[20,128], index: 3, kind: output, shape index: {}]  }
   0x1   :  { %v228_v0 = vld [vmem:[%s297_s1] sm:$0xff]   ;;  %v229_v1 = vld [vmem:[%s297_s1 + $0x8] sm:$0xff]   ;;  %v230_v2 = vld [vmem:[%s297_s1 + $0x10] sm:$0xff]  }
   0x2   :  { %208 = vmatprep.subr.bf16.mxu0 %v228_v0  ;;  %v231_v3 = vld [vmem:[%s297_s1 + $0x18] sm:$0xff]   ;;  %v236_v4 = vld [vmem:[%s298_s0] sm:$0xff]   ;;  %v233_v6 = vld [vmem:[%s297_s1 + $0x28] sm:$0xff]  }
   0x3   :  { %209 = vmatpush3.bf16.msra.mxu0 %v228_v0  ;;  %224 = vmatprep.mubr.bf16.mxu0 %v236_v4  ;;  %v232_v5 = vld [vmem:[%s297_s1 + $0x20] sm:$0xff]   ;;  %v234_v7 = vld [vmem:[%s297_s1 + $0x30] sm:$0xff]   ;;  %v235_v8 = vld [vmem:[%s297_s1 + $0x38] sm:$0xff]  }
   0x4   :  { %210 = vmatprep.subr.bf16.mxu0 %v229_v1  ;;  %v237_v9 = vld [vmem:[%s298_s0 + $0x8] ss:$0 sps:$4 sm:$0x33]   ;;  %v176_v10 = vld [vmem:[%s299_s2] ss:$0 sm:$0xff] }
   0x7   :  { %211 = vmatpush3.bf16.msra.mxu0 %v229_v1 }
   0x8   :  { %212 = vmatprep.subr.bf16.mxu0 %v230_v2 }
   0xb   :  { %213 = vmatpush3.bf16.msra.mxu0 %v230_v2 }
   0xc   :  { %214 = vmatprep.subr.bf16.mxu0 %v231_v3 }
   0xf   :  { %215 = vmatpush3.bf16.msra.mxu0 %v231_v3 }
  0x10   :  { %216 = vmatprep.subr.bf16.mxu0 %v232_v5 }
  0x13   :  { %217 = vmatpush3.bf16.msra.mxu0 %v232_v5 }
  0x14   :  { %218 = vmatprep.subr.bf16.mxu0 %v233_v6 }
  0x17   :  { %219 = vmatpush3.bf16.msra.mxu0 %v233_v6 }
  0x18   :  { %220 = vmatprep.subr.bf16.mxu0 %v234_v7 }
  0x1b   :  { %221 = vmatpush3.bf16.msra.mxu0 %v234_v7 }
  0x1c   :  { %222 = vmatprep.subr.bf16.mxu0 %v235_v8 }
  0x1f   :  { %223 = vmatpush3.bf16.msra.mxu0 %v235_v8 }
  0x22   :  { %225 = vmatmul.mubr.bf16.vlgmr.msra.gmra.mrb[0].mxu0 %v237_v9 }
  0xf5   :  { %v226_v11 = vpop.f32.mrb[0].mxu0 }
  0xf6   :  { %v142_v12 = vadd.f32 %v226_v11, %v176_v10  ;;  %v133_v13 = vpop.f32.mrb[1].mxu0 }
  0xf7   :  { %v134_v14 = vadd.f32 %v176_v10, %v133_v13  ;;  %v227_v15 = vpop.f32.mrb[2].mxu0 }
  0xf8   :  { %vm149_vm0 = vcmp.gt.f32.partialorder %v142_v12, 0.0  ;;  %v152_v16 = vmul.f32 0.2, %v142_v12  ;;  %v136_v17 = vpop.f32.mrb[3].mxu0 }
  0xf9   :  { %v150_v18 = vmul.f32 0.2, %v134_v14  ;;  %v137_v19 = vadd.f32 %v176_v10, %v136_v17  ;;  %vm147_vm1 = vcmp.gt.f32.partialorder %v134_v14, 0.0 }
  0xfa   :  { %v155_v20 = vsel %vm149_vm0, %v142_v12, %v152_v16 }
  0xfb   :  { %v192_v21 = vpack.c.bf16 %v155_v20, %v155_v20  ;;  %vm148_vm2 = vcmp.gt.f32.partialorder %v137_v19, 0.0  ;;  %v151_v22 = vmul.f32 0.2, %v137_v19  ;;  %v153_v23 = vsel %vm147_vm1, %v134_v14, %v150_v18 }
  0xfd   :  { %171 = vst [vmem:[%s300_s3 + $0x8] sm:$0x3] %v192_v21  ;;  %v154_v24 = vsel %vm148_vm2, %v137_v19, %v151_v22 }
  0xfe   :  { %v196_v25 = vpack.c.bf16 %v154_v24, %v153_v23 }
 0x100   :  { %197 = vst [vmem:[%s300_s3] sm:$0xff] %v196_v25  }

// kernel: _lambda_.9
= control target key start
LH: loop header
LB: loop body
LE: loop exit
PB: predicated region body
PF: predicated region fallthrough
CT: control target
= control target key end

     0   :  { %v807_v38 = vlaneseq  ;;  %v9741_v39 = vmov 1966171168   ;;  %vm7269_vm0 = vcmask 1041408   ;;  %vm7289_vm1 = vcmask 1024   ;;  %s12899_s2 = inlined_call_operand.vmem [shape: bf16[6144,256], index: 2, kind: input, shape index: {}]   ;;  %s12900_s0 = inlined_call_operand.vmem [shape: bf16[2,6144], index: 0, kind: input, shape index: {}]   ;;  %s12901_s4 = inlined_call_operand.vmem [shape: bf16[1280,256], index: 4, kind: input, shape index: {}]   ;;  %s12902_s1 = inlined_call_operand.vmem [shape: bf16[2,1280], index: 1, kind: input, shape index: {}]   ;;  %s12903_s7 = inlined_call_operand.<no memory space> [shape: f32[1,1], index: 7, kind: input, shape index: {}]   ;;  %s12904_s3 = inlined_call_operand.vmem [shape: f32[1,256], index: 3, kind: input, shape index: {}]   ;;  %s12905_s5 = inlined_call_operand.vmem [shape: f32[1,256], index: 5, kind: input, shape index: {}]   ;;  %s12906_s6 = inlined_call_operand.vmem [shape: f32[1,256], index: 6, kind: input, shape index: {}]   ;;  %s12907_s8 = inlined_call_operand.vmem [shape: f32[2,1], index: 8, kind: output, shape index: {}]  }
   0x1   :  { %v8336_v0 = vld [vmem:[%s12899_s2 + $0x4] ss:$8 sps:$4 sm:$0xff]   ;;  %v8340_v2 = vld [vmem:[%s12899_s2] ss:$8 sps:$4 sm:$0xff]   ;;  %v8342_v4 = vld [vmem:[%s12899_s2 + $0x14] ss:$8 sps:$4 sm:$0xff]   ;;  %v825_v40 = vunpack.c.l.s4 %v9741_v39 }
   0x2   :  { %v8338_v1 = vld [vmem:[%s12899_s2 + $0x904] ss:$8 sps:$4 sm:$0xff]   ;;  %5005 = vmatprep.subr.bf16.mxu1 %v8336_v0  ;;  %v8341_v3 = vld [vmem:[%s12899_s2 + $0x900] ss:$8 sps:$4 sm:$0xff]   ;;  %v8344_v5 = vld [vmem:[%s12899_s2 + $0x914] ss:$8 sps:$4 sm:$0xff]  }
   0x3   :  { %5374 = vmatprep.subr.bf16.mxu0 %v8338_v1  ;;  %5006 = vmatpush1.bf16.msra.mxu1 %v8340_v2  ;;  %v8346_v6 = vld [vmem:[%s12899_s2 + $0x10] ss:$8 sps:$4 sm:$0xff]   ;;  %v8348_v8 = vld [vmem:[%s12899_s2 + $0x24] ss:$8 sps:$4 sm:$0xff]   ;;  %v8352_v10 = vld [vmem:[%s12899_s2 + $0x20] ss:$8 sps:$4 sm:$0xff]   ;;  %v826_v46 = vunpack.c.0.s8 %v825_v40 }
   0x4   :  { %5375 = vmatpush1.bf16.msra.mxu0 %v8341_v3  ;;  %5007 = vmatprep.subr.bf16.mxu1 %v8342_v4  ;;  %v8347_v7 = vld [vmem:[%s12899_s2 + $0x910] ss:$8 sps:$4 sm:$0xff]   ;;  %v8350_v9 = vld [vmem:[%s12899_s2 + $0x924] ss:$8 sps:$4 sm:$0xff]   ;;  %v8353_v11 = vld [vmem:[%s12899_s2 + $0x920] ss:$8 sps:$4 sm:$0xff]  }
   0x5   :  { %5376 = vmatprep.subr.bf16.mxu0 %v8344_v5  ;;  %v8354_v12 = vld [vmem:[%s12899_s2 + $0x34] ss:$8 sps:$4 sm:$0xff]   ;;  %v8358_v14 = vld [vmem:[%s12899_s2 + $0x30] ss:$8 sps:$4 sm:$0xff]   ;;  %v8360_v16 = vld [vmem:[%s12899_s2 + $0x44] ss:$8 sps:$4 sm:$0xff]  }
   0x6   :  { %v8356_v13 = vld [vmem:[%s12899_s2 + $0x934] ss:$8 sps:$4 sm:$0xff]   ;;  %v8359_v15 = vld [vmem:[%s12899_s2 + $0x930] ss:$8 sps:$4 sm:$0xff]   ;;  %v8362_v17 = vld [vmem:[%s12899_s2 + $0x944] ss:$8 sps:$4 sm:$0xff]  }
   0x7   :  { %5008 = vmatpush1.bf16.msra.mxu1 %v8346_v6  ;;  %v8364_v18 = vld [vmem:[%s12899_s2 + $0x40] ss:$8 sps:$4 sm:$0xff]   ;;  %v8366_v20 = vld [vmem:[%s12899_s2 + $0x54] ss:$8 sps:$4 sm:$0xff]   ;;  %v8370_v22 = vld [vmem:[%s12899_s2 + $0x50] ss:$8 sps:$4 sm:$0xff]  }
   0x8   :  { %5377 = vmatpush1.bf16.msra.mxu0 %v8347_v7  ;;  %5009 = vmatprep.subr.bf16.mxu1 %v8348_v8  ;;  %v8365_v19 = vld [vmem:[%s12899_s2 + $0x940] ss:$8 sps:$4 sm:$0xff]   ;;  %v8368_v21 = vld [vmem:[%s12899_s2 + $0x954] ss:$8 sps:$4 sm:$0xff]   ;;  %v8371_v23 = vld [vmem:[%s12899_s2 + $0x950] ss:$8 sps:$4 sm:$0xff]  }
   0x9   :  { %5378 = vmatprep.subr.bf16.mxu0 %v8350_v9  ;;  %v8372_v24 = vld [vmem:[%s12899_s2 + $0x64] ss:$8 sps:$4 sm:$0xff]   ;;  %v8376_v26 = vld [vmem:[%s12899_s2 + $0x60] ss:$8 sps:$4 sm:$0xff]   ;;  %v8378_v28 = vld [vmem:[%s12899_s2 + $0x74] ss:$8 sps:$4 sm:$0xff]  }
   0xa   :  { %v8374_v25 = vld [vmem:[%s12899_s2 + $0x964] ss:$8 sps:$4 sm:$0xff]   ;;  %v8377_v27 = vld [vmem:[%s12899_s2 + $0x960] ss:$8 sps:$4 sm:$0xff]   ;;  %v8380_v29 = vld [vmem:[%s12899_s2 + $0x974] ss:$8 sps:$4 sm:$0xff]  }
   0xb   :  { %5010 = vmatpush1.bf16.msra.mxu1 %v8352_v10  ;;  %v8382_v30 = vld [vmem:[%s12899_s2 + $0x70] ss:$8 sps:$4 sm:$0xff]   ;;  %v8384_v32 = vld [vmem:[%s12899_s2 + $0x84] ss:$8 sps:$4 sm:$0xff]   ;;  %v8388_v34 = vld [vmem:[%s12899_s2 + $0x80] ss:$8 sps:$4 sm:$0xff]  }
   0xc   :  { %5379 = vmatpush1.bf16.msra.mxu0 %v8353_v11  ;;  %5011 = vmatprep.subr.bf16.mxu1 %v8354_v12  ;;  %v8383_v31 = vld [vmem:[%s12899_s2 + $0x970] ss:$8 sps:$4 sm:$0xff]   ;;  %v8386_v33 = vld [vmem:[%s12899_s2 + $0x984] ss:$8 sps:$4 sm:$0xff]   ;;  %v8389_v35 = vld [vmem:[%s12899_s2 + $0x980] ss:$8 sps:$4 sm:$0xff]  }
   0xd   :  { %5380 = vmatprep.subr.bf16.mxu0 %v8356_v13  ;;  %v8390_v36 = vld [vmem:[%s12899_s2 + $0x94] ss:$8 sps:$4 sm:$0xff]   ;;  %v8394_v41 = vld [vmem:[%s12899_s2 + $0x90] ss:$8 sps:$4 sm:$0xff]   ;;  %v8396_v43 = vld [vmem:[%s12899_s2 + $0xa4] ss:$8 sps:$4 sm:$0xff]  }
   0xe   :  { %v8392_v37 = vld [vmem:[%s12899_s2 + $0x994] ss:$8 sps:$4 sm:$0xff]   ;;  %v8395_v42 = vld [vmem:[%s12899_s2 + $0x990] ss:$8 sps:$4 sm:$0xff]   ;;  %v8398_v44 = vld [vmem:[%s12899_s2 + $0x9a4] ss:$8 sps:$4 sm:$0xff]  }
   0xf   :  { %5012 = vmatpush1.bf16.msra.mxu1 %v8358_v14  ;;  %v9913_v45 = vshrl.u32 %v807_v38, 7  ;;  %v8400_v47 = vld [vmem:[%s12899_s2 + $0xa0] ss:$8 sps:$4 sm:$0xff]   ;;  %v8402_v49 = vld [vmem:[%s12899_s2 + $0xb4] ss:$8 sps:$4 sm:$0xff]  }
  0x10   :  { %5381 = vmatpush1.bf16.msra.mxu0 %v8359_v15  ;;  %5013 = vmatprep.subr.bf16.mxu1 %v8360_v16  ;;  %v8401_v48 = vld [vmem:[%s12899_s2 + $0x9a0] ss:$8 sps:$4 sm:$0xff]   ;;  %v8404_v50 = vld [vmem:[%s12899_s2 + $0x9b4] ss:$8 sps:$4 sm:$0xff]   ;;  %v8406_v53 = vld [vmem:[%s12899_s2 + $0xb0] ss:$8 sps:$4 sm:$0xff]  }
  0x11   :  { %5382 = vmatprep.subr.bf16.mxu0 %v8362_v17  ;;  %v9928_v51 = vsub.s32 %v826_v46, %v9913_v45  ;;  %v9933_v52 = vld [vmem:[%s12900_s0] sm:$0xff]  ;;  %v8407_v55 = vld [vmem:[%s12899_s2 + $0x9b0] ss:$8 sps:$4 sm:$0xff]   ;;  %v8414_v1 = vld [vmem:[%s12899_s2 + $0xd4] ss:$8 sps:$4 sm:$0xff]  }
  0x12   :  { %v33_v56 = vld [vmem:[%s12900_s0 + $0x10] sm:$0xff]  ;;  %v8408_v57 = vld [vmem:[%s12899_s2 + $0xc4] ss:$8 sps:$4 sm:$0xff]   ;;  %v8412_v63 = vld [vmem:[%s12899_s2 + $0xc0] ss:$8 sps:$4 sm:$0xff]  }
  0x13   :  { %5014 = vmatpush1.bf16.msra.mxu1 %v8364_v18  ;;  %v830_v54 = vrot.slane %v9933_v52, %v9928_v51  ;;  %v8410_v58 = vld [vmem:[%s12899_s2 + $0x9c4] ss:$8 sps:$4 sm:$0xff]   ;;  %v928_v60 = vrot.slane %v33_v56, %v9928_v51  ;;  %v8413_v0 = vld [vmem:[%s12899_s2 + $0x9c0] ss:$8 sps:$4 sm:$0xff]   ;;  %v8416_v2 = vld [vmem:[%s12899_s2 + $0x9d4] ss:$8 sps:$4 sm:$0xff]   ;;  %v921_v9 = vcombine.high %v33_v56, %v33_v56 }
  0x14   :  { %5383 = vmatpush1.bf16.msra.mxu0 %v8365_v19  ;;  %5015 = vmatprep.subr.bf16.mxu1 %v8366_v20  ;;  %v8418_v5 = vld [vmem:[%s12899_s2 + $0xd0] ss:$8 sps:$4 sm:$0xff]   ;;  %v8420_v7 = vld [vmem:[%s12899_s2 + $0xe4] ss:$8 sps:$4 sm:$0xff]   ;;  %v8424_v10 = vld [vmem:[%s12899_s2 + $0xe0] ss:$8 sps:$4 sm:$0xff]  }
  0x15   :  { %5384 = vmatprep.subr.bf16.mxu0 %v8368_v21  ;;  %v838_v59 = vcombine.high %v830_v54, %v830_v54  ;;  %v936_v62 = vcombine.high %v928_v60, %v928_v60  ;;  %v8419_v6 = vld [vmem:[%s12899_s2 + $0x9d0] ss:$8 sps:$4 sm:$0xff]   ;;  %v8422_v8 = vld [vmem:[%s12899_s2 + $0x9e4] ss:$8 sps:$4 sm:$0xff]   ;;  %v8425_v11 = vld [vmem:[%s12899_s2 + $0x9e0] ss:$8 sps:$4 sm:$0xff]   ;;  %v9999_v14 = vrot.slane %v921_v9, %v9928_v51  ;;  %v10002_v15 = vrot.slane %v928_v60, %v9928_v51 }
  0x16   :  { %v8426_v12 = vld [vmem:[%s12899_s2 + $0xf4] ss:$8 sps:$4 sm:$0xff]   ;;  %v8430_v16 = vld [vmem:[%s12899_s2 + $0xf0] ss:$8 sps:$4 sm:$0xff]   ;;  %v8435_v18 = vld [vmem:[%s12899_s2 + $0x104] ss:$8 sps:$4 sm:$0xff]   ;;  %v10019_v21 = vrot.slane %v830_v54, %v9928_v51 }
  0x17   :  { %5016 = vmatpush1.bf16.msra.mxu1 %v8370_v22  ;;  %v9954_v61 = vrot.slane %v838_v59, %v9928_v51  ;;  %v9969_v3 = vrot.slane %v936_v62, %v9928_v51  ;;  %v8428_v13 = vld [vmem:[%s12899_s2 + $0x9f4] ss:$8 sps:$4 sm:$0xff]   ;;  %v8431_v17 = vld [vmem:[%s12899_s2 + $0x9f0] ss:$8 sps:$4 sm:$0xff]   ;;  %v8439_v19 = vld [vmem:[%s12899_s2 + $0xa04] ss:$8 sps:$4 sm:$0xff]   ;;  %v937_v20 = vcombine.high %v9999_v14, %v9999_v14  ;;  %v966_v22 = vcombine.high %v10002_v15, %v10002_v15 }
  0x18   :  { %5385 = vmatpush1.bf16.msra.mxu0 %v8371_v23  ;;  %5017 = vmatprep.subr.bf16.mxu1 %v8372_v24  ;;  %v8433_v23 = vld [vmem:[%s12899_s2 + $0x100] ss:$8 sps:$4 sm:$0xff]   ;;  %v8455_v38 = vld [vmem:[%s12899_s2 + $0xa30] ss:$8 sps:$4 sm:$0xff]   ;;  %v8460_v39 = vld [vmem:[%s12899_s2 + $0x144] ss:$8 sps:$4 sm:$0xff]  }
  0x19   :  { %5386 = vmatprep.subr.bf16.mxu0 %v8374_v25  ;;  %5037 = vmatprep.mubr.bf16.mxu1 %v9954_v61  ;;  %v968_v4 = vcombine.high %v9969_v3, %v9969_v3  ;;  %v8437_v24 = vld [vmem:[%s12899_s2 + $0xa00] ss:$8 sps:$4 sm:$0xff]   ;;  %v8442_v25 = vld [vmem:[%s12899_s2 + $0x114] ss:$8 sps:$4 sm:$0xff]   ;;  %v8463_v40 = vld [vmem:[%s12899_s2 + $0xa44] ss:$8 sps:$4 sm:$0xff]  }
  0x1a   :  { %v8464_v46 = vld [vmem:[%s12899_s2 + $0x150] ss:$8 sps:$4 sm:$0xff]   ;;  %v8478_v54 = vld [vmem:[%s12899_s2 + $0x174] ss:$8 sps:$4 sm:$0xff]   ;;  %v8487_v59 = vld [vmem:[%s12899_s2 + $0xa84] ss:$8 sps:$4 sm:$0xff]  }
  0x1b   :  { %5018 = vmatpush1.bf16.msra.mxu1 %v8376_v26  ;;  %5406 = vmatprep.mubr.bf16.mxu0 %v968_v4  ;;  %v8445_v26 = vld [vmem:[%s12899_s2 + $0xa14] ss:$8 sps:$4 sm:$0xff]   ;;  %v8476_v56 = vld [vmem:[%s12899_s2 + $0x170] ss:$8 sps:$4 sm:$0xff]   ;;  %v8482_v60 = vld [vmem:[%s12899_s2 + $0x180] ss:$8 sps:$4 sm:$0xff]  }
  0x1c   :  { %5387 = vmatpush1.bf16.msra.mxu0 %v8377_v27  ;;  %5019 = vmatprep.subr.bf16.mxu1 %v8378_v28  ;;  %v870_v27 = vcombine.high %v9954_v61, %v9954_v61  ;;  %v10038_v28 = vrot.slane %v937_v20, %v9928_v51  ;;  %v8485_v61 = vld [vmem:[%s12899_s2 + $0xa80] ss:$8 sps:$4 sm:$0xff]   ;;  %v8490_v62 = vld [vmem:[%s12899_s2 + $0x194] ss:$8 sps:$4 sm:$0xff]   ;;  %v8499_v4 = vld [vmem:[%s12899_s2 + $0xaa4] ss:$8 sps:$4 sm:$0xff]  }
  0x1d   :  { %5388 = vmatprep.subr.bf16.mxu0 %v8380_v29  ;;  %v8440_v29 = vld [vmem:[%s12899_s2 + $0x110] ss:$8 sps:$4 sm:$0xff]  }
  0x1e   :  { %v8500_v9 = vld [vmem:[%s12899_s2 + $0x1b0] ss:$8 sps:$4 sm:$0xff]  }
  0x1f   :  { %5020 = vmatpush1.bf16.msra.mxu1 %v8382_v30  ;;  %v8443_v30 = vld [vmem:[%s12899_s2 + $0xa10] ss:$8 sps:$4 sm:$0xff]  }
  0x20   :  { %5389 = vmatpush1.bf16.msra.mxu0 %v8383_v31  ;;  %5021 = vmatprep.subr.bf16.mxu1 %v8384_v32  ;;  %v8448_v31 = vld [vmem:[%s12899_s2 + $0x124] ss:$8 sps:$4 sm:$0xff]   ;;  %v8515_v20 = vld [vmem:[%s12899_s2 + $0xad0] ss:$8 sps:$4 sm:$0xff]  }
  0x21   :  { %5390 = vmatprep.subr.bf16.mxu0 %v8386_v33  ;;  %v8451_v32 = vld [vmem:[%s12899_s2 + $0xa24] ss:$8 sps:$4 sm:$0xff]   ;;  %v8446_v33 = vld [vmem:[%s12899_s2 + $0x120] ss:$8 sps:$4 sm:$0xff]  }
  0x23   :  { %5022 = vmatpush1.bf16.msra.mxu1 %v8388_v34  ;;  %v8449_v34 = vld [vmem:[%s12899_s2 + $0xa20] ss:$8 sps:$4 sm:$0xff]  }
  0x24   :  { %5391 = vmatpush1.bf16.msra.mxu0 %v8389_v35  ;;  %5023 = vmatprep.subr.bf16.mxu1 %v8390_v36  ;;  %v8454_v35 = vld [vmem:[%s12899_s2 + $0x134] ss:$8 sps:$4 sm:$0xff]  }
  0x25   :  { %5392 = vmatprep.subr.bf16.mxu0 %v8392_v37  ;;  %v8457_v36 = vld [vmem:[%s12899_s2 + $0xa34] ss:$8 sps:$4 sm:$0xff]   ;;  %v8452_v37 = vld [vmem:[%s12899_s2 + $0x130] ss:$8 sps:$4 sm:$0xff]  }
  0x27   :  { %5024 = vmatpush1.bf16.msra.mxu1 %v8394_v41  ;;  %v8458_v41 = vld [vmem:[%s12899_s2 + $0x140] ss:$8 sps:$4 sm:$0xff]  }
  0x28   :  { %5393 = vmatpush1.bf16.msra.mxu0 %v8395_v42  ;;  %5025 = vmatprep.subr.bf16.mxu1 %v8396_v43  ;;  %v8461_v42 = vld [vmem:[%s12899_s2 + $0xa40] ss:$8 sps:$4 sm:$0xff]   ;;  %v8466_v43 = vld [vmem:[%s12899_s2 + $0x154] ss:$8 sps:$4 sm:$0xff]  }
  0x29   :  { %5394 = vmatprep.subr.bf16.mxu0 %v8398_v44  ;;  %v8469_v44 = vld [vmem:[%s12899_s2 + $0xa54] ss:$8 sps:$4 sm:$0xff]  }
  0x2b   :  { %5026 = vmatpush1.bf16.msra.mxu1 %v8400_v47  ;;  %v8467_v47 = vld [vmem:[%s12899_s2 + $0xa50] ss:$8 sps:$4 sm:$0xff]  }
  0x2c   :  { %5395 = vmatpush1.bf16.msra.mxu0 %v8401_v48  ;;  %5027 = vmatprep.subr.bf16.mxu1 %v8402_v49  ;;  %v8472_v48 = vld [vmem:[%s12899_s2 + $0x164] ss:$8 sps:$4 sm:$0xff]  }
  0x2d   :  { %5396 = vmatprep.subr.bf16.mxu0 %v8404_v50  ;;  %v8475_v49 = vld [vmem:[%s12899_s2 + $0xa64] ss:$8 sps:$4 sm:$0xff]   ;;  %v8470_v50 = vld [vmem:[%s12899_s2 + $0x160] ss:$8 sps:$4 sm:$0xff]  }
  0x2f   :  { %5028 = vmatpush1.bf16.msra.mxu1 %v8406_v53  ;;  %v8473_v53 = vld [vmem:[%s12899_s2 + $0xa60] ss:$8 sps:$4 sm:$0xff]  }
  0x30   :  { %5397 = vmatpush1.bf16.msra.mxu0 %v8407_v55  ;;  %5029 = vmatprep.subr.bf16.mxu1 %v8408_v57  ;;  %v8481_v55 = vld [vmem:[%s12899_s2 + $0xa74] ss:$8 sps:$4 sm:$0xff]   ;;  %v8479_v57 = vld [vmem:[%s12899_s2 + $0xa70] ss:$8 sps:$4 sm:$0xff]  }
  0x31   :  { %5398 = vmatprep.subr.bf16.mxu0 %v8410_v58  ;;  %v8484_v58 = vld [vmem:[%s12899_s2 + $0x184] ss:$8 sps:$4 sm:$0xff]  }
  0x33   :  { %5030 = vmatpush1.bf16.msra.mxu1 %v8412_v63  ;;  %v8493_v63 = vld [vmem:[%s12899_s2 + $0xa94] ss:$8 sps:$4 sm:$0xff]  }
  0x34   :  { %5399 = vmatpush1.bf16.msra.mxu0 %v8413_v0  ;;  %5031 = vmatprep.subr.bf16.mxu1 %v8414_v1  ;;  %v8488_v0 = vld [vmem:[%s12899_s2 + $0x190] ss:$8 sps:$4 sm:$0xff]  }
  0x35   :  { %5400 = vmatprep.subr.bf16.mxu0 %v8416_v2  ;;  %v8491_v1 = vld [vmem:[%s12899_s2 + $0xa90] ss:$8 sps:$4 sm:$0xff]   ;;  %v8496_v2 = vld [vmem:[%s12899_s2 + $0x1a4] ss:$8 sps:$4 sm:$0xff]  }
  0x37   :  { %5032 = vmatpush1.bf16.msra.mxu1 %v8418_v5  ;;  %v8494_v5 = vld [vmem:[%s12899_s2 + $0x1a0] ss:$8 sps:$4 sm:$0xff]  }
  0x38   :  { %5401 = vmatpush1.bf16.msra.mxu0 %v8419_v6  ;;  %5033 = vmatprep.subr.bf16.mxu1 %v8420_v7  ;;  %v8497_v6 = vld [vmem:[%s12899_s2 + $0xaa0] ss:$8 sps:$4 sm:$0xff]   ;;  %v8502_v7 = vld [vmem:[%s12899_s2 + $0x1b4] ss:$8 sps:$4 sm:$0xff]  }
  0x39   :  { %5402 = vmatprep.subr.bf16.mxu0 %v8422_v8  ;;  %v8505_v8 = vld [vmem:[%s12899_s2 + $0xab4] ss:$8 sps:$4 sm:$0xff]  }
  0x3b   :  { %5034 = vmatpush1.bf16.msra.mxu1 %v8424_v10  ;;  %v8503_v10 = vld [vmem:[%s12899_s2 + $0xab0] ss:$8 sps:$4 sm:$0xff]  }
  0x3c   :  { %5403 = vmatpush1.bf16.msra.mxu0 %v8425_v11  ;;  %5035 = vmatprep.subr.bf16.mxu1 %v8426_v12  ;;  %v8508_v11 = vld [vmem:[%s12899_s2 + $0x1c4] ss:$8 sps:$4 sm:$0xff]  }
  0x3d   :  { %5404 = vmatprep.subr.bf16.mxu0 %v8428_v13  ;;  %v8511_v12 = vld [vmem:[%s12899_s2 + $0xac4] ss:$8 sps:$4 sm:$0xff]   ;;  %v8506_v13 = vld [vmem:[%s12899_s2 + $0x1c0] ss:$8 sps:$4 sm:$0xff]  }
  0x3f   :  { %5036 = vmatpush1.bf16.msra.mxu1 %v8430_v16  ;;  %v8509_v16 = vld [vmem:[%s12899_s2 + $0xac0] ss:$8 sps:$4 sm:$0xff]  }
  0x40   :  { %5405 = vmatpush1.bf16.msra.mxu0 %v8431_v17  ;;  %5046 = vmatprep.subr.bf16.mxu1 %v8435_v18  ;;  %v8514_v17 = vld [vmem:[%s12899_s2 + $0x1d4] ss:$8 sps:$4 sm:$0xff]  }
  0x41   :  { %5415 = vmatprep.subr.bf16.mxu0 %v8439_v19  ;;  %v8517_v18 = vld [vmem:[%s12899_s2 + $0xad4] ss:$8 sps:$4 sm:$0xff]   ;;  %v8512_v19 = vld [vmem:[%s12899_s2 + $0x1d0] ss:$8 sps:$4 sm:$0xff]  }
  0x42   :  { %5038 = vmatmul.mubr.bf16.vlgmr.msra.gmra.mrb[0].mxu1 %v10019_v21 }
  0x43   :  { %5407 = vmatmul.mubr.bf16.vlgmr.msra.gmra.mrb[0].mxu0 %v966_v22  ;;  %5047 = vmatpush1.bf16.msra.mxu1 %v8433_v23  ;;  %v8520_v22 = vld [vmem:[%s12899_s2 + $0x1e4] ss:$8 sps:$4 sm:$0xff]  }
  0x44   :  { %5416 = vmatpush1.bf16.msra.mxu0 %v8437_v24  ;;  %5048 = vmatprep.subr.bf16.mxu1 %v8442_v25  ;;  %v8523_v23 = vld [vmem:[%s12899_s2 + $0xae4] ss:$8 sps:$4 sm:$0xff]   ;;  %v823_v24 = vcombine.high %v9933_v52, %v9933_v52  ;;  %v8518_v25 = vld [vmem:[%s12899_s2 + $0x1e0] ss:$8 sps:$4 sm:$0xff]   ;;  %v8529_v52 = vld [vmem:[%s12899_s2 + $0xaf4] ss:$8 sps:$4 sm:$0xff]  }
  0x45   :  { %5417 = vmatprep.subr.bf16.mxu0 %v8445_v26  ;;  %5078 = vmatprep.mubr.bf16.mxu1 %v870_v27  ;;  %v8521_v26 = vld [vmem:[%s12899_s2 + $0xae0] ss:$8 sps:$4 sm:$0xff]   ;;  %v8526_v27 = vld [vmem:[%s12899_s2 + $0x1f4] ss:$8 sps:$4 sm:$0xff]  }
  0x46   :  { %5447 = vmatprep.mubr.bf16.mxu0 %v10038_v28 }
  0x47   :  { %5049 = vmatpush1.bf16.msra.mxu1 %v8440_v29  ;;  %v10213_v29 = vrot.slane %v823_v24, %v9928_v51  ;;  %v8599_v24 = vld [vmem:[%s12899_s2 + $0xbb0] ss:$8 sps:$4 sm:$0xff]  }
  0x48   :  { %5418 = vmatpush1.bf16.msra.mxu0 %v8443_v30  ;;  %5050 = vmatprep.subr.bf16.mxu1 %v8448_v31  ;;  %v8524_v30 = vld [vmem:[%s12899_s2 + $0x1f0] ss:$8 sps:$4 sm:$0xff]  }
  0x49   :  { %5419 = vmatprep.subr.bf16.mxu0 %v8451_v32  ;;  %v8527_v31 = vld [vmem:[%s12899_s2 + $0xaf0] ss:$8 sps:$4 sm:$0xff]   ;;  %v8532_v32 = vld [vmem:[%s12899_s2 + $0x204] ss:$8 sps:$4 sm:$0xff]  }
  0x4b   :  { %5051 = vmatpush1.bf16.msra.mxu1 %v8446_v33  ;;  %v8535_v33 = vld [vmem:[%s12899_s2 + $0xb04] ss:$8 sps:$4 sm:$0xff]  }
  0x4c   :  { %5420 = vmatpush1.bf16.msra.mxu0 %v8449_v34  ;;  %5052 = vmatprep.subr.bf16.mxu1 %v8454_v35  ;;  %v839_v34 = vcombine.high %v10213_v29, %v10213_v29  ;;  %v868_v35 = vcombine.high %v10019_v21, %v10019_v21  ;;  %v8538_v21 = vld [vmem:[%s12899_s2 + $0x214] ss:$8 sps:$4 sm:$0xff]  }
  0x4d   :  { %5421 = vmatprep.subr.bf16.mxu0 %v8457_v36  ;;  %v10233_v36 = vrot.slane %v9999_v14, %v9928_v51  ;;  %v8541_v14 = vld [vmem:[%s12899_s2 + $0xb14] ss:$8 sps:$4 sm:$0xff]  }
  0x4f   :  { %5053 = vmatpush1.bf16.msra.mxu1 %v8452_v37  ;;  %v8530_v37 = vld [vmem:[%s12899_s2 + $0x200] ss:$8 sps:$4 sm:$0xff]  }
  0x50   :  { %5422 = vmatpush1.bf16.msra.mxu0 %v8455_v38  ;;  %5054 = vmatprep.subr.bf16.mxu1 %v8460_v39  ;;  %v8533_v38 = vld [vmem:[%s12899_s2 + $0xb00] ss:$8 sps:$4 sm:$0xff]   ;;  %v10248_v39 = vrot.slane %v839_v34, %v9928_v51  ;;  %v8616_v34 = vld [vmem:[%s12899_s2 + $0x2e4] ss:$8 sps:$4 sm:$0xff]  }
  0x51   :  { %5423 = vmatprep.subr.bf16.mxu0 %v8463_v40  ;;  %v969_v40 = vcombine.high %v10038_v28, %v10038_v28  ;;  %v8547_v28 = vld [vmem:[%s12899_s2 + $0xb24] ss:$8 sps:$4 sm:$0xff]  }
  0x53   :  { %5055 = vmatpush1.bf16.msra.mxu1 %v8458_v41  ;;  %v8536_v41 = vld [vmem:[%s12899_s2 + $0x210] ss:$8 sps:$4 sm:$0xff]  }
  0x54   :  { %5424 = vmatpush1.bf16.msra.mxu0 %v8461_v42  ;;  %5056 = vmatprep.subr.bf16.mxu1 %v8466_v43  ;;  %v8539_v42 = vld [vmem:[%s12899_s2 + $0xb10] ss:$8 sps:$4 sm:$0xff]   ;;  %v8544_v43 = vld [vmem:[%s12899_s2 + $0x224] ss:$8 sps:$4 sm:$0xff]  }
  0x55   :  { %5425 = vmatprep.subr.bf16.mxu0 %v8469_v44  ;;  %v8542_v44 = vld [vmem:[%s12899_s2 + $0x220] ss:$8 sps:$4 sm:$0xff]  }
  0x57   :  { %5057 = vmatpush1.bf16.msra.mxu1 %v8464_v46  ;;  %v8545_v46 = vld [vmem:[%s12899_s2 + $0xb20] ss:$8 sps:$4 sm:$0xff]  }
  0x58   :  { %5426 = vmatpush1.bf16.msra.mxu0 %v8467_v47  ;;  %5058 = vmatprep.subr.bf16.mxu1 %v8472_v48  ;;  %v8550_v47 = vld [vmem:[%s12899_s2 + $0x234] ss:$8 sps:$4 sm:$0xff]  }
  0x59   :  { %5427 = vmatprep.subr.bf16.mxu0 %v8475_v49  ;;  %v8553_v48 = vld [vmem:[%s12899_s2 + $0xb34] ss:$8 sps:$4 sm:$0xff]   ;;  %v8548_v49 = vld [vmem:[%s12899_s2 + $0x230] ss:$8 sps:$4 sm:$0xff]  }
  0x5b   :  { %5059 = vmatpush1.bf16.msra.mxu1 %v8470_v50  ;;  %v8551_v50 = vld [vmem:[%s12899_s2 + $0xb30] ss:$8 sps:$4 sm:$0xff]  }
  0x5c   :  { %5428 = vmatpush1.bf16.msra.mxu0 %v8473_v53  ;;  %5060 = vmatprep.subr.bf16.mxu1 %v8478_v54  ;;  %v8556_v53 = vld [vmem:[%s12899_s2 + $0x244] ss:$8 sps:$4 sm:$0xff]  }
  0x5d   :  { %5429 = vmatprep.subr.bf16.mxu0 %v8481_v55  ;;  %v8559_v54 = vld [vmem:[%s12899_s2 + $0xb44] ss:$8 sps:$4 sm:$0xff]   ;;  %v8554_v55 = vld [vmem:[%s12899_s2 + $0x240] ss:$8 sps:$4 sm:$0xff]  }
  0x5f   :  { %5061 = vmatpush1.bf16.msra.mxu1 %v8476_v56  ;;  %v8557_v56 = vld [vmem:[%s12899_s2 + $0xb40] ss:$8 sps:$4 sm:$0xff]  }
  0x60   :  { %5430 = vmatpush1.bf16.msra.mxu0 %v8479_v57  ;;  %5062 = vmatprep.subr.bf16.mxu1 %v8484_v58  ;;  %v8562_v57 = vld [vmem:[%s12899_s2 + $0x254] ss:$8 sps:$4 sm:$0xff]  }
  0x61   :  { %5431 = vmatprep.subr.bf16.mxu0 %v8487_v59  ;;  %v8565_v58 = vld [vmem:[%s12899_s2 + $0xb54] ss:$8 sps:$4 sm:$0xff]   ;;  %v8560_v59 = vld [vmem:[%s12899_s2 + $0x250] ss:$8 sps:$4 sm:$0xff]  }
  0x63   :  { %5063 = vmatpush1.bf16.msra.mxu1 %v8482_v60  ;;  %v8563_v60 = vld [vmem:[%s12899_s2 + $0xb50] ss:$8 sps:$4 sm:$0xff]  }
  0x64   :  { %5432 = vmatpush1.bf16.msra.mxu0 %v8485_v61  ;;  %5064 = vmatprep.subr.bf16.mxu1 %v8490_v62  ;;  %v8568_v61 = vld [vmem:[%s12899_s2 + $0x264] ss:$8 sps:$4 sm:$0xff]  }
  0x65   :  { %5433 = vmatprep.subr.bf16.mxu0 %v8493_v63  ;;  %v8571_v62 = vld [vmem:[%s12899_s2 + $0xb64] ss:$8 sps:$4 sm:$0xff]   ;;  %v8566_v63 = vld [vmem:[%s12899_s2 + $0x260] ss:$8 sps:$4 sm:$0xff]  }
  0x67   :  { %5065 = vmatpush1.bf16.msra.mxu1 %v8488_v0  ;;  %v8569_v0 = vld [vmem:[%s12899_s2 + $0xb60] ss:$8 sps:$4 sm:$0xff]  }
  0x68   :  { %5434 = vmatpush1.bf16.msra.mxu0 %v8491_v1  ;;  %5066 = vmatprep.subr.bf16.mxu1 %v8496_v2  ;;  %v8574_v1 = vld [vmem:[%s12899_s2 + $0x274] ss:$8 sps:$4 sm:$0xff]  }
  0x69   :  { %5435 = vmatprep.subr.bf16.mxu0 %v8499_v4  ;;  %v8577_v2 = vld [vmem:[%s12899_s2 + $0xb74] ss:$8 sps:$4 sm:$0xff]   ;;  %v8572_v4 = vld [vmem:[%s12899_s2 + $0x270] ss:$8 sps:$4 sm:$0xff]  }
  0x6b   :  { %5067 = vmatpush1.bf16.msra.mxu1 %v8494_v5  ;;  %v8575_v5 = vld [vmem:[%s12899_s2 + $0xb70] ss:$8 sps:$4 sm:$0xff]  }
  0x6c   :  { %5436 = vmatpush1.bf16.msra.mxu0 %v8497_v6  ;;  %5068 = vmatprep.subr.bf16.mxu1 %v8502_v7  ;;  %v8580_v6 = vld [vmem:[%s12899_s2 + $0x284] ss:$8 sps:$4 sm:$0xff]  }
  0x6d   :  { %5437 = vmatprep.subr.bf16.mxu0 %v8505_v8  ;;  %v8583_v7 = vld [vmem:[%s12899_s2 + $0xb84] ss:$8 sps:$4 sm:$0xff]   ;;  %v8578_v8 = vld [vmem:[%s12899_s2 + $0x280] ss:$8 sps:$4 sm:$0xff]  }
  0x6f   :  { %5069 = vmatpush1.bf16.msra.mxu1 %v8500_v9  ;;  %v8581_v9 = vld [vmem:[%s12899_s2 + $0xb80] ss:$8 sps:$4 sm:$0xff]  }
  0x70   :  { %5438 = vmatpush1.bf16.msra.mxu0 %v8503_v10  ;;  %5070 = vmatprep.subr.bf16.mxu1 %v8508_v11  ;;  %v8586_v10 = vld [vmem:[%s12899_s2 + $0x294] ss:$8 sps:$4 sm:$0xff]  }
  0x71   :  { %5439 = vmatprep.subr.bf16.mxu0 %v8511_v12  ;;  %v8589_v11 = vld [vmem:[%s12899_s2 + $0xb94] ss:$8 sps:$4 sm:$0xff]   ;;  %v8584_v12 = vld [vmem:[%s12899_s2 + $0x290] ss:$8 sps:$4 sm:$0xff]  }
  0x73   :  { %5071 = vmatpush1.bf16.msra.mxu1 %v8506_v13  ;;  %v8587_v13 = vld [vmem:[%s12899_s2 + $0xb90] ss:$8 sps:$4 sm:$0xff]  }
  0x74   :  { %5440 = vmatpush1.bf16.msra.mxu0 %v8509_v16  ;;  %5072 = vmatprep.subr.bf16.mxu1 %v8514_v17  ;;  %v8592_v16 = vld [vmem:[%s12899_s2 + $0x2a4] ss:$8 sps:$4 sm:$0xff]  }
  0x75   :  { %5441 = vmatprep.subr.bf16.mxu0 %v8517_v18  ;;  %v8595_v17 = vld [vmem:[%s12899_s2 + $0xba4] ss:$8 sps:$4 sm:$0xff]   ;;  %v8590_v18 = vld [vmem:[%s12899_s2 + $0x2a0] ss:$8 sps:$4 sm:$0xff]  }
  0x77   :  { %5073 = vmatpush1.bf16.msra.mxu1 %v8512_v19  ;;  %v8593_v19 = vld [vmem:[%s12899_s2 + $0xba0] ss:$8 sps:$4 sm:$0xff]  }
  0x78   :  { %5442 = vmatpush1.bf16.msra.mxu0 %v8515_v20  ;;  %5074 = vmatprep.subr.bf16.mxu1 %v8520_v22  ;;  %v8598_v20 = vld [vmem:[%s12899_s2 + $0x2b4] ss:$8 sps:$4 sm:$0xff]  }
  0x79   :  { %5443 = vmatprep.subr.bf16.mxu0 %v8523_v23  ;;  %v8601_v22 = vld [vmem:[%s12899_s2 + $0xbb4] ss:$8 sps:$4 sm:$0xff]   ;;  %v8596_v23 = vld [vmem:[%s12899_s2 + $0x2b0] ss:$8 sps:$4 sm:$0xff]  }
  0x7b   :  { %5075 = vmatpush1.bf16.msra.mxu1 %v8518_v25  ;;  %v8604_v25 = vld [vmem:[%s12899_s2 + $0x2c4] ss:$8 sps:$4 sm:$0xff]  }
  0x7c   :  { %5444 = vmatpush1.bf16.msra.mxu0 %v8521_v26  ;;  %5076 = vmatprep.subr.bf16.mxu1 %v8526_v27  ;;  %v8607_v26 = vld [vmem:[%s12899_s2 + $0xbc4] ss:$8 sps:$4 sm:$0xff]   ;;  %v8602_v27 = vld [vmem:[%s12899_s2 + $0x2c0] ss:$8 sps:$4 sm:$0xff]  }
  0x7d   :  { %5445 = vmatprep.subr.bf16.mxu0 %v8529_v52  ;;  %v8605_v52 = vld [vmem:[%s12899_s2 + $0xbc0] ss:$8 sps:$4 sm:$0xff]  }
  0x7f   :  { %5077 = vmatpush1.bf16.msra.mxu1 %v8524_v30  ;;  %v8610_v30 = vld [vmem:[%s12899_s2 + $0x2d4] ss:$8 sps:$4 sm:$0xff]  }
  0x80   :  { %5446 = vmatpush1.bf16.msra.mxu0 %v8527_v31  ;;  %5087 = vmatprep.subr.bf16.mxu1 %v8532_v32  ;;  %v8613_v31 = vld [vmem:[%s12899_s2 + $0xbd4] ss:$8 sps:$4 sm:$0xff]   ;;  %v8608_v32 = vld [vmem:[%s12899_s2 + $0x2d0] ss:$8 sps:$4 sm:$0xff]  }
  0x81   :  { %5456 = vmatprep.subr.bf16.mxu0 %v8535_v33  ;;  %v8611_v33 = vld [vmem:[%s12899_s2 + $0xbd0] ss:$8 sps:$4 sm:$0xff]  }
  0x82   :  { %5079 = vmatmul.mubr.bf16.vlgmr.msra.gmra.mrb[0].mxu1 %v868_v35  ;;  %v8619_v35 = vld [vmem:[%s12899_s2 + $0xbe4] ss:$8 sps:$4 sm:$0xff]  }
  0x83   :  { %5448 = vmatmul.mubr.bf16.vlgmr.msra.gmra.mrb[0].mxu0 %v10233_v36  ;;  %5088 = vmatpush1.bf16.msra.mxu1 %v8530_v37  ;;  %v8614_v37 = vld [vmem:[%s12899_s2 + $0x2e0] ss:$8 sps:$4 sm:$0xff]  }
  0x84   :  { %5457 = vmatpush1.bf16.msra.mxu0 %v8533_v38  ;;  %5089 = vmatprep.subr.bf16.mxu1 %v8538_v21  ;;  %v10416_v38 = vld [vmem:[%s12900_s0 + $0x18] sm:$0xff]  ;;  %v8617_v21 = vld [vmem:[%s12899_s2 + $0xbe0] ss:$8 sps:$4 sm:$0xff]  }
  0x85   :  { %5458 = vmatprep.subr.bf16.mxu0 %v8541_v14  ;;  %5119 = vmatprep.mubr.bf16.mxu1 %v10248_v39  ;;  %v8622_v14 = vld [vmem:[%s12899_s2 + $0x2f4] ss:$8 sps:$4 sm:$0xff]  }
  0x86   :  { %5488 = vmatprep.mubr.bf16.mxu0 %v969_v40  ;;  %v8625_v40 = vld [vmem:[%s12899_s2 + $0xbf4] ss:$8 sps:$4 sm:$0xff]  }
  0x87   :  { %5090 = vmatpush1.bf16.msra.mxu1 %v8536_v41  ;;  %v10429_v41 = vrot.slane %v10416_v38, %v9928_v51 }
  0x88   :  { %5459 = vmatpush1.bf16.msra.mxu0 %v8539_v42  ;;  %5091 = vmatprep.subr.bf16.mxu1 %v8544_v43  ;;  %v8620_v42 = vld [vmem:[%s12899_s2 + $0x2f0] ss:$8 sps:$4 sm:$0xff]  }
  0x89   :  { %5460 = vmatprep.subr.bf16.mxu0 %v8547_v28  ;;  %v8623_v43 = vld [vmem:[%s12899_s2 + $0xbf0] ss:$8 sps:$4 sm:$0xff]   ;;  %v8628_v28 = vld [vmem:[%s12899_s2 + $0x304] ss:$8 sps:$4 sm:$0xff]  }
  0x8b   :  { %5092 = vmatpush1.bf16.msra.mxu1 %v8542_v44  ;;  %v8631_v44 = vld [vmem:[%s12899_s2 + $0xc04] ss:$8 sps:$4 sm:$0xff]  }
  0x8c   :  { %5461 = vmatpush1.bf16.msra.mxu0 %v8545_v46  ;;  %5093 = vmatprep.subr.bf16.mxu1 %v8550_v47  ;;  %v985_v46 = vcombine.high %v10429_v41, %v10429_v41  ;;  %v8626_v47 = vld [vmem:[%s12899_s2 + $0x300] ss:$8 sps:$4 sm:$0xff]  }
  0x8d   :  { %5462 = vmatprep.subr.bf16.mxu0 %v8553_v48  ;;  %v10450_v48 = vrot.slane %v10213_v29, %v9928_v51  ;;  %v8637_v29 = vld [vmem:[%s12899_s2 + $0xc14] ss:$8 sps:$4 sm:$0xff]  }
  0x8f   :  { %5094 = vmatpush1.bf16.msra.mxu1 %v8548_v49  ;;  %v967_v49 = vcombine.high %v10233_v36, %v10233_v36  ;;  %v10466_v36 = vrot.slane %v985_v46, %v9928_v51  ;;  %v8707_v46 = vld [vmem:[%s12899_s2 + $0xcd0] ss:$8 sps:$4 sm:$0xff]  }
  0x90   :  { %5463 = vmatpush1.bf16.msra.mxu0 %v8551_v50  ;;  %5095 = vmatprep.subr.bf16.mxu1 %v8556_v53  ;;  %v8629_v50 = vld [vmem:[%s12899_s2 + $0xc00] ss:$8 sps:$4 sm:$0xff]   ;;  %v8634_v53 = vld [vmem:[%s12899_s2 + $0x314] ss:$8 sps:$4 sm:$0xff]  }
  0x91   :  { %5464 = vmatprep.subr.bf16.mxu0 %v8559_v54  ;;  %v871_v54 = vcombine.high %v10248_v39, %v10248_v39  ;;  %v8640_v39 = vld [vmem:[%s12899_s2 + $0x324] ss:$8 sps:$4 sm:$0xff]  }
  0x93   :  { %5096 = vmatpush1.bf16.msra.mxu1 %v8554_v55  ;;  %v8632_v55 = vld [vmem:[%s12899_s2 + $0x310] ss:$8 sps:$4 sm:$0xff]  }
  0x94   :  { %5465 = vmatpush1.bf16.msra.mxu0 %v8557_v56  ;;  %5097 = vmatprep.subr.bf16.mxu1 %v8562_v57  ;;  %v8635_v56 = vld [vmem:[%s12899_s2 + $0xc10] ss:$8 sps:$4 sm:$0xff]   ;;  %v8643_v57 = vld [vmem:[%s12899_s2 + $0xc24] ss:$8 sps:$4 sm:$0xff]  }
  0x95   :  { %5466 = vmatprep.subr.bf16.mxu0 %v8565_v58  ;;  %v8638_v58 = vld [vmem:[%s12899_s2 + $0x320] ss:$8 sps:$4 sm:$0xff]  }
  0x97   :  { %5098 = vmatpush1.bf16.msra.mxu1 %v8560_v59  ;;  %v8641_v59 = vld [vmem:[%s12899_s2 + $0xc20] ss:$8 sps:$4 sm:$0xff]  }
  0x98   :  { %5467 = vmatpush1.bf16.msra.mxu0 %v8563_v60  ;;  %5099 = vmatprep.subr.bf16.mxu1 %v8568_v61  ;;  %v8646_v60 = vld [vmem:[%s12899_s2 + $0x334] ss:$8 sps:$4 sm:$0xff]  }
  0x99   :  { %5468 = vmatprep.subr.bf16.mxu0 %v8571_v62  ;;  %v8649_v61 = vld [vmem:[%s12899_s2 + $0xc34] ss:$8 sps:$4 sm:$0xff]   ;;  %v8644_v62 = vld [vmem:[%s12899_s2 + $0x330] ss:$8 sps:$4 sm:$0xff]  }
  0x9b   :  { %5100 = vmatpush1.bf16.msra.mxu1 %v8566_v63  ;;  %v8647_v63 = vld [vmem:[%s12899_s2 + $0xc30] ss:$8 sps:$4 sm:$0xff]  }
  0x9c   :  { %5469 = vmatpush1.bf16.msra.mxu0 %v8569_v0  ;;  %5101 = vmatprep.subr.bf16.mxu1 %v8574_v1  ;;  %v8652_v0 = vld [vmem:[%s12899_s2 + $0x344] ss:$8 sps:$4 sm:$0xff]  }
  0x9d   :  { %5470 = vmatprep.subr.bf16.mxu0 %v8577_v2  ;;  %v8655_v1 = vld [vmem:[%s12899_s2 + $0xc44] ss:$8 sps:$4 sm:$0xff]   ;;  %v8650_v2 = vld [vmem:[%s12899_s2 + $0x340] ss:$8 sps:$4 sm:$0xff]  }
  0x9f   :  { %5102 = vmatpush1.bf16.msra.mxu1 %v8572_v4  ;;  %v8653_v4 = vld [vmem:[%s12899_s2 + $0xc40] ss:$8 sps:$4 sm:$0xff]  }
  0xa0   :  { %5471 = vmatpush1.bf16.msra.mxu0 %v8575_v5  ;;  %5103 = vmatprep.subr.bf16.mxu1 %v8580_v6  ;;  %v8658_v5 = vld [vmem:[%s12899_s2 + $0x354] ss:$8 sps:$4 sm:$0xff]  }
  0xa1   :  { %5472 = vmatprep.subr.bf16.mxu0 %v8583_v7  ;;  %v8661_v6 = vld [vmem:[%s12899_s2 + $0xc54] ss:$8 sps:$4 sm:$0xff]   ;;  %v8656_v7 = vld [vmem:[%s12899_s2 + $0x350] ss:$8 sps:$4 sm:$0xff]  }
  0xa3   :  { %5104 = vmatpush1.bf16.msra.mxu1 %v8578_v8  ;;  %v8659_v8 = vld [vmem:[%s12899_s2 + $0xc50] ss:$8 sps:$4 sm:$0xff]  }
  0xa4   :  { %5473 = vmatpush1.bf16.msra.mxu0 %v8581_v9  ;;  %5105 = vmatprep.subr.bf16.mxu1 %v8586_v10  ;;  %v8664_v9 = vld [vmem:[%s12899_s2 + $0x364] ss:$8 sps:$4 sm:$0xff]  }
  0xa5   :  { %5474 = vmatprep.subr.bf16.mxu0 %v8589_v11  ;;  %v8667_v10 = vld [vmem:[%s12899_s2 + $0xc64] ss:$8 sps:$4 sm:$0xff]   ;;  %v8662_v11 = vld [vmem:[%s12899_s2 + $0x360] ss:$8 sps:$4 sm:$0xff]  }
  0xa7   :  { %5106 = vmatpush1.bf16.msra.mxu1 %v8584_v12  ;;  %v8665_v12 = vld [vmem:[%s12899_s2 + $0xc60] ss:$8 sps:$4 sm:$0xff]  }
  0xa8   :  { %5475 = vmatpush1.bf16.msra.mxu0 %v8587_v13  ;;  %5107 = vmatprep.subr.bf16.mxu1 %v8592_v16  ;;  %v8670_v13 = vld [vmem:[%s12899_s2 + $0x374] ss:$8 sps:$4 sm:$0xff]  }
  0xa9   :  { %5476 = vmatprep.subr.bf16.mxu0 %v8595_v17  ;;  %v8673_v16 = vld [vmem:[%s12899_s2 + $0xc74] ss:$8 sps:$4 sm:$0xff]   ;;  %v8668_v17 = vld [vmem:[%s12899_s2 + $0x370] ss:$8 sps:$4 sm:$0xff]  }
  0xab   :  { %5108 = vmatpush1.bf16.msra.mxu1 %v8590_v18  ;;  %v8671_v18 = vld [vmem:[%s12899_s2 + $0xc70] ss:$8 sps:$4 sm:$0xff]  }
  0xac   :  { %5477 = vmatpush1.bf16.msra.mxu0 %v8593_v19  ;;  %5109 = vmatprep.subr.bf16.mxu1 %v8598_v20  ;;  %v8676_v19 = vld [vmem:[%s12899_s2 + $0x384] ss:$8 sps:$4 sm:$0xff]  }
  0xad   :  { %5478 = vmatprep.subr.bf16.mxu0 %v8601_v22  ;;  %v8679_v20 = vld [vmem:[%s12899_s2 + $0xc84] ss:$8 sps:$4 sm:$0xff]   ;;  %v8674_v22 = vld [vmem:[%s12899_s2 + $0x380] ss:$8 sps:$4 sm:$0xff]  }
  0xaf   :  { %5110 = vmatpush1.bf16.msra.mxu1 %v8596_v23  ;;  %v8677_v23 = vld [vmem:[%s12899_s2 + $0xc80] ss:$8 sps:$4 sm:$0xff]  }
  0xb0   :  { %5479 = vmatpush1.bf16.msra.mxu0 %v8599_v24  ;;  %5111 = vmatprep.subr.bf16.mxu1 %v8604_v25  ;;  %v8682_v24 = vld [vmem:[%s12899_s2 + $0x394] ss:$8 sps:$4 sm:$0xff]  }
  0xb1   :  { %5480 = vmatprep.subr.bf16.mxu0 %v8607_v26  ;;  %v8685_v25 = vld [vmem:[%s12899_s2 + $0xc94] ss:$8 sps:$4 sm:$0xff]   ;;  %v8680_v26 = vld [vmem:[%s12899_s2 + $0x390] ss:$8 sps:$4 sm:$0xff]  }
  0xb3   :  { %5112 = vmatpush1.bf16.msra.mxu1 %v8602_v27  ;;  %v8683_v27 = vld [vmem:[%s12899_s2 + $0xc90] ss:$8 sps:$4 sm:$0xff]  }
  0xb4   :  { %5481 = vmatpush1.bf16.msra.mxu0 %v8605_v52  ;;  %5113 = vmatprep.subr.bf16.mxu1 %v8610_v30  ;;  %v8688_v52 = vld [vmem:[%s12899_s2 + $0x3a4] ss:$8 sps:$4 sm:$0xff]  }
  0xb5   :  { %5482 = vmatprep.subr.bf16.mxu0 %v8613_v31  ;;  %v8691_v30 = vld [vmem:[%s12899_s2 + $0xca4] ss:$8 sps:$4 sm:$0xff]   ;;  %v8686_v31 = vld [vmem:[%s12899_s2 + $0x3a0] ss:$8 sps:$4 sm:$0xff]  }
  0xb7   :  { %5114 = vmatpush1.bf16.msra.mxu1 %v8608_v32  ;;  %v8689_v32 = vld [vmem:[%s12899_s2 + $0xca0] ss:$8 sps:$4 sm:$0xff]  }
  0xb8   :  { %5483 = vmatpush1.bf16.msra.mxu0 %v8611_v33  ;;  %5115 = vmatprep.subr.bf16.mxu1 %v8616_v34  ;;  %v8694_v33 = vld [vmem:[%s12899_s2 + $0x3b4] ss:$8 sps:$4 sm:$0xff]  }
  0xb9   :  { %5484 = vmatprep.subr.bf16.mxu0 %v8619_v35  ;;  %v8697_v34 = vld [vmem:[%s12899_s2 + $0xcb4] ss:$8 sps:$4 sm:$0xff]   ;;  %v8692_v35 = vld [vmem:[%s12899_s2 + $0x3b0] ss:$8 sps:$4 sm:$0xff]  }
  0xbb   :  { %5116 = vmatpush1.bf16.msra.mxu1 %v8614_v37  ;;  %v8695_v37 = vld [vmem:[%s12899_s2 + $0xcb0] ss:$8 sps:$4 sm:$0xff]  }
  0xbc   :  { %5485 = vmatpush1.bf16.msra.mxu0 %v8617_v21  ;;  %5117 = vmatprep.subr.bf16.mxu1 %v8622_v14  ;;  %v8700_v21 = vld [vmem:[%s12899_s2 + $0x3c4] ss:$8 sps:$4 sm:$0xff]  }
  0xbd   :  { %5486 = vmatprep.subr.bf16.mxu0 %v8625_v40  ;;  %v8703_v14 = vld [vmem:[%s12899_s2 + $0xcc4] ss:$8 sps:$4 sm:$0xff]   ;;  %v8698_v40 = vld [vmem:[%s12899_s2 + $0x3c0] ss:$8 sps:$4 sm:$0xff]  }
  0xbf   :  { %5118 = vmatpush1.bf16.msra.mxu1 %v8620_v42  ;;  %v8701_v42 = vld [vmem:[%s12899_s2 + $0xcc0] ss:$8 sps:$4 sm:$0xff]  }
  0xc0   :  { %5487 = vmatpush1.bf16.msra.mxu0 %v8623_v43  ;;  %5128 = vmatprep.subr.bf16.mxu1 %v8628_v28  ;;  %v8706_v43 = vld [vmem:[%s12899_s2 + $0x3d4] ss:$8 sps:$4 sm:$0xff]  }
  0xc1   :  { %5497 = vmatprep.subr.bf16.mxu0 %v8631_v44  ;;  %v8709_v28 = vld [vmem:[%s12899_s2 + $0xcd4] ss:$8 sps:$4 sm:$0xff]   ;;  %v8704_v44 = vld [vmem:[%s12899_s2 + $0x3d0] ss:$8 sps:$4 sm:$0xff]  }
  0xc2   :  { %5120 = vmatmul.mubr.bf16.vlgmr.msra.gmra.mrb[0].mxu1 %v10450_v48 }
  0xc3   :  { %5489 = vmatmul.mubr.bf16.vlgmr.msra.gmra.mrb[0].mxu0 %v967_v49  ;;  %5129 = vmatpush1.bf16.msra.mxu1 %v8626_v47  ;;  %v8712_v47 = vld [vmem:[%s12899_s2 + $0x3e4] ss:$8 sps:$4 sm:$0xff]  }
  0xc4   :  { %5498 = vmatpush1.bf16.msra.mxu0 %v8629_v50  ;;  %5130 = vmatprep.subr.bf16.mxu1 %v8634_v53  ;;  %v8715_v49 = vld [vmem:[%s12899_s2 + $0xce4] ss:$8 sps:$4 sm:$0xff]   ;;  %v8710_v50 = vld [vmem:[%s12899_s2 + $0x3e0] ss:$8 sps:$4 sm:$0xff]  }
  0xc5   :  { %5499 = vmatprep.subr.bf16.mxu0 %v8637_v29  ;;  %5160 = vmatprep.mubr.bf16.mxu1 %v871_v54  ;;  %v8713_v53 = vld [vmem:[%s12899_s2 + $0xce0] ss:$8 sps:$4 sm:$0xff]   ;;  %v8718_v54 = vld [vmem:[%s12899_s2 + $0x3f4] ss:$8 sps:$4 sm:$0xff]  }
  0xc6   :  { %5529 = vmatprep.mubr.bf16.mxu0 %v10466_v36  ;;  %v10635_v29 = vld.sshfl [vmem:[%s12900_s0 + $0x8] sm:$0xff pattern:$0x75316420] }
  0xc7   :  { %5131 = vmatpush1.bf16.msra.mxu1 %v8632_v55  ;;  %v8721_v55 = vld [vmem:[%s12899_s2 + $0xcf4] ss:$8 sps:$4 sm:$0xff]  }
  0xc8   :  { %5500 = vmatpush1.bf16.msra.mxu0 %v8635_v56  ;;  %5132 = vmatprep.subr.bf16.mxu1 %v8640_v39  ;;  %v8716_v56 = vld [vmem:[%s12899_s2 + $0x3f0] ss:$8 sps:$4 sm:$0xff]  }
  0xc9   :  { %5501 = vmatprep.subr.bf16.mxu0 %v8643_v57  ;;  %v8719_v39 = vld [vmem:[%s12899_s2 + $0xcf0] ss:$8 sps:$4 sm:$0xff]   ;;  %v8724_v57 = vld [vmem:[%s12899_s2 + $0x404] ss:$8 sps:$4 sm:$0xff]  }
  0xcb   :  { %5133 = vmatpush1.bf16.msra.mxu1 %v8638_v58  ;;  %v8727_v58 = vld [vmem:[%s12899_s2 + $0xd04] ss:$8 sps:$4 sm:$0xff]  }
  0xcc   :  { %5502 = vmatpush1.bf16.msra.mxu0 %v8641_v59  ;;  %5134 = vmatprep.subr.bf16.mxu1 %v8646_v60  ;;  %v887_v59 = vcombine.high %v10635_v29, %v10635_v29  ;;  %v8722_v60 = vld [vmem:[%s12899_s2 + $0x400] ss:$8 sps:$4 sm:$0xff]  }
  0xcd   :  { %5503 = vmatprep.subr.bf16.mxu0 %v8649_v61  ;;  %v8725_v61 = vld [vmem:[%s12899_s2 + $0xd00] ss:$8 sps:$4 sm:$0xff]  }
  0xcf   :  { %5135 = vmatpush1.bf16.msra.mxu1 %v8644_v62  ;;  %v869_v62 = vcombine.high %v10450_v48, %v10450_v48  ;;  %v1017_v48 = vcombine.high %v10466_v36, %v10466_v36  ;;  %v8739_v36 = vld [vmem:[%s12899_s2 + $0xd24] ss:$8 sps:$4 sm:$0xff]  }
  0xd0   :  { %5504 = vmatpush1.bf16.msra.mxu0 %v8647_v63  ;;  %5136 = vmatprep.subr.bf16.mxu1 %v8652_v0  ;;  %v10667_v63 = vrot.slane %v10429_v41, %v9928_v51  ;;  %v8730_v0 = vld [vmem:[%s12899_s2 + $0x414] ss:$8 sps:$4 sm:$0xff]   ;;  %v8728_v41 = vld [vmem:[%s12899_s2 + $0x410] ss:$8 sps:$4 sm:$0xff]  }
  0xd1   :  { %5505 = vmatprep.subr.bf16.mxu0 %v8655_v1  ;;  %v8733_v1 = vld [vmem:[%s12899_s2 + $0xd14] ss:$8 sps:$4 sm:$0xff]  }
  0xd3   :  { %5137 = vmatpush1.bf16.msra.mxu1 %v8650_v2  ;;  %v10676_v2 = vrot.slane %v887_v59, %v9928_v51  ;;  %v8803_v59 = vld [vmem:[%s12899_s2 + $0xdd0] ss:$8 sps:$4 sm:$0xff]  }
  0xd4   :  { %5506 = vmatpush1.bf16.msra.mxu0 %v8653_v4  ;;  %5138 = vmatprep.subr.bf16.mxu1 %v8658_v5  ;;  %v8731_v4 = vld [vmem:[%s12899_s2 + $0xd10] ss:$8 sps:$4 sm:$0xff]   ;;  %v8736_v5 = vld [vmem:[%s12899_s2 + $0x424] ss:$8 sps:$4 sm:$0xff]  }
  0xd5   :  { %5507 = vmatprep.subr.bf16.mxu0 %v8661_v6  ;;  %v8734_v6 = vld [vmem:[%s12899_s2 + $0x420] ss:$8 sps:$4 sm:$0xff]  }
  0xd7   :  { %5139 = vmatpush1.bf16.msra.mxu1 %v8656_v7  ;;  %v8737_v7 = vld [vmem:[%s12899_s2 + $0xd20] ss:$8 sps:$4 sm:$0xff]  }
  0xd8   :  { %5508 = vmatpush1.bf16.msra.mxu0 %v8659_v8  ;;  %5140 = vmatprep.subr.bf16.mxu1 %v8664_v9  ;;  %v8742_v8 = vld [vmem:[%s12899_s2 + $0x434] ss:$8 sps:$4 sm:$0xff]  }
  0xd9   :  { %5509 = vmatprep.subr.bf16.mxu0 %v8667_v10  ;;  %v8745_v9 = vld [vmem:[%s12899_s2 + $0xd34] ss:$8 sps:$4 sm:$0xff]   ;;  %v8740_v10 = vld [vmem:[%s12899_s2 + $0x430] ss:$8 sps:$4 sm:$0xff]  }
  0xdb   :  { %5141 = vmatpush1.bf16.msra.mxu1 %v8662_v11  ;;  %v8743_v11 = vld [vmem:[%s12899_s2 + $0xd30] ss:$8 sps:$4 sm:$0xff]  }
  0xdc   :  { %5510 = vmatpush1.bf16.msra.mxu0 %v8665_v12  ;;  %5142 = vmatprep.subr.bf16.mxu1 %v8670_v13  ;;  %v8748_v12 = vld [vmem:[%s12899_s2 + $0x444] ss:$8 sps:$4 sm:$0xff]  }
  0xdd   :  { %5511 = vmatprep.subr.bf16.mxu0 %v8673_v16  ;;  %v8751_v13 = vld [vmem:[%s12899_s2 + $0xd44] ss:$8 sps:$4 sm:$0xff]   ;;  %v8746_v16 = vld [vmem:[%s12899_s2 + $0x440] ss:$8 sps:$4 sm:$0xff]  }
  0xdf   :  { %5143 = vmatpush1.bf16.msra.mxu1 %v8668_v17  ;;  %v8749_v17 = vld [vmem:[%s12899_s2 + $0xd40] ss:$8 sps:$4 sm:$0xff]  }
  0xe0   :  { %5512 = vmatpush1.bf16.msra.mxu0 %v8671_v18  ;;  %5144 = vmatprep.subr.bf16.mxu1 %v8676_v19  ;;  %v8754_v18 = vld [vmem:[%s12899_s2 + $0x454] ss:$8 sps:$4 sm:$0xff]  }
  0xe1   :  { %5513 = vmatprep.subr.bf16.mxu0 %v8679_v20  ;;  %v8757_v19 = vld [vmem:[%s12899_s2 + $0xd54] ss:$8 sps:$4 sm:$0xff]   ;;  %v8752_v20 = vld [vmem:[%s12899_s2 + $0x450] ss:$8 sps:$4 sm:$0xff]  }
  0xe3   :  { %5145 = vmatpush1.bf16.msra.mxu1 %v8674_v22  ;;  %v8755_v22 = vld [vmem:[%s12899_s2 + $0xd50] ss:$8 sps:$4 sm:$0xff]  }
  0xe4   :  { %5514 = vmatpush1.bf16.msra.mxu0 %v8677_v23  ;;  %5146 = vmatprep.subr.bf16.mxu1 %v8682_v24  ;;  %v8760_v23 = vld [vmem:[%s12899_s2 + $0x464] ss:$8 sps:$4 sm:$0xff]  }
  0xe5   :  { %5515 = vmatprep.subr.bf16.mxu0 %v8685_v25  ;;  %v8763_v24 = vld [vmem:[%s12899_s2 + $0xd64] ss:$8 sps:$4 sm:$0xff]   ;;  %v8758_v25 = vld [vmem:[%s12899_s2 + $0x460] ss:$8 sps:$4 sm:$0xff]  }
  0xe7   :  { %5147 = vmatpush1.bf16.msra.mxu1 %v8680_v26  ;;  %v8761_v26 = vld [vmem:[%s12899_s2 + $0xd60] ss:$8 sps:$4 sm:$0xff]  }
  0xe8   :  { %5516 = vmatpush1.bf16.msra.mxu0 %v8683_v27  ;;  %5148 = vmatprep.subr.bf16.mxu1 %v8688_v52  ;;  %v8766_v27 = vld [vmem:[%s12899_s2 + $0x474] ss:$8 sps:$4 sm:$0xff]  }
  0xe9   :  { %5517 = vmatprep.subr.bf16.mxu0 %v8691_v30  ;;  %v8769_v52 = vld [vmem:[%s12899_s2 + $0xd74] ss:$8 sps:$4 sm:$0xff]   ;;  %v8764_v30 = vld [vmem:[%s12899_s2 + $0x470] ss:$8 sps:$4 sm:$0xff]  }
  0xeb   :  { %5149 = vmatpush1.bf16.msra.mxu1 %v8686_v31  ;;  %v8767_v31 = vld [vmem:[%s12899_s2 + $0xd70] ss:$8 sps:$4 sm:$0xff]  }
  0xec   :  { %5518 = vmatpush1.bf16.msra.mxu0 %v8689_v32  ;;  %5150 = vmatprep.subr.bf16.mxu1 %v8694_v33  ;;  %v8772_v32 = vld [vmem:[%s12899_s2 + $0x484] ss:$8 sps:$4 sm:$0xff]  }
  0xed   :  { %5519 = vmatprep.subr.bf16.mxu0 %v8697_v34  ;;  %v8775_v33 = vld [vmem:[%s12899_s2 + $0xd84] ss:$8 sps:$4 sm:$0xff]   ;;  %v8770_v34 = vld [vmem:[%s12899_s2 + $0x480] ss:$8 sps:$4 sm:$0xff]  }
  0xef   :  { %5151 = vmatpush1.bf16.msra.mxu1 %v8692_v35  ;;  %v8773_v35 = vld [vmem:[%s12899_s2 + $0xd80] ss:$8 sps:$4 sm:$0xff]  }
  0xf0   :  { %5520 = vmatpush1.bf16.msra.mxu0 %v8695_v37  ;;  %5152 = vmatprep.subr.bf16.mxu1 %v8700_v21  ;;  %v8778_v37 = vld [vmem:[%s12899_s2 + $0x494] ss:$8 sps:$4 sm:$0xff]  }
  0xf1   :  { %5521 = vmatprep.subr.bf16.mxu0 %v8703_v14  ;;  %v8781_v21 = vld [vmem:[%s12899_s2 + $0xd94] ss:$8 sps:$4 sm:$0xff]   ;;  %v8776_v14 = vld [vmem:[%s12899_s2 + $0x490] ss:$8 sps:$4 sm:$0xff]  }
  0xf3   :  { %5153 = vmatpush1.bf16.msra.mxu1 %v8698_v40  ;;  %v8779_v40 = vld [vmem:[%s12899_s2 + $0xd90] ss:$8 sps:$4 sm:$0xff]  }
  0xf4   :  { %5522 = vmatpush1.bf16.msra.mxu0 %v8701_v42  ;;  %5154 = vmatprep.subr.bf16.mxu1 %v8706_v43  ;;  %v8784_v42 = vld [vmem:[%s12899_s2 + $0x4a4] ss:$8 sps:$4 sm:$0xff]  }
  0xf5   :  { %5523 = vmatprep.subr.bf16.mxu0 %v8709_v28  ;;  %v8787_v43 = vld [vmem:[%s12899_s2 + $0xda4] ss:$8 sps:$4 sm:$0xff]   ;;  %v8782_v28 = vld [vmem:[%s12899_s2 + $0x4a0] ss:$8 sps:$4 sm:$0xff]  }
  0xf7   :  { %5155 = vmatpush1.bf16.msra.mxu1 %v8704_v44  ;;  %v8785_v44 = vld [vmem:[%s12899_s2 + $0xda0] ss:$8 sps:$4 sm:$0xff]  }
  0xf8   :  { %5524 = vmatpush1.bf16.msra.mxu0 %v8707_v46  ;;  %5156 = vmatprep.subr.bf16.mxu1 %v8712_v47  ;;  %v8790_v46 = vld [vmem:[%s12899_s2 + $0x4b4] ss:$8 sps:$4 sm:$0xff]  }
  0xf9   :  { %5525 = vmatprep.subr.bf16.mxu0 %v8715_v49  ;;  %v8793_v47 = vld [vmem:[%s12899_s2 + $0xdb4] ss:$8 sps:$4 sm:$0xff]   ;;  %v8788_v49 = vld [vmem:[%s12899_s2 + $0x4b0] ss:$8 sps:$4 sm:$0xff]  }
  0xfb   :  { %5157 = vmatpush1.bf16.msra.mxu1 %v8710_v50  ;;  %v8791_v50 = vld [vmem:[%s12899_s2 + $0xdb0] ss:$8 sps:$4 sm:$0xff]  }
  0xfc   :  { %5526 = vmatpush1.bf16.msra.mxu0 %v8713_v53  ;;  %5158 = vmatprep.subr.bf16.mxu1 %v8718_v54  ;;  %v8796_v53 = vld [vmem:[%s12899_s2 + $0x4c4] ss:$8 sps:$4 sm:$0xff]  }
  0xfd   :  { %5527 = vmatprep.subr.bf16.mxu0 %v8721_v55  ;;  %v8799_v54 = vld [vmem:[%s12899_s2 + $0xdc4] ss:$8 sps:$4 sm:$0xff]   ;;  %v8794_v55 = vld [vmem:[%s12899_s2 + $0x4c0] ss:$8 sps:$4 sm:$0xff]  }
  0xff   :  { %5159 = vmatpush1.bf16.msra.mxu1 %v8716_v56  ;;  %v8797_v56 = vld [vmem:[%s12899_s2 + $0xdc0] ss:$8 sps:$4 sm:$0xff]  }
 0x100   :  { %5528 = vmatpush1.bf16.msra.mxu0 %v8719_v39  ;;  %5169 = vmatprep.subr.bf16.mxu1 %v8724_v57  ;;  %v8802_v39 = vld [vmem:[%s12899_s2 + $0x4d4] ss:$8 sps:$4 sm:$0xff]  }
 0x101   :  { %5538 = vmatprep.subr.bf16.mxu0 %v8727_v58  ;;  %v8805_v57 = vld [vmem:[%s12899_s2 + $0xdd4] ss:$8 sps:$4 sm:$0xff]   ;;  %v8800_v58 = vld [vmem:[%s12899_s2 + $0x4d0] ss:$8 sps:$4 sm:$0xff]  }
 0x102   :  { %5161 = vmatmul.mubr.bf16.vlgmr.msra.gmra.mrb[0].mxu1 %v869_v62  ;;  %v970_v62 = vcombine.high %v10416_v38, %v10416_v38  ;;  %v8817_v38 = vld [vmem:[%s12899_s2 + $0xdf4] ss:$8 sps:$4 sm:$0xff]  }
 0x103   :  { %5530 = vmatmul.mubr.bf16.vlgmr.msra.gmra.mrb[0].mxu0 %v10667_v63  ;;  %5170 = vmatpush1.bf16.msra.mxu1 %v8722_v60  ;;  %v8808_v60 = vld [vmem:[%s12899_s2 + $0x4e4] ss:$8 sps:$4 sm:$0xff]  }
 0x104   :  { %5539 = vmatpush1.bf16.msra.mxu0 %v8725_v61  ;;  %5171 = vmatprep.subr.bf16.mxu1 %v8730_v0  ;;  %v8811_v61 = vld [vmem:[%s12899_s2 + $0xde4] ss:$8 sps:$4 sm:$0xff]   ;;  %v8806_v0 = vld [vmem:[%s12899_s2 + $0x4e0] ss:$8 sps:$4 sm:$0xff]  }
 0x105   :  { %5540 = vmatprep.subr.bf16.mxu0 %v8733_v1  ;;  %5201 = vmatprep.mubr.bf16.mxu1 %v10676_v2  ;;  %v8809_v1 = vld [vmem:[%s12899_s2 + $0xde0] ss:$8 sps:$4 sm:$0xff]  }
 0x106   :  { %5570 = vmatprep.mubr.bf16.mxu0 %v1017_v48  ;;  %v8814_v48 = vld [vmem:[%s12899_s2 + $0x4f4] ss:$8 sps:$4 sm:$0xff]  }
 0x107   :  { %5172 = vmatpush1.bf16.msra.mxu1 %v8728_v41  ;;  %v10853_v41 = vrot.slane %v970_v62, %v9928_v51  ;;  %v8887_v62 = vld [vmem:[%s12899_s2 + $0xeb0] ss:$8 sps:$4 sm:$0xff]  }
 0x108   :  { %5541 = vmatpush1.bf16.msra.mxu0 %v8731_v4  ;;  %5173 = vmatprep.subr.bf16.mxu1 %v8736_v5  ;;  %v8812_v4 = vld [vmem:[%s12899_s2 + $0x4f0] ss:$8 sps:$4 sm:$0xff]  }
 0x109   :  { %5542 = vmatprep.subr.bf16.mxu0 %v8739_v36  ;;  %v8815_v5 = vld [vmem:[%s12899_s2 + $0xdf0] ss:$8 sps:$4 sm:$0xff]   ;;  %v8820_v36 = vld [vmem:[%s12899_s2 + $0x504] ss:$8 sps:$4 sm:$0xff]  }
 0x10b   :  { %5174 = vmatpush1.bf16.msra.mxu1 %v8734_v6  ;;  %v8823_v6 = vld [vmem:[%s12899_s2 + $0xe04] ss:$8 sps:$4 sm:$0xff]  }
 0x10c   :  { %5543 = vmatpush1.bf16.msra.mxu0 %v8737_v7  ;;  %5175 = vmatprep.subr.bf16.mxu1 %v8742_v8  ;;  %v986_v7 = vcombine.high %v10853_v41, %v10853_v41  ;;  %v10871_v8 = vrot.slane %v10635_v29, %v9928_v51  ;;  %v8826_v29 = vld [vmem:[%s12899_s2 + $0x514] ss:$8 sps:$4 sm:$0xff]  }
 0x10d   :  { %5544 = vmatprep.subr.bf16.mxu0 %v8745_v9  ;;  %v1015_v9 = vcombine.high %v10667_v63, %v10667_v63  ;;  %v8829_v63 = vld [vmem:[%s12899_s2 + $0xe14] ss:$8 sps:$4 sm:$0xff]  }
 0x10f   :  { %5176 = vmatpush1.bf16.msra.mxu1 %v8740_v10  ;;  %v8818_v10 = vld [vmem:[%s12899_s2 + $0x500] ss:$8 sps:$4 sm:$0xff]  }
 0x110   :  { %5545 = vmatpush1.bf16.msra.mxu0 %v8743_v11  ;;  %5177 = vmatprep.subr.bf16.mxu1 %v8748_v12  ;;  %v8821_v11 = vld [vmem:[%s12899_s2 + $0xe00] ss:$8 sps:$4 sm:$0xff]   ;;  %v919_v12 = vcombine.high %v10676_v2, %v10676_v2  ;;  %v8832_v2 = vld [vmem:[%s12899_s2 + $0x524] ss:$8 sps:$4 sm:$0xff]  }
 0x111   :  { %5546 = vmatprep.subr.bf16.mxu0 %v8751_v13  ;;  %v10890_v13 = vrot.slane %v986_v7, %v9928_v51  ;;  %v8904_v7 = vld [vmem:[%s12899_s2 + $0x5e4] ss:$8 sps:$4 sm:$0xff]  }
 0x113   :  { %5178 = vmatpush1.bf16.msra.mxu1 %v8746_v16  ;;  %v8824_v16 = vld [vmem:[%s12899_s2 + $0x510] ss:$8 sps:$4 sm:$0xff]  }
 0x114   :  { %5547 = vmatpush1.bf16.msra.mxu0 %v8749_v17  ;;  %5179 = vmatprep.subr.bf16.mxu1 %v8754_v18  ;;  %v8827_v17 = vld [vmem:[%s12899_s2 + $0xe10] ss:$8 sps:$4 sm:$0xff]   ;;  %v8835_v18 = vld [vmem:[%s12899_s2 + $0xe24] ss:$8 sps:$4 sm:$0xff]  }
 0x115   :  { %5548 = vmatprep.subr.bf16.mxu0 %v8757_v19  ;;  %v8830_v19 = vld [vmem:[%s12899_s2 + $0x520] ss:$8 sps:$4 sm:$0xff]  }
 0x117   :  { %5180 = vmatpush1.bf16.msra.mxu1 %v8752_v20  ;;  %v8833_v20 = vld [vmem:[%s12899_s2 + $0xe20] ss:$8 sps:$4 sm:$0xff]  }
 0x118   :  { %5549 = vmatpush1.bf16.msra.mxu0 %v8755_v22  ;;  %5181 = vmatprep.subr.bf16.mxu1 %v8760_v23  ;;  %v8838_v22 = vld [vmem:[%s12899_s2 + $0x534] ss:$8 sps:$4 sm:$0xff]  }
 0x119   :  { %5550 = vmatprep.subr.bf16.mxu0 %v8763_v24  ;;  %v8841_v23 = vld [vmem:[%s12899_s2 + $0xe34] ss:$8 sps:$4 sm:$0xff]   ;;  %v8836_v24 = vld [vmem:[%s12899_s2 + $0x530] ss:$8 sps:$4 sm:$0xff]  }
 0x11b   :  { %5182 = vmatpush1.bf16.msra.mxu1 %v8758_v25  ;;  %v8839_v25 = vld [vmem:[%s12899_s2 + $0xe30] ss:$8 sps:$4 sm:$0xff]  }
 0x11c   :  { %5551 = vmatpush1.bf16.msra.mxu0 %v8761_v26  ;;  %5183 = vmatprep.subr.bf16.mxu1 %v8766_v27  ;;  %v8844_v26 = vld [vmem:[%s12899_s2 + $0x544] ss:$8 sps:$4 sm:$0xff]  }
 0x11d   :  { %5552 = vmatprep.subr.bf16.mxu0 %v8769_v52  ;;  %v8847_v27 = vld [vmem:[%s12899_s2 + $0xe44] ss:$8 sps:$4 sm:$0xff]   ;;  %v8842_v52 = vld [vmem:[%s12899_s2 + $0x540] ss:$8 sps:$4 sm:$0xff]  }
 0x11f   :  { %5184 = vmatpush1.bf16.msra.mxu1 %v8764_v30  ;;  %v8845_v30 = vld [vmem:[%s12899_s2 + $0xe40] ss:$8 sps:$4 sm:$0xff]  }
 0x120   :  { %5553 = vmatpush1.bf16.msra.mxu0 %v8767_v31  ;;  %5185 = vmatprep.subr.bf16.mxu1 %v8772_v32  ;;  %v8850_v31 = vld [vmem:[%s12899_s2 + $0x554] ss:$8 sps:$4 sm:$0xff]  }
 0x121   :  { %5554 = vmatprep.subr.bf16.mxu0 %v8775_v33  ;;  %v8853_v32 = vld [vmem:[%s12899_s2 + $0xe54] ss:$8 sps:$4 sm:$0xff]   ;;  %v8848_v33 = vld [vmem:[%s12899_s2 + $0x550] ss:$8 sps:$4 sm:$0xff]  }
 0x123   :  { %5186 = vmatpush1.bf16.msra.mxu1 %v8770_v34  ;;  %v8851_v34 = vld [vmem:[%s12899_s2 + $0xe50] ss:$8 sps:$4 sm:$0xff]  }
 0x124   :  { %5555 = vmatpush1.bf16.msra.mxu0 %v8773_v35  ;;  %5187 = vmatprep.subr.bf16.mxu1 %v8778_v37  ;;  %v8856_v35 = vld [vmem:[%s12899_s2 + $0x564] ss:$8 sps:$4 sm:$0xff]  }
 0x125   :  { %5556 = vmatprep.subr.bf16.mxu0 %v8781_v21  ;;  %v8859_v37 = vld [vmem:[%s12899_s2 + $0xe64] ss:$8 sps:$4 sm:$0xff]   ;;  %v8854_v21 = vld [vmem:[%s12899_s2 + $0x560] ss:$8 sps:$4 sm:$0xff]  }
 0x127   :  { %5188 = vmatpush1.bf16.msra.mxu1 %v8776_v14  ;;  %v8857_v14 = vld [vmem:[%s12899_s2 + $0xe60] ss:$8 sps:$4 sm:$0xff]  }
 0x128   :  { %5557 = vmatpush1.bf16.msra.mxu0 %v8779_v40  ;;  %5189 = vmatprep.subr.bf16.mxu1 %v8784_v42  ;;  %v8862_v40 = vld [vmem:[%s12899_s2 + $0x574] ss:$8 sps:$4 sm:$0xff]  }
 0x129   :  { %5558 = vmatprep.subr.bf16.mxu0 %v8787_v43  ;;  %v8865_v42 = vld [vmem:[%s12899_s2 + $0xe74] ss:$8 sps:$4 sm:$0xff]   ;;  %v8860_v43 = vld [vmem:[%s12899_s2 + $0x570] ss:$8 sps:$4 sm:$0xff]  }
 0x12b   :  { %5190 = vmatpush1.bf16.msra.mxu1 %v8782_v28  ;;  %v8863_v28 = vld [vmem:[%s12899_s2 + $0xe70] ss:$8 sps:$4 sm:$0xff]  }
 0x12c   :  { %5559 = vmatpush1.bf16.msra.mxu0 %v8785_v44  ;;  %5191 = vmatprep.subr.bf16.mxu1 %v8790_v46  ;;  %v8868_v44 = vld [vmem:[%s12899_s2 + $0x584] ss:$8 sps:$4 sm:$0xff]  }
 0x12d   :  { %5560 = vmatprep.subr.bf16.mxu0 %v8793_v47  ;;  %v8871_v46 = vld [vmem:[%s12899_s2 + $0xe84] ss:$8 sps:$4 sm:$0xff]   ;;  %v8866_v47 = vld [vmem:[%s12899_s2 + $0x580] ss:$8 sps:$4 sm:$0xff]  }
 0x12f   :  { %5192 = vmatpush1.bf16.msra.mxu1 %v8788_v49  ;;  %v8869_v49 = vld [vmem:[%s12899_s2 + $0xe80] ss:$8 sps:$4 sm:$0xff]  }
 0x130   :  { %5561 = vmatpush1.bf16.msra.mxu0 %v8791_v50  ;;  %5193 = vmatprep.subr.bf16.mxu1 %v8796_v53  ;;  %v8874_v50 = vld [vmem:[%s12899_s2 + $0x594] ss:$8 sps:$4 sm:$0xff]  }
 0x131   :  { %5562 = vmatprep.subr.bf16.mxu0 %v8799_v54  ;;  %v8877_v53 = vld [vmem:[%s12899_s2 + $0xe94] ss:$8 sps:$4 sm:$0xff]   ;;  %v8872_v54 = vld [vmem:[%s12899_s2 + $0x590] ss:$8 sps:$4 sm:$0xff]  }
 0x133   :  { %5194 = vmatpush1.bf16.msra.mxu1 %v8794_v55  ;;  %v8875_v55 = vld [vmem:[%s12899_s2 + $0xe90] ss:$8 sps:$4 sm:$0xff]  }
 0x134   :  { %5563 = vmatpush1.bf16.msra.mxu0 %v8797_v56  ;;  %5195 = vmatprep.subr.bf16.mxu1 %v8802_v39  ;;  %v8880_v56 = vld [vmem:[%s12899_s2 + $0x5a4] ss:$8 sps:$4 sm:$0xff]  }
 0x135   :  { %5564 = vmatprep.subr.bf16.mxu0 %v8805_v57  ;;  %v8883_v39 = vld [vmem:[%s12899_s2 + $0xea4] ss:$8 sps:$4 sm:$0xff]   ;;  %v8878_v57 = vld [vmem:[%s12899_s2 + $0x5a0] ss:$8 sps:$4 sm:$0xff]  }
 0x137   :  { %5196 = vmatpush1.bf16.msra.mxu1 %v8800_v58  ;;  %v8881_v58 = vld [vmem:[%s12899_s2 + $0xea0] ss:$8 sps:$4 sm:$0xff]  }
 0x138   :  { %5565 = vmatpush1.bf16.msra.mxu0 %v8803_v59  ;;  %5197 = vmatprep.subr.bf16.mxu1 %v8808_v60  ;;  %v8886_v59 = vld [vmem:[%s12899_s2 + $0x5b4] ss:$8 sps:$4 sm:$0xff]  }
 0x139   :  { %5566 = vmatprep.subr.bf16.mxu0 %v8811_v61  ;;  %v8889_v60 = vld [vmem:[%s12899_s2 + $0xeb4] ss:$8 sps:$4 sm:$0xff]   ;;  %v8884_v61 = vld [vmem:[%s12899_s2 + $0x5b0] ss:$8 sps:$4 sm:$0xff]  }
 0x13b   :  { %5198 = vmatpush1.bf16.msra.mxu1 %v8806_v0  ;;  %v8892_v0 = vld [vmem:[%s12899_s2 + $0x5c4] ss:$8 sps:$4 sm:$0xff]  }
 0x13c   :  { %5567 = vmatpush1.bf16.msra.mxu0 %v8809_v1  ;;  %5199 = vmatprep.subr.bf16.mxu1 %v8814_v48  ;;  %v8895_v1 = vld [vmem:[%s12899_s2 + $0xec4] ss:$8 sps:$4 sm:$0xff]   ;;  %v8890_v48 = vld [vmem:[%s12899_s2 + $0x5c0] ss:$8 sps:$4 sm:$0xff]  }
 0x13d   :  { %5568 = vmatprep.subr.bf16.mxu0 %v8817_v38  ;;  %v8893_v38 = vld [vmem:[%s12899_s2 + $0xec0] ss:$8 sps:$4 sm:$0xff]  }
 0x13f   :  { %5200 = vmatpush1.bf16.msra.mxu1 %v8812_v4  ;;  %v8898_v4 = vld [vmem:[%s12899_s2 + $0x5d4] ss:$8 sps:$4 sm:$0xff]  }
 0x140   :  { %5569 = vmatpush1.bf16.msra.mxu0 %v8815_v5  ;;  %5210 = vmatprep.subr.bf16.mxu1 %v8820_v36  ;;  %v8901_v5 = vld [vmem:[%s12899_s2 + $0xed4] ss:$8 sps:$4 sm:$0xff]   ;;  %v8896_v36 = vld [vmem:[%s12899_s2 + $0x5d0] ss:$8 sps:$4 sm:$0xff]  }
 0x141   :  { %5579 = vmatprep.subr.bf16.mxu0 %v8823_v6  ;;  %v8899_v6 = vld [vmem:[%s12899_s2 + $0xed0] ss:$8 sps:$4 sm:$0xff]  }
 0x142   :  { %5202 = vmatmul.mubr.bf16.vlgmr.msra.gmra.mrb[0].mxu1 %v10871_v8 }
 0x143   :  { %5571 = vmatmul.mubr.bf16.vlgmr.msra.gmra.mrb[0].mxu0 %v1015_v9  ;;  %5211 = vmatpush1.bf16.msra.mxu1 %v8818_v10  ;;  %v8907_v9 = vld [vmem:[%s12899_s2 + $0xee4] ss:$8 sps:$4 sm:$0xff]  }
 0x144   :  { %5580 = vmatpush1.bf16.msra.mxu0 %v8821_v11  ;;  %5212 = vmatprep.subr.bf16.mxu1 %v8826_v29  ;;  %v9739_v10 = vld [vmem:[%s12900_s0 + $0x8] sm:$0xff] }
 0x145   :  { %5581 = vmatprep.subr.bf16.mxu0 %v8829_v63  ;;  %5242 = vmatprep.mubr.bf16.mxu1 %v919_v12  ;;  %v872_v11 = vcombine.high %v9739_v10, %v9739_v10  ;;  %v8902_v29 = vld [vmem:[%s12899_s2 + $0x5e0] ss:$8 sps:$4 sm:$0xff]   ;;  %v8910_v12 = vld [vmem:[%s12899_s2 + $0x5f4] ss:$8 sps:$4 sm:$0xff]   ;;  %v8981_v10 = vld [vmem:[%s12899_s2 + $0x6b0] ss:$8 sps:$4 sm:$0xff]  }
 0x146   :  { %5611 = vmatprep.mubr.bf16.mxu0 %v10890_v13  ;;  %v8905_v63 = vld [vmem:[%s12899_s2 + $0xee0] ss:$8 sps:$4 sm:$0xff]  }
 0x147   :  { %5213 = vmatpush1.bf16.msra.mxu1 %v8824_v16  ;;  %v8913_v16 = vld [vmem:[%s12899_s2 + $0xef4] ss:$8 sps:$4 sm:$0xff]  }
 0x148   :  { %5582 = vmatpush1.bf16.msra.mxu0 %v8827_v17  ;;  %5214 = vmatprep.subr.bf16.mxu1 %v8832_v2  ;;  %v11066_v17 = vrot.slane %v872_v11, %v9928_v51  ;;  %v8908_v2 = vld [vmem:[%s12899_s2 + $0x5f0] ss:$8 sps:$4 sm:$0xff]  }
 0x149   :  { %5583 = vmatprep.subr.bf16.mxu0 %v8835_v18  ;;  %v8911_v18 = vld [vmem:[%s12899_s2 + $0xef0] ss:$8 sps:$4 sm:$0xff]  }
 0x14a   :  { %v8984_v11 = vld [vmem:[%s12899_s2 + $0xfb0] ss:$8 sps:$4 sm:$0xff]  }
 0x14b   :  { %5215 = vmatpush1.bf16.msra.mxu1 %v8830_v19  ;;  %v8916_v19 = vld [vmem:[%s12899_s2 + $0x604] ss:$8 sps:$4 sm:$0xff]  }
 0x14c   :  { %5584 = vmatpush1.bf16.msra.mxu0 %v8833_v20  ;;  %5216 = vmatprep.subr.bf16.mxu1 %v8838_v22  ;;  %v8920_v20 = vld [vmem:[%s12899_s2 + $0xf04] ss:$8 sps:$4 sm:$0xff]   ;;  %v888_v22 = vcombine.high %v11066_v17, %v11066_v17 }
 0x14d   :  { %5585 = vmatprep.subr.bf16.mxu0 %v8841_v23  ;;  %v917_v23 = vcombine.high %v10871_v8, %v10871_v8  ;;  %v8923_v8 = vld [vmem:[%s12899_s2 + $0x614] ss:$8 sps:$4 sm:$0xff]  }
 0x14f   :  { %5217 = vmatpush1.bf16.msra.mxu1 %v8836_v24  ;;  %v11086_v24 = vrot.slane %v10853_v41, %v9928_v51  ;;  %v8926_v41 = vld [vmem:[%s12899_s2 + $0xf14] ss:$8 sps:$4 sm:$0xff]  }
 0x150   :  { %5586 = vmatpush1.bf16.msra.mxu0 %v8839_v25  ;;  %5218 = vmatprep.subr.bf16.mxu1 %v8844_v26  ;;  %v8914_v25 = vld [vmem:[%s12899_s2 + $0x600] ss:$8 sps:$4 sm:$0xff]  }
 0x151   :  { %5587 = vmatprep.subr.bf16.mxu0 %v8847_v27  ;;  %v8918_v26 = vld [vmem:[%s12899_s2 + $0xf00] ss:$8 sps:$4 sm:$0xff]   ;;  %v11101_v27 = vrot.slane %v888_v22, %v9928_v51  ;;  %v9001_v22 = vld [vmem:[%s12899_s2 + $0x6e4] ss:$8 sps:$4 sm:$0xff]  }
 0x153   :  { %5219 = vmatpush1.bf16.msra.mxu1 %v8842_v52  ;;  %v1018_v52 = vcombine.high %v10890_v13, %v10890_v13  ;;  %v8932_v13 = vld [vmem:[%s12899_s2 + $0xf24] ss:$8 sps:$4 sm:$0xff]  }
 0x154   :  { %5588 = vmatpush1.bf16.msra.mxu0 %v8845_v30  ;;  %5220 = vmatprep.subr.bf16.mxu1 %v8850_v31  ;;  %v8921_v30 = vld [vmem:[%s12899_s2 + $0x610] ss:$8 sps:$4 sm:$0xff]  }
 0x155   :  { %5589 = vmatprep.subr.bf16.mxu0 %v8853_v32  ;;  %v8924_v31 = vld [vmem:[%s12899_s2 + $0xf10] ss:$8 sps:$4 sm:$0xff]   ;;  %v8929_v32 = vld [vmem:[%s12899_s2 + $0x624] ss:$8 sps:$4 sm:$0xff]  }
 0x157   :  { %5221 = vmatpush1.bf16.msra.mxu1 %v8848_v33  ;;  %v8927_v33 = vld [vmem:[%s12899_s2 + $0x620] ss:$8 sps:$4 sm:$0xff]  }
 0x158   :  { %5590 = vmatpush1.bf16.msra.mxu0 %v8851_v34  ;;  %5222 = vmatprep.subr.bf16.mxu1 %v8856_v35  ;;  %v8930_v34 = vld [vmem:[%s12899_s2 + $0xf20] ss:$8 sps:$4 sm:$0xff]   ;;  %v8935_v35 = vld [vmem:[%s12899_s2 + $0x634] ss:$8 sps:$4 sm:$0xff]  }
 0x159   :  { %5591 = vmatprep.subr.bf16.mxu0 %v8859_v37  ;;  %v8938_v37 = vld [vmem:[%s12899_s2 + $0xf34] ss:$8 sps:$4 sm:$0xff]  }
 0x15b   :  { %5223 = vmatpush1.bf16.msra.mxu1 %v8854_v21  ;;  %v8933_v21 = vld [vmem:[%s12899_s2 + $0x630] ss:$8 sps:$4 sm:$0xff]  }
 0x15c   :  { %5592 = vmatpush1.bf16.msra.mxu0 %v8857_v14  ;;  %5224 = vmatprep.subr.bf16.mxu1 %v8862_v40  ;;  %v8936_v14 = vld [vmem:[%s12899_s2 + $0xf30] ss:$8 sps:$4 sm:$0xff]   ;;  %v8941_v40 = vld [vmem:[%s12899_s2 + $0x644] ss:$8 sps:$4 sm:$0xff]  }
 0x15d   :  { %5593 = vmatprep.subr.bf16.mxu0 %v8865_v42  ;;  %v8944_v42 = vld [vmem:[%s12899_s2 + $0xf44] ss:$8 sps:$4 sm:$0xff]  }
 0x15f   :  { %5225 = vmatpush1.bf16.msra.mxu1 %v8860_v43  ;;  %v8939_v43 = vld [vmem:[%s12899_s2 + $0x640] ss:$8 sps:$4 sm:$0xff]  }
 0x160   :  { %5594 = vmatpush1.bf16.msra.mxu0 %v8863_v28  ;;  %5226 = vmatprep.subr.bf16.mxu1 %v8868_v44  ;;  %v8942_v28 = vld [vmem:[%s12899_s2 + $0xf40] ss:$8 sps:$4 sm:$0xff]   ;;  %v8947_v44 = vld [vmem:[%s12899_s2 + $0x654] ss:$8 sps:$4 sm:$0xff]  }
 0x161   :  { %5595 = vmatprep.subr.bf16.mxu0 %v8871_v46  ;;  %v8950_v46 = vld [vmem:[%s12899_s2 + $0xf54] ss:$8 sps:$4 sm:$0xff]  }
 0x163   :  { %5227 = vmatpush1.bf16.msra.mxu1 %v8866_v47  ;;  %v8945_v47 = vld [vmem:[%s12899_s2 + $0x650] ss:$8 sps:$4 sm:$0xff]  }
 0x164   :  { %5596 = vmatpush1.bf16.msra.mxu0 %v8869_v49  ;;  %5228 = vmatprep.subr.bf16.mxu1 %v8874_v50  ;;  %v8948_v49 = vld [vmem:[%s12899_s2 + $0xf50] ss:$8 sps:$4 sm:$0xff]   ;;  %v8953_v50 = vld [vmem:[%s12899_s2 + $0x664] ss:$8 sps:$4 sm:$0xff]  }
 0x165   :  { %5597 = vmatprep.subr.bf16.mxu0 %v8877_v53  ;;  %v8956_v53 = vld [vmem:[%s12899_s2 + $0xf64] ss:$8 sps:$4 sm:$0xff]  }
 0x167   :  { %5229 = vmatpush1.bf16.msra.mxu1 %v8872_v54  ;;  %v8951_v54 = vld [vmem:[%s12899_s2 + $0x660] ss:$8 sps:$4 sm:$0xff]  }
 0x168   :  { %5598 = vmatpush1.bf16.msra.mxu0 %v8875_v55  ;;  %5230 = vmatprep.subr.bf16.mxu1 %v8880_v56  ;;  %v8954_v55 = vld [vmem:[%s12899_s2 + $0xf60] ss:$8 sps:$4 sm:$0xff]   ;;  %v8959_v56 = vld [vmem:[%s12899_s2 + $0x674] ss:$8 sps:$4 sm:$0xff]  }
 0x169   :  { %5599 = vmatprep.subr.bf16.mxu0 %v8883_v39  ;;  %v8962_v39 = vld [vmem:[%s12899_s2 + $0xf74] ss:$8 sps:$4 sm:$0xff]  }
 0x16b   :  { %5231 = vmatpush1.bf16.msra.mxu1 %v8878_v57  ;;  %v8957_v57 = vld [vmem:[%s12899_s2 + $0x670] ss:$8 sps:$4 sm:$0xff]  }
 0x16c   :  { %5600 = vmatpush1.bf16.msra.mxu0 %v8881_v58  ;;  %5232 = vmatprep.subr.bf16.mxu1 %v8886_v59  ;;  %v8960_v58 = vld [vmem:[%s12899_s2 + $0xf70] ss:$8 sps:$4 sm:$0xff]   ;;  %v8965_v59 = vld [vmem:[%s12899_s2 + $0x684] ss:$8 sps:$4 sm:$0xff]  }
 0x16d   :  { %5601 = vmatprep.subr.bf16.mxu0 %v8889_v60  ;;  %v8968_v60 = vld [vmem:[%s12899_s2 + $0xf84] ss:$8 sps:$4 sm:$0xff]  }
 0x16f   :  { %5233 = vmatpush1.bf16.msra.mxu1 %v8884_v61  ;;  %v8963_v61 = vld [vmem:[%s12899_s2 + $0x680] ss:$8 sps:$4 sm:$0xff]  }
 0x170   :  { %5602 = vmatpush1.bf16.msra.mxu0 %v8887_v62  ;;  %5234 = vmatprep.subr.bf16.mxu1 %v8892_v0  ;;  %v8966_v62 = vld [vmem:[%s12899_s2 + $0xf80] ss:$8 sps:$4 sm:$0xff]   ;;  %v8971_v0 = vld [vmem:[%s12899_s2 + $0x694] ss:$8 sps:$4 sm:$0xff]  }
 0x171   :  { %5603 = vmatprep.subr.bf16.mxu0 %v8895_v1  ;;  %v8974_v1 = vld [vmem:[%s12899_s2 + $0xf94] ss:$8 sps:$4 sm:$0xff]  }
 0x173   :  { %5235 = vmatpush1.bf16.msra.mxu1 %v8890_v48  ;;  %v8969_v48 = vld [vmem:[%s12899_s2 + $0x690] ss:$8 sps:$4 sm:$0xff]  }
 0x174   :  { %5604 = vmatpush1.bf16.msra.mxu0 %v8893_v38  ;;  %5236 = vmatprep.subr.bf16.mxu1 %v8898_v4  ;;  %v8972_v38 = vld [vmem:[%s12899_s2 + $0xf90] ss:$8 sps:$4 sm:$0xff]   ;;  %v8977_v4 = vld [vmem:[%s12899_s2 + $0x6a4] ss:$8 sps:$4 sm:$0xff]  }
 0x175   :  { %5605 = vmatprep.subr.bf16.mxu0 %v8901_v5  ;;  %v8980_v5 = vld [vmem:[%s12899_s2 + $0xfa4] ss:$8 sps:$4 sm:$0xff]  }
 0x177   :  { %5237 = vmatpush1.bf16.msra.mxu1 %v8896_v36  ;;  %v8975_v36 = vld [vmem:[%s12899_s2 + $0x6a0] ss:$8 sps:$4 sm:$0xff]  }
 0x178   :  { %5606 = vmatpush1.bf16.msra.mxu0 %v8899_v6  ;;  %5238 = vmatprep.subr.bf16.mxu1 %v8904_v7  ;;  %v8978_v6 = vld [vmem:[%s12899_s2 + $0xfa0] ss:$8 sps:$4 sm:$0xff]   ;;  %v8983_v7 = vld [vmem:[%s12899_s2 + $0x6b4] ss:$8 sps:$4 sm:$0xff]  }
 0x179   :  { %5607 = vmatprep.subr.bf16.mxu0 %v8907_v9  ;;  %v8986_v9 = vld [vmem:[%s12899_s2 + $0xfb4] ss:$8 sps:$4 sm:$0xff]  }
 0x17b   :  { %5239 = vmatpush1.bf16.msra.mxu1 %v8902_v29  ;;  %v8989_v29 = vld [vmem:[%s12899_s2 + $0x6c4] ss:$8 sps:$4 sm:$0xff]  }
 0x17c   :  { %5608 = vmatpush1.bf16.msra.mxu0 %v8905_v63  ;;  %5240 = vmatprep.subr.bf16.mxu1 %v8910_v12  ;;  %v8992_v63 = vld [vmem:[%s12899_s2 + $0xfc4] ss:$8 sps:$4 sm:$0xff]   ;;  %v8987_v12 = vld [vmem:[%s12899_s2 + $0x6c0] ss:$8 sps:$4 sm:$0xff]  }
 0x17d   :  { %5609 = vmatprep.subr.bf16.mxu0 %v8913_v16  ;;  %v8990_v16 = vld [vmem:[%s12899_s2 + $0xfc0] ss:$8 sps:$4 sm:$0xff]  }
 0x17f   :  { %5241 = vmatpush1.bf16.msra.mxu1 %v8908_v2  ;;  %v8995_v2 = vld [vmem:[%s12899_s2 + $0x6d4] ss:$8 sps:$4 sm:$0xff]  }
 0x180   :  { %5610 = vmatpush1.bf16.msra.mxu0 %v8911_v18  ;;  %5251 = vmatprep.subr.bf16.mxu1 %v8916_v19  ;;  %v8998_v18 = vld [vmem:[%s12899_s2 + $0xfd4] ss:$8 sps:$4 sm:$0xff]   ;;  %v8993_v19 = vld [vmem:[%s12899_s2 + $0x6d0] ss:$8 sps:$4 sm:$0xff]  }
 0x181   :  { %5620 = vmatprep.subr.bf16.mxu0 %v8920_v20  ;;  %v8996_v20 = vld [vmem:[%s12899_s2 + $0xfd0] ss:$8 sps:$4 sm:$0xff]  }
 0x182   :  { %5243 = vmatmul.mubr.bf16.vlgmr.msra.gmra.mrb[0].mxu1 %v917_v23  ;;  %v9004_v23 = vld [vmem:[%s12899_s2 + $0xfe4] ss:$8 sps:$4 sm:$0xff]  }
 0x183   :  { %5612 = vmatmul.mubr.bf16.vlgmr.msra.gmra.mrb[0].mxu0 %v11086_v24  ;;  %5252 = vmatpush1.bf16.msra.mxu1 %v8914_v25  ;;  %v11266_v25 = vld [vmem:[%s12900_s0 + $0x20] sm:$0xff] }
 0x184   :  { %5621 = vmatpush1.bf16.msra.mxu0 %v8918_v26  ;;  %5253 = vmatprep.subr.bf16.mxu1 %v8923_v8  ;;  %v8999_v26 = vld [vmem:[%s12899_s2 + $0x6e0] ss:$8 sps:$4 sm:$0xff]  }
 0x185   :  { %5622 = vmatprep.subr.bf16.mxu0 %v8926_v41  ;;  %5283 = vmatprep.mubr.bf16.mxu1 %v11101_v27  ;;  %v9002_v8 = vld [vmem:[%s12899_s2 + $0xfe0] ss:$8 sps:$4 sm:$0xff]   ;;  %v9007_v41 = vld [vmem:[%s12899_s2 + $0x6f4] ss:$8 sps:$4 sm:$0xff]  }
 0x186   :  { %5652 = vmatprep.mubr.bf16.mxu0 %v1018_v52  ;;  %v9010_v52 = vld [vmem:[%s12899_s2 + $0xff4] ss:$8 sps:$4 sm:$0xff]  }
 0x187   :  { %5254 = vmatpush1.bf16.msra.mxu1 %v8921_v30  ;;  %v11282_v30 = vrot.slane %v11266_v25, %v9928_v51 }
 0x188   :  { %5623 = vmatpush1.bf16.msra.mxu0 %v8924_v31  ;;  %5255 = vmatprep.subr.bf16.mxu1 %v8929_v32  ;;  %v9005_v31 = vld [vmem:[%s12899_s2 + $0x6f0] ss:$8 sps:$4 sm:$0xff]  }
 0x189   :  { %5624 = vmatprep.subr.bf16.mxu0 %v8932_v13  ;;  %v9008_v32 = vld [vmem:[%s12899_s2 + $0xff0] ss:$8 sps:$4 sm:$0xff]   ;;  %v9014_v13 = vld [vmem:[%s12899_s2 + $0x704] ss:$8 sps:$4 sm:$0xff]  }
 0x18b   :  { %5256 = vmatpush1.bf16.msra.mxu1 %v8927_v33  ;;  %v9017_v33 = vld [vmem:[%s12899_s2 + $0x1004] ss:$8 sps:$4 sm:$0xff]  }
 0x18c   :  { %5625 = vmatpush1.bf16.msra.mxu0 %v8930_v34  ;;  %5257 = vmatprep.subr.bf16.mxu1 %v8935_v35  ;;  %v9012_v34 = vld [vmem:[%s12899_s2 + $0x700] ss:$8 sps:$4 sm:$0xff]  }
 0x18d   :  { %5626 = vmatprep.subr.bf16.mxu0 %v8938_v37  ;;  %v9015_v35 = vld [vmem:[%s12899_s2 + $0x1000] ss:$8 sps:$4 sm:$0xff]   ;;  %v1034_v37 = vcombine.high %v11282_v30, %v11282_v30 }
 0x18f   :  { %5258 = vmatpush1.bf16.msra.mxu1 %v8933_v21  ;;  %v11306_v21 = vrot.slane %v11066_v17, %v9928_v51  ;;  %v11319_v17 = vrot.slane %v1034_v37, %v9928_v51  ;;  %v9101_v37 = vld [vmem:[%s12899_s2 + $0x10e4] ss:$8 sps:$4 sm:$0xff]  }
 0x190   :  { %5627 = vmatpush1.bf16.msra.mxu0 %v8936_v14  ;;  %5259 = vmatprep.subr.bf16.mxu1 %v8941_v40  ;;  %v1016_v14 = vcombine.high %v11086_v24, %v11086_v24  ;;  %v9020_v40 = vld [vmem:[%s12899_s2 + $0x714] ss:$8 sps:$4 sm:$0xff]   ;;  %v9018_v24 = vld [vmem:[%s12899_s2 + $0x710] ss:$8 sps:$4 sm:$0xff]  }
 0x191   :  { %5628 = vmatprep.subr.bf16.mxu0 %v8944_v42  ;;  %v9023_v42 = vld [vmem:[%s12899_s2 + $0x1014] ss:$8 sps:$4 sm:$0xff]  }
 0x193   :  { %5260 = vmatpush1.bf16.msra.mxu1 %v8939_v43  ;;  %v920_v43 = vcombine.high %v11101_v27, %v11101_v27  ;;  %v9026_v27 = vld [vmem:[%s12899_s2 + $0x724] ss:$8 sps:$4 sm:$0xff]  }
 0x194   :  { %5629 = vmatpush1.bf16.msra.mxu0 %v8942_v28  ;;  %5261 = vmatprep.subr.bf16.mxu1 %v8947_v44  ;;  %v9021_v28 = vld [vmem:[%s12899_s2 + $0x1010] ss:$8 sps:$4 sm:$0xff]   ;;  %v9029_v44 = vld [vmem:[%s12899_s2 + $0x1024] ss:$8 sps:$4 sm:$0xff]  }
 0x195   :  { %5630 = vmatprep.subr.bf16.mxu0 %v8950_v46  ;;  %v9024_v46 = vld [vmem:[%s12899_s2 + $0x720] ss:$8 sps:$4 sm:$0xff]  }
 0x197   :  { %5262 = vmatpush1.bf16.msra.mxu1 %v8945_v47  ;;  %v9027_v47 = vld [vmem:[%s12899_s2 + $0x1020] ss:$8 sps:$4 sm:$0xff]  }
 0x198   :  { %5631 = vmatpush1.bf16.msra.mxu0 %v8948_v49  ;;  %5263 = vmatprep.subr.bf16.mxu1 %v8953_v50  ;;  %v9032_v49 = vld [vmem:[%s12899_s2 + $0x734] ss:$8 sps:$4 sm:$0xff]  }
 0x199   :  { %5632 = vmatprep.subr.bf16.mxu0 %v8956_v53  ;;  %v9035_v50 = vld [vmem:[%s12899_s2 + $0x1034] ss:$8 sps:$4 sm:$0xff]   ;;  %v9030_v53 = vld [vmem:[%s12899_s2 + $0x730] ss:$8 sps:$4 sm:$0xff]  }
 0x19b   :  { %5264 = vmatpush1.bf16.msra.mxu1 %v8951_v54  ;;  %v9033_v54 = vld [vmem:[%s12899_s2 + $0x1030] ss:$8 sps:$4 sm:$0xff]  }
 0x19c   :  { %5633 = vmatpush1.bf16.msra.mxu0 %v8954_v55  ;;  %5265 = vmatprep.subr.bf16.mxu1 %v8959_v56  ;;  %v9038_v55 = vld [vmem:[%s12899_s2 + $0x744] ss:$8 sps:$4 sm:$0xff]  }
 0x19d   :  { %5634 = vmatprep.subr.bf16.mxu0 %v8962_v39  ;;  %v9041_v56 = vld [vmem:[%s12899_s2 + $0x1044] ss:$8 sps:$4 sm:$0xff]   ;;  %v9036_v39 = vld [vmem:[%s12899_s2 + $0x740] ss:$8 sps:$4 sm:$0xff]  }
 0x19f   :  { %5266 = vmatpush1.bf16.msra.mxu1 %v8957_v57  ;;  %v9039_v57 = vld [vmem:[%s12899_s2 + $0x1040] ss:$8 sps:$4 sm:$0xff]  }
 0x1a0   :  { %5635 = vmatpush1.bf16.msra.mxu0 %v8960_v58  ;;  %5267 = vmatprep.subr.bf16.mxu1 %v8965_v59  ;;  %v9044_v58 = vld [vmem:[%s12899_s2 + $0x754] ss:$8 sps:$4 sm:$0xff]  }
 0x1a1   :  { %5636 = vmatprep.subr.bf16.mxu0 %v8968_v60  ;;  %v9047_v59 = vld [vmem:[%s12899_s2 + $0x1054] ss:$8 sps:$4 sm:$0xff]   ;;  %v9042_v60 = vld [vmem:[%s12899_s2 + $0x750] ss:$8 sps:$4 sm:$0xff]  }
 0x1a3   :  { %5268 = vmatpush1.bf16.msra.mxu1 %v8963_v61  ;;  %v9045_v61 = vld [vmem:[%s12899_s2 + $0x1050] ss:$8 sps:$4 sm:$0xff]  }
 0x1a4   :  { %5637 = vmatpush1.bf16.msra.mxu0 %v8966_v62  ;;  %5269 = vmatprep.subr.bf16.mxu1 %v8971_v0  ;;  %v9050_v62 = vld [vmem:[%s12899_s2 + $0x764] ss:$8 sps:$4 sm:$0xff]  }
 0x1a5   :  { %5638 = vmatprep.subr.bf16.mxu0 %v8974_v1  ;;  %v9053_v0 = vld [vmem:[%s12899_s2 + $0x1064] ss:$8 sps:$4 sm:$0xff]   ;;  %v9048_v1 = vld [vmem:[%s12899_s2 + $0x760] ss:$8 sps:$4 sm:$0xff]  }
 0x1a7   :  { %5270 = vmatpush1.bf16.msra.mxu1 %v8969_v48  ;;  %v9051_v48 = vld [vmem:[%s12899_s2 + $0x1060] ss:$8 sps:$4 sm:$0xff]  }
 0x1a8   :  { %5639 = vmatpush1.bf16.msra.mxu0 %v8972_v38  ;;  %5271 = vmatprep.subr.bf16.mxu1 %v8977_v4  ;;  %v9056_v38 = vld [vmem:[%s12899_s2 + $0x774] ss:$8 sps:$4 sm:$0xff]  }
 0x1a9   :  { %5640 = vmatprep.subr.bf16.mxu0 %v8980_v5  ;;  %v9059_v4 = vld [vmem:[%s12899_s2 + $0x1074] ss:$8 sps:$4 sm:$0xff]   ;;  %v9054_v5 = vld [vmem:[%s12899_s2 + $0x770] ss:$8 sps:$4 sm:$0xff]  }
 0x1ab   :  { %5272 = vmatpush1.bf16.msra.mxu1 %v8975_v36  ;;  %v9057_v36 = vld [vmem:[%s12899_s2 + $0x1070] ss:$8 sps:$4 sm:$0xff]  }
 0x1ac   :  { %5641 = vmatpush1.bf16.msra.mxu0 %v8978_v6  ;;  %5273 = vmatprep.subr.bf16.mxu1 %v8983_v7  ;;  %v9062_v6 = vld [vmem:[%s12899_s2 + $0x784] ss:$8 sps:$4 sm:$0xff]  }
 0x1ad   :  { %5642 = vmatprep.subr.bf16.mxu0 %v8986_v9  ;;  %v9065_v7 = vld [vmem:[%s12899_s2 + $0x1084] ss:$8 sps:$4 sm:$0xff]   ;;  %v9060_v9 = vld [vmem:[%s12899_s2 + $0x780] ss:$8 sps:$4 sm:$0xff]  }
 0x1af   :  { %5274 = vmatpush1.bf16.msra.mxu1 %v8981_v10  ;;  %v9063_v10 = vld [vmem:[%s12899_s2 + $0x1080] ss:$8 sps:$4 sm:$0xff]  }
 0x1b0   :  { %5643 = vmatpush1.bf16.msra.mxu0 %v8984_v11  ;;  %5275 = vmatprep.subr.bf16.mxu1 %v8989_v29  ;;  %v9068_v11 = vld [vmem:[%s12899_s2 + $0x794] ss:$8 sps:$4 sm:$0xff]  }
 0x1b1   :  { %5644 = vmatprep.subr.bf16.mxu0 %v8992_v63  ;;  %v9071_v29 = vld [vmem:[%s12899_s2 + $0x1094] ss:$8 sps:$4 sm:$0xff]   ;;  %v9066_v63 = vld [vmem:[%s12899_s2 + $0x790] ss:$8 sps:$4 sm:$0xff]  }
 0x1b3   :  { %5276 = vmatpush1.bf16.msra.mxu1 %v8987_v12  ;;  %v9069_v12 = vld [vmem:[%s12899_s2 + $0x1090] ss:$8 sps:$4 sm:$0xff]  }
 0x1b4   :  { %5645 = vmatpush1.bf16.msra.mxu0 %v8990_v16  ;;  %5277 = vmatprep.subr.bf16.mxu1 %v8995_v2  ;;  %v9074_v16 = vld [vmem:[%s12899_s2 + $0x7a4] ss:$8 sps:$4 sm:$0xff]  }
 0x1b5   :  { %5646 = vmatprep.subr.bf16.mxu0 %v8998_v18  ;;  %v9077_v2 = vld [vmem:[%s12899_s2 + $0x10a4] ss:$8 sps:$4 sm:$0xff]   ;;  %v9072_v18 = vld [vmem:[%s12899_s2 + $0x7a0] ss:$8 sps:$4 sm:$0xff]  }
 0x1b7   :  { %5278 = vmatpush1.bf16.msra.mxu1 %v8993_v19  ;;  %v9075_v19 = vld [vmem:[%s12899_s2 + $0x10a0] ss:$8 sps:$4 sm:$0xff]  }
 0x1b8   :  { %5647 = vmatpush1.bf16.msra.mxu0 %v8996_v20  ;;  %5279 = vmatprep.subr.bf16.mxu1 %v9001_v22  ;;  %v9080_v20 = vld [vmem:[%s12899_s2 + $0x7b4] ss:$8 sps:$4 sm:$0xff]  }
 0x1b9   :  { %5648 = vmatprep.subr.bf16.mxu0 %v9004_v23  ;;  %v9083_v22 = vld [vmem:[%s12899_s2 + $0x10b4] ss:$8 sps:$4 sm:$0xff]   ;;  %v9078_v23 = vld [vmem:[%s12899_s2 + $0x7b0] ss:$8 sps:$4 sm:$0xff]  }
 0x1bb   :  { %5280 = vmatpush1.bf16.msra.mxu1 %v8999_v26  ;;  %v9081_v26 = vld [vmem:[%s12899_s2 + $0x10b0] ss:$8 sps:$4 sm:$0xff]  }
 0x1bc   :  { %5649 = vmatpush1.bf16.msra.mxu0 %v9002_v8  ;;  %5281 = vmatprep.subr.bf16.mxu1 %v9007_v41  ;;  %v9086_v8 = vld [vmem:[%s12899_s2 + $0x7c4] ss:$8 sps:$4 sm:$0xff]  }
 0x1bd   :  { %5650 = vmatprep.subr.bf16.mxu0 %v9010_v52  ;;  %v9089_v41 = vld [vmem:[%s12899_s2 + $0x10c4] ss:$8 sps:$4 sm:$0xff]   ;;  %v9084_v52 = vld [vmem:[%s12899_s2 + $0x7c0] ss:$8 sps:$4 sm:$0xff]  }
 0x1bf   :  { %5282 = vmatpush1.bf16.msra.mxu1 %v9005_v31  ;;  %v9087_v31 = vld [vmem:[%s12899_s2 + $0x10c0] ss:$8 sps:$4 sm:$0xff]  }
 0x1c0   :  { %5651 = vmatpush1.bf16.msra.mxu0 %v9008_v32  ;;  %5292 = vmatprep.subr.bf16.mxu1 %v9014_v13  ;;  %v9092_v32 = vld [vmem:[%s12899_s2 + $0x7d4] ss:$8 sps:$4 sm:$0xff]  }
 0x1c1   :  { %5661 = vmatprep.subr.bf16.mxu0 %v9017_v33  ;;  %v9095_v13 = vld [vmem:[%s12899_s2 + $0x10d4] ss:$8 sps:$4 sm:$0xff]   ;;  %v9090_v33 = vld [vmem:[%s12899_s2 + $0x7d0] ss:$8 sps:$4 sm:$0xff]  }
 0x1c2   :  { %5284 = vmatmul.mubr.bf16.vlgmr.msra.gmra.mrb[0].mxu1 %v11306_v21 }
 0x1c3   :  { %5653 = vmatmul.mubr.bf16.vlgmr.msra.gmra.mrb[0].mxu0 %v1016_v14  ;;  %5293 = vmatpush1.bf16.msra.mxu1 %v9012_v34  ;;  %v9093_v34 = vld [vmem:[%s12899_s2 + $0x10d0] ss:$8 sps:$4 sm:$0xff]   ;;  %v9096_v14 = vld [vmem:[%s12899_s2 + $0x7e0] ss:$8 sps:$4 sm:$0xff]  }
 0x1c4   :  { %5662 = vmatpush1.bf16.msra.mxu0 %v9015_v35  ;;  %5294 = vmatprep.subr.bf16.mxu1 %v9020_v40  ;;  %v9098_v35 = vld [vmem:[%s12899_s2 + $0x7e4] ss:$8 sps:$4 sm:$0xff]   ;;  %v9099_v40 = vld [vmem:[%s12899_s2 + $0x10e0] ss:$8 sps:$4 sm:$0xff]  }
 0x1c5   :  { %5663 = vmatprep.subr.bf16.mxu0 %v9023_v42  ;;  %5324 = vmatprep.mubr.bf16.mxu1 %v920_v43  ;;  %v9104_v42 = vld [vmem:[%s12899_s2 + $0x7f4] ss:$8 sps:$4 sm:$0xff]  }
 0x1c6   :  { %5693 = vmatprep.mubr.bf16.mxu0 %v11319_v17  ;;  %v9107_v43 = vld [vmem:[%s12899_s2 + $0x10f4] ss:$8 sps:$4 sm:$0xff]  }
 0x1c7   :  { %5295 = vmatpush1.bf16.msra.mxu1 %v9018_v24  ;;  %v9102_v24 = vld [vmem:[%s12899_s2 + $0x7f0] ss:$8 sps:$4 sm:$0xff]  }
 0x1c8   :  { %5664 = vmatpush1.bf16.msra.mxu0 %v9021_v28  ;;  %5296 = vmatprep.subr.bf16.mxu1 %v9026_v27  ;;  %v9105_v28 = vld [vmem:[%s12899_s2 + $0x10f0] ss:$8 sps:$4 sm:$0xff]   ;;  %v9110_v27 = vld [vmem:[%s12899_s2 + $0x804] ss:$8 sps:$4 sm:$0xff]  }
 0x1c9   :  { %5665 = vmatprep.subr.bf16.mxu0 %v9029_v44  ;;  %v9113_v44 = vld [vmem:[%s12899_s2 + $0x1104] ss:$8 sps:$4 sm:$0xff]  }
 0x1cb   :  { %5297 = vmatpush1.bf16.msra.mxu1 %v9024_v46  ;;  %v918_v46 = vcombine.high %v11306_v21, %v11306_v21  ;;  %v9116_v21 = vld [vmem:[%s12899_s2 + $0x814] ss:$8 sps:$4 sm:$0xff]  }
 0x1cc   :  { %5666 = vmatpush1.bf16.msra.mxu0 %v9027_v47  ;;  %5298 = vmatprep.subr.bf16.mxu1 %v9032_v49  ;;  %v11507_v47 = vrot.slane %v11282_v30, %v9928_v51  ;;  %v9108_v49 = vld [vmem:[%s12899_s2 + $0x800] ss:$8 sps:$4 sm:$0xff]   ;;  %v9119_v30 = vld [vmem:[%s12899_s2 + $0x1114] ss:$8 sps:$4 sm:$0xff]  }
 0x1cd   :  { %5667 = vmatprep.subr.bf16.mxu0 %v9035_v50  ;;  %v9111_v50 = vld [vmem:[%s12899_s2 + $0x1100] ss:$8 sps:$4 sm:$0xff]  }
 0x1cf   :  { %5299 = vmatpush1.bf16.msra.mxu1 %v9030_v53  ;;  %v1066_v53 = vcombine.high %v11319_v17, %v11319_v17  ;;  %v9125_v17 = vld [vmem:[%s12899_s2 + $0x1124] ss:$8 sps:$4 sm:$0xff]  }
 0x1d0   :  { %5668 = vmatpush1.bf16.msra.mxu0 %v9033_v54  ;;  %5300 = vmatprep.subr.bf16.mxu1 %v9038_v55  ;;  %v9114_v54 = vld [vmem:[%s12899_s2 + $0x810] ss:$8 sps:$4 sm:$0xff]  }
 0x1d1   :  { %5669 = vmatprep.subr.bf16.mxu0 %v9041_v56  ;;  %v9117_v55 = vld [vmem:[%s12899_s2 + $0x1110] ss:$8 sps:$4 sm:$0xff]   ;;  %v9122_v56 = vld [vmem:[%s12899_s2 + $0x824] ss:$8 sps:$4 sm:$0xff]  }
 0x1d3   :  { %5301 = vmatpush1.bf16.msra.mxu1 %v9036_v39  ;;  %v9120_v39 = vld [vmem:[%s12899_s2 + $0x820] ss:$8 sps:$4 sm:$0xff]  }
 0x1d4   :  { %5670 = vmatpush1.bf16.msra.mxu0 %v9039_v57  ;;  %5302 = vmatprep.subr.bf16.mxu1 %v9044_v58  ;;  %v9123_v57 = vld [vmem:[%s12899_s2 + $0x1120] ss:$8 sps:$4 sm:$0xff]   ;;  %v9128_v58 = vld [vmem:[%s12899_s2 + $0x834] ss:$8 sps:$4 sm:$0xff]  }
 0x1d5   :  { %5671 = vmatprep.subr.bf16.mxu0 %v9047_v59  ;;  %v9126_v59 = vld [vmem:[%s12899_s2 + $0x830] ss:$8 sps:$4 sm:$0xff]  }
 0x1d7   :  { %5303 = vmatpush1.bf16.msra.mxu1 %v9042_v60  ;;  %v9129_v60 = vld [vmem:[%s12899_s2 + $0x1130] ss:$8 sps:$4 sm:$0xff]  }
 0x1d8   :  { %5672 = vmatpush1.bf16.msra.mxu0 %v9045_v61  ;;  %5304 = vmatprep.subr.bf16.mxu1 %v9050_v62  ;;  %v9134_v61 = vld [vmem:[%s12899_s2 + $0x844] ss:$8 sps:$4 sm:$0xff]  }
 0x1d9   :  { %5673 = vmatprep.subr.bf16.mxu0 %v9053_v0  ;;  %v9137_v62 = vld [vmem:[%s12899_s2 + $0x1144] ss:$8 sps:$4 sm:$0xff]   ;;  %v9132_v0 = vld [vmem:[%s12899_s2 + $0x840] ss:$8 sps:$4 sm:$0xff]  }
 0x1db   :  { %5305 = vmatpush1.bf16.msra.mxu1 %v9048_v1  ;;  %v9135_v1 = vld [vmem:[%s12899_s2 + $0x1140] ss:$8 sps:$4 sm:$0xff]  }
 0x1dc   :  { %5674 = vmatpush1.bf16.msra.mxu0 %v9051_v48  ;;  %5306 = vmatprep.subr.bf16.mxu1 %v9056_v38  ;;  %v9140_v48 = vld [vmem:[%s12899_s2 + $0x854] ss:$8 sps:$4 sm:$0xff]  }
 0x1dd   :  { %5675 = vmatprep.subr.bf16.mxu0 %v9059_v4  ;;  %v9143_v38 = vld [vmem:[%s12899_s2 + $0x1154] ss:$8 sps:$4 sm:$0xff]   ;;  %v9138_v4 = vld [vmem:[%s12899_s2 + $0x850] ss:$8 sps:$4 sm:$0xff]  }
 0x1df   :  { %5307 = vmatpush1.bf16.msra.mxu1 %v9054_v5  ;;  %v9141_v5 = vld [vmem:[%s12899_s2 + $0x1150] ss:$8 sps:$4 sm:$0xff]  }
 0x1e0   :  { %5676 = vmatpush1.bf16.msra.mxu0 %v9057_v36  ;;  %5308 = vmatprep.subr.bf16.mxu1 %v9062_v6  ;;  %v9146_v36 = vld [vmem:[%s12899_s2 + $0x864] ss:$8 sps:$4 sm:$0xff]  }
 0x1e1   :  { %5677 = vmatprep.subr.bf16.mxu0 %v9065_v7  ;;  %v9149_v6 = vld [vmem:[%s12899_s2 + $0x1164] ss:$8 sps:$4 sm:$0xff]   ;;  %v9144_v7 = vld [vmem:[%s12899_s2 + $0x860] ss:$8 sps:$4 sm:$0xff]  }
 0x1e3   :  { %5309 = vmatpush1.bf16.msra.mxu1 %v9060_v9  ;;  %v9147_v9 = vld [vmem:[%s12899_s2 + $0x1160] ss:$8 sps:$4 sm:$0xff]  }
 0x1e4   :  { %5678 = vmatpush1.bf16.msra.mxu0 %v9063_v10  ;;  %5310 = vmatprep.subr.bf16.mxu1 %v9068_v11  ;;  %v9152_v10 = vld [vmem:[%s12899_s2 + $0x874] ss:$8 sps:$4 sm:$0xff]  }
 0x1e5   :  { %5679 = vmatprep.subr.bf16.mxu0 %v9071_v29  ;;  %v9155_v11 = vld [vmem:[%s12899_s2 + $0x1174] ss:$8 sps:$4 sm:$0xff]   ;;  %v9150_v29 = vld [vmem:[%s12899_s2 + $0x870] ss:$8 sps:$4 sm:$0xff]  }
 0x1e7   :  { %5311 = vmatpush1.bf16.msra.mxu1 %v9066_v63  ;;  %v9153_v63 = vld [vmem:[%s12899_s2 + $0x1170] ss:$8 sps:$4 sm:$0xff]  }
 0x1e8   :  { %5680 = vmatpush1.bf16.msra.mxu0 %v9069_v12  ;;  %5312 = vmatprep.subr.bf16.mxu1 %v9074_v16  ;;  %v9158_v12 = vld [vmem:[%s12899_s2 + $0x884] ss:$8 sps:$4 sm:$0xff]  }
 0x1e9   :  { %5681 = vmatprep.subr.bf16.mxu0 %v9077_v2  ;;  %v9161_v16 = vld [vmem:[%s12899_s2 + $0x1184] ss:$8 sps:$4 sm:$0xff]   ;;  %v9156_v2 = vld [vmem:[%s12899_s2 + $0x880] ss:$8 sps:$4 sm:$0xff]  }
 0x1eb   :  { %5313 = vmatpush1.bf16.msra.mxu1 %v9072_v18  ;;  %v9159_v18 = vld [vmem:[%s12899_s2 + $0x1180] ss:$8 sps:$4 sm:$0xff]  }
 0x1ec   :  { %5682 = vmatpush1.bf16.msra.mxu0 %v9075_v19  ;;  %5314 = vmatprep.subr.bf16.mxu1 %v9080_v20  ;;  %v9164_v19 = vld [vmem:[%s12899_s2 + $0x894] ss:$8 sps:$4 sm:$0xff]  }
 0x1ed   :  { %5683 = vmatprep.subr.bf16.mxu0 %v9083_v22  ;;  %v9167_v20 = vld [vmem:[%s12899_s2 + $0x1194] ss:$8 sps:$4 sm:$0xff]   ;;  %v9162_v22 = vld [vmem:[%s12899_s2 + $0x890] ss:$8 sps:$4 sm:$0xff]  }
 0x1ef   :  { %5315 = vmatpush1.bf16.msra.mxu1 %v9078_v23  ;;  %v9165_v23 = vld [vmem:[%s12899_s2 + $0x1190] ss:$8 sps:$4 sm:$0xff]  }
 0x1f0   :  { %5684 = vmatpush1.bf16.msra.mxu0 %v9081_v26  ;;  %5316 = vmatprep.subr.bf16.mxu1 %v9086_v8  ;;  %v9170_v26 = vld [vmem:[%s12899_s2 + $0x8a4] ss:$8 sps:$4 sm:$0xff]  }
 0x1f1   :  { %5685 = vmatprep.subr.bf16.mxu0 %v9089_v41  ;;  %v9173_v8 = vld [vmem:[%s12899_s2 + $0x11a4] ss:$8 sps:$4 sm:$0xff]   ;;  %v9168_v41 = vld [vmem:[%s12899_s2 + $0x8a0] ss:$8 sps:$4 sm:$0xff]  }
 0x1f3   :  { %5317 = vmatpush1.bf16.msra.mxu1 %v9084_v52  ;;  %v9171_v52 = vld [vmem:[%s12899_s2 + $0x11a0] ss:$8 sps:$4 sm:$0xff]  }
 0x1f4   :  { %5686 = vmatpush1.bf16.msra.mxu0 %v9087_v31  ;;  %5318 = vmatprep.subr.bf16.mxu1 %v9092_v32  ;;  %v9176_v31 = vld [vmem:[%s12899_s2 + $0x8b4] ss:$8 sps:$4 sm:$0xff]  }
 0x1f5   :  { %5687 = vmatprep.subr.bf16.mxu0 %v9095_v13  ;;  %v9179_v32 = vld [vmem:[%s12899_s2 + $0x11b4] ss:$8 sps:$4 sm:$0xff]   ;;  %v9174_v13 = vld [vmem:[%s12899_s2 + $0x8b0] ss:$8 sps:$4 sm:$0xff]  }
 0x1f7   :  { %5319 = vmatpush1.bf16.msra.mxu1 %v9090_v33  ;;  %v9177_v33 = vld [vmem:[%s12899_s2 + $0x11b0] ss:$8 sps:$4 sm:$0xff]  }
 0x1f8   :  { %5688 = vmatpush1.bf16.msra.mxu0 %v9093_v34  ;;  %5320 = vmatprep.subr.bf16.mxu1 %v9098_v35  ;;  %v9182_v34 = vld [vmem:[%s12899_s2 + $0x8c4] ss:$8 sps:$4 sm:$0xff]  }
 0x1f9   :  { %5689 = vmatprep.subr.bf16.mxu0 %v9101_v37  ;;  %v9185_v35 = vld [vmem:[%s12899_s2 + $0x11c4] ss:$8 sps:$4 sm:$0xff]   ;;  %v9180_v37 = vld [vmem:[%s12899_s2 + $0x8c0] ss:$8 sps:$4 sm:$0xff]  }
 0x1fb   :  { %5321 = vmatpush1.bf16.msra.mxu1 %v9096_v14  ;;  %v9183_v14 = vld [vmem:[%s12899_s2 + $0x11c0] ss:$8 sps:$4 sm:$0xff]  }
 0x1fc   :  { %5690 = vmatpush1.bf16.msra.mxu0 %v9099_v40  ;;  %5322 = vmatprep.subr.bf16.mxu1 %v9104_v42  ;;  %v9188_v40 = vld [vmem:[%s12899_s2 + $0x8d4] ss:$8 sps:$4 sm:$0xff]  }
 0x1fd   :  { %5691 = vmatprep.subr.bf16.mxu0 %v9107_v43  ;;  %v9191_v42 = vld [vmem:[%s12899_s2 + $0x11d4] ss:$8 sps:$4 sm:$0xff]   ;;  %v9186_v43 = vld [vmem:[%s12899_s2 + $0x8d0] ss:$8 sps:$4 sm:$0xff]  }
 0x1ff   :  { %5323 = vmatpush1.bf16.msra.mxu1 %v9102_v24  ;;  %v9189_v24 = vld [vmem:[%s12899_s2 + $0x11d0] ss:$8 sps:$4 sm:$0xff]  }
 0x200   :  { %5692 = vmatpush1.bf16.msra.mxu0 %v9105_v28  ;;  %5333 = vmatprep.subr.bf16.mxu1 %v9110_v27  ;;  %v9194_v28 = vld [vmem:[%s12899_s2 + $0x8e4] ss:$8 sps:$4 sm:$0xff]  }
 0x201   :  { %5702 = vmatprep.subr.bf16.mxu0 %v9113_v44  ;;  %v9197_v27 = vld [vmem:[%s12899_s2 + $0x11e4] ss:$8 sps:$4 sm:$0xff]   ;;  %v1019_v44 = vcombine.high %v11266_v25, %v11266_v25  ;;  %v9200_v25 = vld [vmem:[%s12899_s2 + $0x8f4] ss:$8 sps:$4 sm:$0xff]  }
 0x202   :  { %5325 = vmatmul.mubr.bf16.vlgmr.msra.gmra.mrb[0].mxu1 %v918_v46  ;;  %v11686_v46 = vld [vmem:[%s12902_s1] sm:$0xff] }
 0x203   :  { %5694 = vmatmul.mubr.bf16.vlgmr.msra.gmra.mrb[0].mxu0 %v11507_v47  ;;  %5334 = vmatpush1.bf16.msra.mxu1 %v9108_v49  ;;  %v9192_v49 = vld [vmem:[%s12899_s2 + $0x8e0] ss:$8 sps:$4 sm:$0xff]  }
 0x204   :  { %5703 = vmatpush1.bf16.msra.mxu0 %v9111_v50  ;;  %5335 = vmatprep.subr.bf16.mxu1 %v9116_v21  ;;  %v9195_v50 = vld [vmem:[%s12899_s2 + $0x11e0] ss:$8 sps:$4 sm:$0xff]   ;;  %v9203_v21 = vld [vmem:[%s12899_s2 + $0x11f4] ss:$8 sps:$4 sm:$0xff]  }
 0x205   :  { %5704 = vmatprep.subr.bf16.mxu0 %v9119_v30  ;;  %5365 = vmatprep.mubr.bf16.mxu1 %v9969_v3  ;;  %v9131_v3 = vld [vmem:[%s12899_s2 + $0x1134] ss:$8 sps:$4 sm:$0xff]   ;;  %v11701_v30 = vrot.slane %v1019_v44, %v9928_v51  ;;  %v9273_v44 = vld [vmem:[%s12901_s4 + $0xb0] ss:$8 sps:$4 sm:$0xff]  }
 0x206   :  { %5734 = vmatprep.mubr.bf16.mxu0 %v1066_v53  ;;  %v11705_v53 = vrot.slane %v11686_v46, %v9928_v51 }
 0x207   :  { %5336 = vmatpush1.bf16.msra.mxu1 %v9114_v54  ;;  %v9198_v54 = vld [vmem:[%s12899_s2 + $0x8f0] ss:$8 sps:$4 sm:$0xff]  }
 0x208   :  { %5705 = vmatpush1.bf16.msra.mxu0 %v9117_v55  ;;  %5337 = vmatprep.subr.bf16.mxu1 %v9122_v56  ;;  %v9201_v55 = vld [vmem:[%s12899_s2 + $0x11f0] ss:$8 sps:$4 sm:$0xff]   ;;  %v9206_v56 = vld [vmem:[%s12899_s2 + $0x1204] ss:$8 sps:$4 sm:$0xff]  }
 0x209   :  { %5706 = vmatprep.subr.bf16.mxu0 %v9125_v17  ;;  %v9209_v17 = vld [vmem:[%s12901_s4 + $0x4] ss:$8 sps:$4 sm:$0xff]  }
 0x20b   :  { %5338 = vmatpush1.bf16.msra.mxu1 %v9120_v39  ;;  %v1035_v39 = vcombine.high %v11701_v30, %v11701_v30 }
 0x20c   :  { %5707 = vmatpush1.bf16.msra.mxu0 %v9123_v57  ;;  %5339 = vmatprep.subr.bf16.mxu1 %v9128_v58  ;;  %v6180_v57 = vcombine.high %v11705_v53, %v11705_v53  ;;  %v1064_v58 = vcombine.high %v11507_v47, %v11507_v47  ;;  %v9215_v47 = vld [vmem:[%s12901_s4 + $0x14] ss:$8 sps:$4 sm:$0xff]  }
 0x20d   :  { %5708 = vmatprep.subr.bf16.mxu0 %v9131_v3  ;;  %v9204_v3 = vld [vmem:[%s12899_s2 + $0x1200] ss:$8 sps:$4 sm:$0xff]  }
 0x20f   :  { %5340 = vmatpush1.bf16.msra.mxu1 %v9126_v59  ;;  %v9207_v59 = vld [vmem:[%s12901_s4] ss:$8 sps:$4 sm:$0xff]  }
 0x210   :  { %5709 = vmatpush1.bf16.msra.mxu0 %v9129_v60  ;;  %5341 = vmatprep.subr.bf16.mxu1 %v9134_v61  ;;  %v9212_v60 = vld [vmem:[%s12899_s2 + $0x1214] ss:$8 sps:$4 sm:$0xff]   ;;  %v11738_v61 = vrot.slane %v1035_v39, %v9928_v51  ;;  %v9290_v39 = vld [vmem:[%s12899_s2 + $0x12e4] ss:$8 sps:$4 sm:$0xff]  }
 0x211   :  { %5710 = vmatprep.subr.bf16.mxu0 %v9137_v62  ;;  %v11741_v62 = vrot.slane %v6180_v57, %v9928_v51  ;;  %v9293_v57 = vld [vmem:[%s12901_s4 + $0xe4] ss:$8 sps:$4 sm:$0xff]  }
 0x213   :  { %5342 = vmatpush1.bf16.msra.mxu1 %v9132_v0  ;;  %v9210_v0 = vld [vmem:[%s12899_s2 + $0x1210] ss:$8 sps:$4 sm:$0xff]  }
 0x214   :  { %5711 = vmatpush1.bf16.msra.mxu0 %v9135_v1  ;;  %5343 = vmatprep.subr.bf16.mxu1 %v9140_v48  ;;  %v9213_v1 = vld [vmem:[%s12901_s4 + $0x10] ss:$8 sps:$4 sm:$0xff]   ;;  %v9218_v48 = vld [vmem:[%s12899_s2 + $0x1224] ss:$8 sps:$4 sm:$0xff]  }
 0x215   :  { %5712 = vmatprep.subr.bf16.mxu0 %v9143_v38  ;;  %v9216_v38 = vld [vmem:[%s12899_s2 + $0x1220] ss:$8 sps:$4 sm:$0xff]  }
 0x217   :  { %5344 = vmatpush1.bf16.msra.mxu1 %v9138_v4  ;;  %v9219_v4 = vld [vmem:[%s12901_s4 + $0x20] ss:$8 sps:$4 sm:$0xff]  }
 0x218   :  { %5713 = vmatpush1.bf16.msra.mxu0 %v9141_v5  ;;  %5345 = vmatprep.subr.bf16.mxu1 %v9146_v36  ;;  %v9224_v5 = vld [vmem:[%s12899_s2 + $0x1234] ss:$8 sps:$4 sm:$0xff]  }
 0x219   :  { %5714 = vmatprep.subr.bf16.mxu0 %v9149_v6  ;;  %v9227_v36 = vld [vmem:[%s12901_s4 + $0x34] ss:$8 sps:$4 sm:$0xff]   ;;  %v9222_v6 = vld [vmem:[%s12899_s2 + $0x1230] ss:$8 sps:$4 sm:$0xff]  }
 0x21b   :  { %5346 = vmatpush1.bf16.msra.mxu1 %v9144_v7  ;;  %v9225_v7 = vld [vmem:[%s12901_s4 + $0x30] ss:$8 sps:$4 sm:$0xff]  }
 0x21c   :  { %5715 = vmatpush1.bf16.msra.mxu0 %v9147_v9  ;;  %5347 = vmatprep.subr.bf16.mxu1 %v9152_v10  ;;  %v9230_v9 = vld [vmem:[%s12899_s2 + $0x1244] ss:$8 sps:$4 sm:$0xff]  }
 0x21d   :  { %5716 = vmatprep.subr.bf16.mxu0 %v9155_v11  ;;  %v9233_v10 = vld [vmem:[%s12901_s4 + $0x44] ss:$8 sps:$4 sm:$0xff]   ;;  %v9228_v11 = vld [vmem:[%s12899_s2 + $0x1240] ss:$8 sps:$4 sm:$0xff]  }
 0x21f   :  { %5348 = vmatpush1.bf16.msra.mxu1 %v9150_v29  ;;  %v9231_v29 = vld [vmem:[%s12901_s4 + $0x40] ss:$8 sps:$4 sm:$0xff]  }
 0x220   :  { %5717 = vmatpush1.bf16.msra.mxu0 %v9153_v63  ;;  %5349 = vmatprep.subr.bf16.mxu1 %v9158_v12  ;;  %v9236_v63 = vld [vmem:[%s12899_s2 + $0x1254] ss:$8 sps:$4 sm:$0xff]  }
 0x221   :  { %5718 = vmatprep.subr.bf16.mxu0 %v9161_v16  ;;  %v9239_v12 = vld [vmem:[%s12901_s4 + $0x54] ss:$8 sps:$4 sm:$0xff]   ;;  %v9234_v16 = vld [vmem:[%s12899_s2 + $0x1250] ss:$8 sps:$4 sm:$0xff]  }
 0x223   :  { %5350 = vmatpush1.bf16.msra.mxu1 %v9156_v2  ;;  %v9237_v2 = vld [vmem:[%s12901_s4 + $0x50] ss:$8 sps:$4 sm:$0xff]  }
 0x224   :  { %5719 = vmatpush1.bf16.msra.mxu0 %v9159_v18  ;;  %5351 = vmatprep.subr.bf16.mxu1 %v9164_v19  ;;  %v9242_v18 = vld [vmem:[%s12899_s2 + $0x1264] ss:$8 sps:$4 sm:$0xff]  }
 0x225   :  { %5720 = vmatprep.subr.bf16.mxu0 %v9167_v20  ;;  %v9245_v19 = vld [vmem:[%s12901_s4 + $0x64] ss:$8 sps:$4 sm:$0xff]   ;;  %v9240_v20 = vld [vmem:[%s12899_s2 + $0x1260] ss:$8 sps:$4 sm:$0xff]  }
 0x227   :  { %5352 = vmatpush1.bf16.msra.mxu1 %v9162_v22  ;;  %v9243_v22 = vld [vmem:[%s12901_s4 + $0x60] ss:$8 sps:$4 sm:$0xff]  }
 0x228   :  { %5721 = vmatpush1.bf16.msra.mxu0 %v9165_v23  ;;  %5353 = vmatprep.subr.bf16.mxu1 %v9170_v26  ;;  %v9248_v23 = vld [vmem:[%s12899_s2 + $0x1274] ss:$8 sps:$4 sm:$0xff]  }
 0x229   :  { %5722 = vmatprep.subr.bf16.mxu0 %v9173_v8  ;;  %v9251_v26 = vld [vmem:[%s12901_s4 + $0x74] ss:$8 sps:$4 sm:$0xff]   ;;  %v9246_v8 = vld [vmem:[%s12899_s2 + $0x1270] ss:$8 sps:$4 sm:$0xff]  }
 0x22b   :  { %5354 = vmatpush1.bf16.msra.mxu1 %v9168_v41  ;;  %v9249_v41 = vld [vmem:[%s12901_s4 + $0x70] ss:$8 sps:$4 sm:$0xff]  }
 0x22c   :  { %5723 = vmatpush1.bf16.msra.mxu0 %v9171_v52  ;;  %5355 = vmatprep.subr.bf16.mxu1 %v9176_v31  ;;  %v9254_v52 = vld [vmem:[%s12899_s2 + $0x1284] ss:$8 sps:$4 sm:$0xff]  }
 0x22d   :  { %5724 = vmatprep.subr.bf16.mxu0 %v9179_v32  ;;  %v9257_v31 = vld [vmem:[%s12901_s4 + $0x84] ss:$8 sps:$4 sm:$0xff]   ;;  %v9252_v32 = vld [vmem:[%s12899_s2 + $0x1280] ss:$8 sps:$4 sm:$0xff]  }
 0x22f   :  { %5356 = vmatpush1.bf16.msra.mxu1 %v9174_v13  ;;  %v9255_v13 = vld [vmem:[%s12901_s4 + $0x80] ss:$8 sps:$4 sm:$0xff]  }
 0x230   :  { %5725 = vmatpush1.bf16.msra.mxu0 %v9177_v33  ;;  %5357 = vmatprep.subr.bf16.mxu1 %v9182_v34  ;;  %v9260_v33 = vld [vmem:[%s12899_s2 + $0x1294] ss:$8 sps:$4 sm:$0xff]  }
 0x231   :  { %5726 = vmatprep.subr.bf16.mxu0 %v9185_v35  ;;  %v9263_v34 = vld [vmem:[%s12901_s4 + $0x94] ss:$8 sps:$4 sm:$0xff]   ;;  %v9258_v35 = vld [vmem:[%s12899_s2 + $0x1290] ss:$8 sps:$4 sm:$0xff]  }
 0x233   :  { %5358 = vmatpush1.bf16.msra.mxu1 %v9180_v37  ;;  %v9261_v37 = vld [vmem:[%s12901_s4 + $0x90] ss:$8 sps:$4 sm:$0xff]  }
 0x234   :  { %5727 = vmatpush1.bf16.msra.mxu0 %v9183_v14  ;;  %5359 = vmatprep.subr.bf16.mxu1 %v9188_v40  ;;  %v9266_v14 = vld [vmem:[%s12899_s2 + $0x12a4] ss:$8 sps:$4 sm:$0xff]  }
 0x235   :  { %5728 = vmatprep.subr.bf16.mxu0 %v9191_v42  ;;  %v9269_v40 = vld [vmem:[%s12901_s4 + $0xa4] ss:$8 sps:$4 sm:$0xff]   ;;  %v9264_v42 = vld [vmem:[%s12899_s2 + $0x12a0] ss:$8 sps:$4 sm:$0xff]  }
 0x237   :  { %5360 = vmatpush1.bf16.msra.mxu1 %v9186_v43  ;;  %v9267_v43 = vld [vmem:[%s12901_s4 + $0xa0] ss:$8 sps:$4 sm:$0xff]  }
 0x238   :  { %5729 = vmatpush1.bf16.msra.mxu0 %v9189_v24  ;;  %5361 = vmatprep.subr.bf16.mxu1 %v9194_v28  ;;  %v9272_v24 = vld [vmem:[%s12899_s2 + $0x12b4] ss:$8 sps:$4 sm:$0xff]  }
 0x239   :  { %5730 = vmatprep.subr.bf16.mxu0 %v9197_v27  ;;  %v9275_v28 = vld [vmem:[%s12901_s4 + $0xb4] ss:$8 sps:$4 sm:$0xff]   ;;  %v9270_v27 = vld [vmem:[%s12899_s2 + $0x12b0] ss:$8 sps:$4 sm:$0xff]  }
 0x23b   :  { %5362 = vmatpush1.bf16.msra.mxu1 %v9192_v49  ;;  %v9278_v49 = vld [vmem:[%s12899_s2 + $0x12c4] ss:$8 sps:$4 sm:$0xff]  }
 0x23c   :  { %5731 = vmatpush1.bf16.msra.mxu0 %v9195_v50  ;;  %5363 = vmatprep.subr.bf16.mxu1 %v9200_v25  ;;  %v9281_v50 = vld [vmem:[%s12901_s4 + $0xc4] ss:$8 sps:$4 sm:$0xff]   ;;  %v9276_v25 = vld [vmem:[%s12899_s2 + $0x12c0] ss:$8 sps:$4 sm:$0xff]  }
 0x23d   :  { %5732 = vmatprep.subr.bf16.mxu0 %v9203_v21  ;;  %v9279_v21 = vld [vmem:[%s12901_s4 + $0xc0] ss:$8 sps:$4 sm:$0xff]  }
 0x23f   :  { %5364 = vmatpush1.bf16.msra.mxu1 %v9198_v54  ;;  %v9284_v54 = vld [vmem:[%s12899_s2 + $0x12d4] ss:$8 sps:$4 sm:$0xff]  }
 0x240   :  { %5733 = vmatpush1.bf16.msra.mxu0 %v9201_v55  ;;  %7046 = vmatprep.subr.bf16.mxu1 %v9209_v17  ;;  %v9287_v55 = vld [vmem:[%s12901_s4 + $0xd4] ss:$8 sps:$4 sm:$0xff]   ;;  %v9285_v17 = vld [vmem:[%s12901_s4 + $0xd0] ss:$8 sps:$4 sm:$0xff]  }
 0x241   :  { %5743 = vmatprep.subr.bf16.mxu0 %v9206_v56  ;;  %v9282_v56 = vld [vmem:[%s12899_s2 + $0x12d0] ss:$8 sps:$4 sm:$0xff]  }
 0x242   :  { %5366 = vmatmul.mubr.bf16.vlgmr.msra.gmra.mrb[0].mxu1 %v10002_v15  ;;  %v9221_v15 = vld [vmem:[%s12901_s4 + $0x24] ss:$8 sps:$4 sm:$0xff]  }
 0x243   :  { %5735 = vmatmul.mubr.bf16.vlgmr.msra.gmra.mrb[0].mxu0 %v1064_v58  ;;  %7047 = vmatpush1.bf16.msra.mxu1 %v9207_v59  ;;  %v9288_v58 = vld [vmem:[%s12899_s2 + $0x12e0] ss:$8 sps:$4 sm:$0xff]   ;;  %v9296_v59 = vld [vmem:[%s12899_s2 + $0x12f4] ss:$8 sps:$4 sm:$0xff]  }
 0x244   :  { %5744 = vmatpush1.bf16.msra.mxu0 %v9204_v3  ;;  %7048 = vmatprep.subr.bf16.mxu1 %v9215_v47  ;;  %v9291_v3 = vld [vmem:[%s12901_s4 + $0xe0] ss:$8 sps:$4 sm:$0xff]   ;;  %v9294_v47 = vld [vmem:[%s12899_s2 + $0x12f0] ss:$8 sps:$4 sm:$0xff]  }
 0x245   :  { %5745 = vmatprep.subr.bf16.mxu0 %v9212_v60  ;;  %5775 = vmatprep.mubr.bf16.mxu0 %v11738_v61  ;;  %v9299_v60 = vld [vmem:[%s12901_s4 + $0xf4] ss:$8 sps:$4 sm:$0xff]  }
 0x246   :  { %7078 = vmatprep.mubr.bf16.mxu1 %v11741_v62 }
 0x247   :  { %7049 = vmatpush1.bf16.msra.mxu1 %v9213_v1  ;;  %v9303_v1 = vld [vmem:[%s12899_s2 + $0x1304] ss:$8 sps:$4 sm:$0xff]  }
 0x248   :  { %5746 = vmatpush1.bf16.msra.mxu0 %v9210_v0  ;;  %7050 = vmatprep.subr.bf16.mxu1 %v9221_v15  ;;  %v9297_v0 = vld [vmem:[%s12901_s4 + $0xf0] ss:$8 sps:$4 sm:$0xff]   ;;  %v11928_v15 = vrot.slane %v11701_v30, %v9928_v51  ;;  %v9309_v30 = vld [vmem:[%s12899_s2 + $0x1314] ss:$8 sps:$4 sm:$0xff]  }
 0x249   :  { %5747 = vmatprep.subr.bf16.mxu0 %v9218_v48  ;;  %v9306_v48 = vld [vmem:[%s12901_s4 + $0x104] ss:$8 sps:$4 sm:$0xff]  }
 0x24b   :  { %7051 = vmatpush1.bf16.msra.mxu1 %v9219_v4  ;;  %v9301_v4 = vld [vmem:[%s12899_s2 + $0x1300] ss:$8 sps:$4 sm:$0xff]  }
 0x24c   :  { %5748 = vmatpush1.bf16.msra.mxu0 %v9216_v38  ;;  %7052 = vmatprep.subr.bf16.mxu1 %v9227_v36  ;;  %v11932_v38 = vrot.slane %v11705_v53, %v9928_v51  ;;  %v9312_v53 = vld [vmem:[%s12901_s4 + $0x114] ss:$8 sps:$4 sm:$0xff]   ;;  %v1067_v36 = vcombine.high %v11738_v61, %v11738_v61  ;;  %v9315_v61 = vld [vmem:[%s12899_s2 + $0x1324] ss:$8 sps:$4 sm:$0xff]  }
 0x24d   :  { %5749 = vmatprep.subr.bf16.mxu0 %v9224_v5  ;;  %v9304_v5 = vld [vmem:[%s12901_s4 + $0x100] ss:$8 sps:$4 sm:$0xff]  }
 0x24f   :  { %7053 = vmatpush1.bf16.msra.mxu1 %v9225_v7  ;;  %v9307_v7 = vld [vmem:[%s12899_s2 + $0x1310] ss:$8 sps:$4 sm:$0xff]  }
 0x250   :  { %5750 = vmatpush1.bf16.msra.mxu0 %v9222_v6  ;;  %7054 = vmatprep.subr.bf16.mxu1 %v9233_v10  ;;  %v6212_v6 = vcombine.high %v11741_v62, %v11741_v62  ;;  %v9318_v62 = vld [vmem:[%s12901_s4 + $0x124] ss:$8 sps:$4 sm:$0xff]   ;;  %v9313_v10 = vld [vmem:[%s12899_s2 + $0x1320] ss:$8 sps:$4 sm:$0xff]  }
 0x251   :  { %5751 = vmatprep.subr.bf16.mxu0 %v9230_v9  ;;  %v9310_v9 = vld [vmem:[%s12901_s4 + $0x110] ss:$8 sps:$4 sm:$0xff]  }
 0x253   :  { %7055 = vmatpush1.bf16.msra.mxu1 %v9231_v29  ;;  %v9321_v29 = vld [vmem:[%s12899_s2 + $0x1334] ss:$8 sps:$4 sm:$0xff]  }
 0x254   :  { %5752 = vmatpush1.bf16.msra.mxu0 %v9228_v11  ;;  %7056 = vmatprep.subr.bf16.mxu1 %v9239_v12  ;;  %v9316_v11 = vld [vmem:[%s12901_s4 + $0x120] ss:$8 sps:$4 sm:$0xff]   ;;  %v9319_v12 = vld [vmem:[%s12899_s2 + $0x1330] ss:$8 sps:$4 sm:$0xff]  }
 0x255   :  { %5753 = vmatprep.subr.bf16.mxu0 %v9236_v63  ;;  %v9324_v63 = vld [vmem:[%s12901_s4 + $0x134] ss:$8 sps:$4 sm:$0xff]  }
 0x257   :  { %7057 = vmatpush1.bf16.msra.mxu1 %v9237_v2  ;;  %v9327_v2 = vld [vmem:[%s12899_s2 + $0x1344] ss:$8 sps:$4 sm:$0xff]  }
 0x258   :  { %5754 = vmatpush1.bf16.msra.mxu0 %v9234_v16  ;;  %7058 = vmatprep.subr.bf16.mxu1 %v9245_v19  ;;  %v9322_v16 = vld [vmem:[%s12901_s4 + $0x130] ss:$8 sps:$4 sm:$0xff]   ;;  %v9325_v19 = vld [vmem:[%s12899_s2 + $0x1340] ss:$8 sps:$4 sm:$0xff]  }
 0x259   :  { %5755 = vmatprep.subr.bf16.mxu0 %v9242_v18  ;;  %v9330_v18 = vld [vmem:[%s12901_s4 + $0x144] ss:$8 sps:$4 sm:$0xff]  }
 0x25b   :  { %7059 = vmatpush1.bf16.msra.mxu1 %v9243_v22  ;;  %v9333_v22 = vld [vmem:[%s12899_s2 + $0x1354] ss:$8 sps:$4 sm:$0xff]  }
 0x25c   :  { %5756 = vmatpush1.bf16.msra.mxu0 %v9240_v20  ;;  %7060 = vmatprep.subr.bf16.mxu1 %v9251_v26  ;;  %v9328_v20 = vld [vmem:[%s12901_s4 + $0x140] ss:$8 sps:$4 sm:$0xff]   ;;  %v9331_v26 = vld [vmem:[%s12899_s2 + $0x1350] ss:$8 sps:$4 sm:$0xff]  }
 0x25d   :  { %5757 = vmatprep.subr.bf16.mxu0 %v9248_v23  ;;  %v9336_v23 = vld [vmem:[%s12901_s4 + $0x154] ss:$8 sps:$4 sm:$0xff]  }
 0x25f   :  { %7061 = vmatpush1.bf16.msra.mxu1 %v9249_v41  ;;  %v9339_v41 = vld [vmem:[%s12899_s2 + $0x1364] ss:$8 sps:$4 sm:$0xff]  }
 0x260   :  { %5758 = vmatpush1.bf16.msra.mxu0 %v9246_v8  ;;  %7062 = vmatprep.subr.bf16.mxu1 %v9257_v31  ;;  %v9334_v8 = vld [vmem:[%s12901_s4 + $0x150] ss:$8 sps:$4 sm:$0xff]   ;;  %v9337_v31 = vld [vmem:[%s12899_s2 + $0x1360] ss:$8 sps:$4 sm:$0xff]  }
 0x261   :  { %5759 = vmatprep.subr.bf16.mxu0 %v9254_v52  ;;  %v9342_v52 = vld [vmem:[%s12901_s4 + $0x164] ss:$8 sps:$4 sm:$0xff]  }
 0x263   :  { %7063 = vmatpush1.bf16.msra.mxu1 %v9255_v13  ;;  %v9345_v13 = vld [vmem:[%s12899_s2 + $0x1374] ss:$8 sps:$4 sm:$0xff]  }
 0x264   :  { %5760 = vmatpush1.bf16.msra.mxu0 %v9252_v32  ;;  %7064 = vmatprep.subr.bf16.mxu1 %v9263_v34  ;;  %v9340_v32 = vld [vmem:[%s12901_s4 + $0x160] ss:$8 sps:$4 sm:$0xff]   ;;  %v9343_v34 = vld [vmem:[%s12899_s2 + $0x1370] ss:$8 sps:$4 sm:$0xff]  }
 0x265   :  { %5761 = vmatprep.subr.bf16.mxu0 %v9260_v33  ;;  %v9348_v33 = vld [vmem:[%s12901_s4 + $0x174] ss:$8 sps:$4 sm:$0xff]  }
 0x267   :  { %7065 = vmatpush1.bf16.msra.mxu1 %v9261_v37  ;;  %v9351_v37 = vld [vmem:[%s12899_s2 + $0x1384] ss:$8 sps:$4 sm:$0xff]  }
 0x268   :  { %5762 = vmatpush1.bf16.msra.mxu0 %v9258_v35  ;;  %7066 = vmatprep.subr.bf16.mxu1 %v9269_v40  ;;  %v9346_v35 = vld [vmem:[%s12901_s4 + $0x170] ss:$8 sps:$4 sm:$0xff]   ;;  %v9349_v40 = vld [vmem:[%s12899_s2 + $0x1380] ss:$8 sps:$4 sm:$0xff]  }
 0x269   :  { %5763 = vmatprep.subr.bf16.mxu0 %v9266_v14  ;;  %v9354_v14 = vld [vmem:[%s12901_s4 + $0x184] ss:$8 sps:$4 sm:$0xff]  }
 0x26b   :  { %7067 = vmatpush1.bf16.msra.mxu1 %v9267_v43  ;;  %v9357_v43 = vld [vmem:[%s12899_s2 + $0x1394] ss:$8 sps:$4 sm:$0xff]  }
 0x26c   :  { %5764 = vmatpush1.bf16.msra.mxu0 %v9264_v42  ;;  %7068 = vmatprep.subr.bf16.mxu1 %v9275_v28  ;;  %v9352_v42 = vld [vmem:[%s12901_s4 + $0x180] ss:$8 sps:$4 sm:$0xff]   ;;  %v9355_v28 = vld [vmem:[%s12899_s2 + $0x1390] ss:$8 sps:$4 sm:$0xff]  }
 0x26d   :  { %5765 = vmatprep.subr.bf16.mxu0 %v9272_v24  ;;  %v9360_v24 = vld [vmem:[%s12901_s4 + $0x194] ss:$8 sps:$4 sm:$0xff]  }
 0x26f   :  { %7069 = vmatpush1.bf16.msra.mxu1 %v9273_v44  ;;  %v9363_v44 = vld [vmem:[%s12899_s2 + $0x13a4] ss:$8 sps:$4 sm:$0xff]  }
 0x270   :  { %5766 = vmatpush1.bf16.msra.mxu0 %v9270_v27  ;;  %7070 = vmatprep.subr.bf16.mxu1 %v9281_v50  ;;  %v9358_v27 = vld [vmem:[%s12901_s4 + $0x190] ss:$8 sps:$4 sm:$0xff]   ;;  %v9361_v50 = vld [vmem:[%s12899_s2 + $0x13a0] ss:$8 sps:$4 sm:$0xff]  }
 0x271   :  { %5767 = vmatprep.subr.bf16.mxu0 %v9278_v49  ;;  %v9366_v49 = vld [vmem:[%s12901_s4 + $0x1a4] ss:$8 sps:$4 sm:$0xff]  }
 0x273   :  { %7071 = vmatpush1.bf16.msra.mxu1 %v9279_v21  ;;  %v9369_v21 = vld [vmem:[%s12899_s2 + $0x13b4] ss:$8 sps:$4 sm:$0xff]  }
 0x274   :  { %5768 = vmatpush1.bf16.msra.mxu0 %v9276_v25  ;;  %7072 = vmatprep.subr.bf16.mxu1 %v9287_v55  ;;  %v9364_v25 = vld [vmem:[%s12901_s4 + $0x1a0] ss:$8 sps:$4 sm:$0xff]   ;;  %v9367_v55 = vld [vmem:[%s12899_s2 + $0x13b0] ss:$8 sps:$4 sm:$0xff]  }
 0x275   :  { %5769 = vmatprep.subr.bf16.mxu0 %v9284_v54  ;;  %v9372_v54 = vld [vmem:[%s12901_s4 + $0x1b4] ss:$8 sps:$4 sm:$0xff]  }
 0x277   :  { %7073 = vmatpush1.bf16.msra.mxu1 %v9285_v17  ;;  %v9375_v17 = vld [vmem:[%s12899_s2 + $0x13c4] ss:$8 sps:$4 sm:$0xff]  }
 0x278   :  { %5770 = vmatpush1.bf16.msra.mxu0 %v9282_v56  ;;  %7074 = vmatprep.subr.bf16.mxu1 %v9293_v57  ;;  %v9370_v56 = vld [vmem:[%s12901_s4 + $0x1b0] ss:$8 sps:$4 sm:$0xff]   ;;  %v9373_v57 = vld [vmem:[%s12899_s2 + $0x13c0] ss:$8 sps:$4 sm:$0xff]  }
 0x279   :  { %5771 = vmatprep.subr.bf16.mxu0 %v9290_v39  ;;  %v9378_v39 = vld [vmem:[%s12901_s4 + $0x1c4] ss:$8 sps:$4 sm:$0xff]  }
 0x27b   :  { %7075 = vmatpush1.bf16.msra.mxu1 %v9291_v3  ;;  %v9381_v3 = vld [vmem:[%s12899_s2 + $0x13d4] ss:$8 sps:$4 sm:$0xff]  }
 0x27c   :  { %5772 = vmatpush1.bf16.msra.mxu0 %v9288_v58  ;;  %7076 = vmatprep.subr.bf16.mxu1 %v9299_v60  ;;  %v9376_v58 = vld [vmem:[%s12901_s4 + $0x1c0] ss:$8 sps:$4 sm:$0xff]   ;;  %v9379_v60 = vld [vmem:[%s12899_s2 + $0x13d0] ss:$8 sps:$4 sm:$0xff]  }
 0x27d   :  { %5773 = vmatprep.subr.bf16.mxu0 %v9296_v59  ;;  %v9384_v59 = vld [vmem:[%s12901_s4 + $0x1d4] ss:$8 sps:$4 sm:$0xff]  }
 0x27f   :  { %7077 = vmatpush1.bf16.msra.mxu1 %v9297_v0  ;;  %v9387_v0 = vld [vmem:[%s12899_s2 + $0x13e4] ss:$8 sps:$4 sm:$0xff]  }
 0x280   :  { %5774 = vmatpush1.bf16.msra.mxu0 %v9294_v47  ;;  %7087 = vmatprep.subr.bf16.mxu1 %v9306_v48  ;;  %v9382_v47 = vld [vmem:[%s12901_s4 + $0x1d0] ss:$8 sps:$4 sm:$0xff]   ;;  %v6165_v48 = vcombine.high %v11686_v46, %v11686_v46  ;;  %v9393_v46 = vld [vmem:[%s12899_s2 + $0x13f4] ss:$8 sps:$4 sm:$0xff]  }
 0x281   :  { %5784 = vmatprep.subr.bf16.mxu0 %v9303_v1  ;;  %v9390_v1 = vld [vmem:[%s12901_s4 + $0x1e4] ss:$8 sps:$4 sm:$0xff]  }
 0x282   :  { %7079 = vmatmul.mubr.bf16.vlgmr.msra.gmra.mrb[4].mxu1 %v11932_v38 }
 0x283   :  { %5776 = vmatmul.mubr.bf16.vlgmr.msra.gmra.mrb[0].mxu0 %v11928_v15  ;;  %7088 = vmatpush1.bf16.msra.mxu1 %v9304_v5  ;;  %v9385_v5 = vld [vmem:[%s12899_s2 + $0x13e0] ss:$8 sps:$4 sm:$0xff]  }
 0x284   :  { %5785 = vmatpush1.bf16.msra.mxu0 %v9301_v4  ;;  %7089 = vmatprep.subr.bf16.mxu1 %v9312_v53  ;;  %v12113_v4 = vld [vmem:[%s12900_s0 + $0x28] sm:$0xff]  ;;  %v9396_v53 = vld [vmem:[%s12901_s4 + $0x1f4] ss:$8 sps:$4 sm:$0xff]  }
 0x285   :  { %5786 = vmatprep.subr.bf16.mxu0 %v9309_v30  ;;  %5816 = vmatprep.mubr.bf16.mxu0 %v1067_v36  ;;  %v9388_v30 = vld [vmem:[%s12901_s4 + $0x1e0] ss:$8 sps:$4 sm:$0xff]   ;;  %v12129_v36 = vrot.slane %v12113_v4, %v9928_v51 }
 0x286   :  { %7119 = vmatprep.mubr.bf16.mxu1 %v6212_v6  ;;  %v12132_v6 = vrot.slane %v6165_v48, %v9928_v51  ;;  %v9463_v48 = vld [vmem:[%s12899_s2 + $0x14b0] ss:$8 sps:$4 sm:$0xff]  }
 0x287   :  { %7090 = vmatpush1.bf16.msra.mxu1 %v9310_v9  ;;  %v9394_v9 = vld [vmem:[%s12901_s4 + $0x1f0] ss:$8 sps:$4 sm:$0xff]  }
 0x288   :  { %5787 = vmatpush1.bf16.msra.mxu0 %v9307_v7  ;;  %7091 = vmatprep.subr.bf16.mxu1 %v9318_v62  ;;  %v9391_v7 = vld [vmem:[%s12899_s2 + $0x13f0] ss:$8 sps:$4 sm:$0xff]   ;;  %v9402_v62 = vld [vmem:[%s12901_s4 + $0x204] ss:$8 sps:$4 sm:$0xff]  }
 0x289   :  { %5788 = vmatprep.subr.bf16.mxu0 %v9315_v61  ;;  %v9399_v61 = vld [vmem:[%s12899_s2 + $0x1404] ss:$8 sps:$4 sm:$0xff]  }
 0x28b   :  { %7092 = vmatpush1.bf16.msra.mxu1 %v9316_v11  ;;  %v6181_v11 = vcombine.high %v12132_v6, %v12132_v6 }
 0x28c   :  { %5789 = vmatpush1.bf16.msra.mxu0 %v9313_v10  ;;  %7093 = vmatprep.subr.bf16.mxu1 %v9324_v63  ;;  %v1083_v10 = vcombine.high %v12129_v36, %v12129_v36  ;;  %v6210_v63 = vcombine.high %v11932_v38, %v11932_v38 }
 0x28d   :  { %5790 = vmatprep.subr.bf16.mxu0 %v9321_v29  ;;  %v1065_v29 = vcombine.high %v11928_v15, %v11928_v15  ;;  %v9408_v15 = vld [vmem:[%s12901_s4 + $0x214] ss:$8 sps:$4 sm:$0xff]  }
 0x28e   :  { %v12167_v38 = vrot.slane %v1083_v10, %v9928_v51  ;;  %v9478_v10 = vld [vmem:[%s12901_s4 + $0x2d0] ss:$8 sps:$4 sm:$0xff]  }
 0x28f   :  { %7094 = vmatpush1.bf16.msra.mxu1 %v9322_v16  ;;  %v9400_v16 = vld [vmem:[%s12901_s4 + $0x200] ss:$8 sps:$4 sm:$0xff]  }
 0x290   :  { %5791 = vmatpush1.bf16.msra.mxu0 %v9319_v12  ;;  %7095 = vmatprep.subr.bf16.mxu1 %v9330_v18  ;;  %v9397_v12 = vld [vmem:[%s12899_s2 + $0x1400] ss:$8 sps:$4 sm:$0xff]   ;;  %v12170_v18 = vrot.slane %v6181_v11, %v9928_v51  ;;  %v9483_v11 = vld [vmem:[%s12899_s2 + $0x14e4] ss:$8 sps:$4 sm:$0xff]  }
 0x291   :  { %5792 = vmatprep.subr.bf16.mxu0 %v9327_v2  ;;  %v9405_v2 = vld [vmem:[%s12899_s2 + $0x1414] ss:$8 sps:$4 sm:$0xff]  }
 0x293   :  { %7096 = vmatpush1.bf16.msra.mxu1 %v9328_v20  ;;  %v9406_v20 = vld [vmem:[%s12901_s4 + $0x210] ss:$8 sps:$4 sm:$0xff]  }
 0x294   :  { %5793 = vmatpush1.bf16.msra.mxu0 %v9325_v19  ;;  %7097 = vmatprep.subr.bf16.mxu1 %v9336_v23  ;;  %v9403_v19 = vld [vmem:[%s12899_s2 + $0x1410] ss:$8 sps:$4 sm:$0xff]   ;;  %v9414_v23 = vld [vmem:[%s12901_s4 + $0x224] ss:$8 sps:$4 sm:$0xff]  }
 0x295   :  { %5794 = vmatprep.subr.bf16.mxu0 %v9333_v22  ;;  %v9411_v22 = vld [vmem:[%s12899_s2 + $0x1424] ss:$8 sps:$4 sm:$0xff]  }
 0x297   :  { %7098 = vmatpush1.bf16.msra.mxu1 %v9334_v8  ;;  %v9412_v8 = vld [vmem:[%s12901_s4 + $0x220] ss:$8 sps:$4 sm:$0xff]  }
 0x298   :  { %5795 = vmatpush1.bf16.msra.mxu0 %v9331_v26  ;;  %7099 = vmatprep.subr.bf16.mxu1 %v9342_v52  ;;  %v9409_v26 = vld [vmem:[%s12899_s2 + $0x1420] ss:$8 sps:$4 sm:$0xff]   ;;  %v9420_v52 = vld [vmem:[%s12901_s4 + $0x234] ss:$8 sps:$4 sm:$0xff]  }
 0x299   :  { %5796 = vmatprep.subr.bf16.mxu0 %v9339_v41  ;;  %v9417_v41 = vld [vmem:[%s12899_s2 + $0x1434] ss:$8 sps:$4 sm:$0xff]  }
 0x29b   :  { %7100 = vmatpush1.bf16.msra.mxu1 %v9340_v32  ;;  %v9418_v32 = vld [vmem:[%s12901_s4 + $0x230] ss:$8 sps:$4 sm:$0xff]  }
 0x29c   :  { %5797 = vmatpush1.bf16.msra.mxu0 %v9337_v31  ;;  %7101 = vmatprep.subr.bf16.mxu1 %v9348_v33  ;;  %v9415_v31 = vld [vmem:[%s12899_s2 + $0x1430] ss:$8 sps:$4 sm:$0xff]   ;;  %v9426_v33 = vld [vmem:[%s12901_s4 + $0x244] ss:$8 sps:$4 sm:$0xff]  }
 0x29d   :  { %5798 = vmatprep.subr.bf16.mxu0 %v9345_v13  ;;  %v9423_v13 = vld [vmem:[%s12899_s2 + $0x1444] ss:$8 sps:$4 sm:$0xff]  }
 0x29f   :  { %7102 = vmatpush1.bf16.msra.mxu1 %v9346_v35  ;;  %v9424_v35 = vld [vmem:[%s12901_s4 + $0x240] ss:$8 sps:$4 sm:$0xff]  }
 0x2a0   :  { %5799 = vmatpush1.bf16.msra.mxu0 %v9343_v34  ;;  %7103 = vmatprep.subr.bf16.mxu1 %v9354_v14  ;;  %v9421_v34 = vld [vmem:[%s12899_s2 + $0x1440] ss:$8 sps:$4 sm:$0xff]   ;;  %v9432_v14 = vld [vmem:[%s12901_s4 + $0x254] ss:$8 sps:$4 sm:$0xff]  }
 0x2a1   :  { %5800 = vmatprep.subr.bf16.mxu0 %v9351_v37  ;;  %v9429_v37 = vld [vmem:[%s12899_s2 + $0x1454] ss:$8 sps:$4 sm:$0xff]  }
 0x2a3   :  { %7104 = vmatpush1.bf16.msra.mxu1 %v9352_v42  ;;  %v9430_v42 = vld [vmem:[%s12901_s4 + $0x250] ss:$8 sps:$4 sm:$0xff]  }
 0x2a4   :  { %5801 = vmatpush1.bf16.msra.mxu0 %v9349_v40  ;;  %7105 = vmatprep.subr.bf16.mxu1 %v9360_v24  ;;  %v9427_v40 = vld [vmem:[%s12899_s2 + $0x1450] ss:$8 sps:$4 sm:$0xff]   ;;  %v9438_v24 = vld [vmem:[%s12901_s4 + $0x264] ss:$8 sps:$4 sm:$0xff]  }
 0x2a5   :  { %5802 = vmatprep.subr.bf16.mxu0 %v9357_v43  ;;  %v9435_v43 = vld [vmem:[%s12899_s2 + $0x1464] ss:$8 sps:$4 sm:$0xff]  }
 0x2a7   :  { %7106 = vmatpush1.bf16.msra.mxu1 %v9358_v27  ;;  %v9436_v27 = vld [vmem:[%s12901_s4 + $0x260] ss:$8 sps:$4 sm:$0xff]  }
 0x2a8   :  { %5803 = vmatpush1.bf16.msra.mxu0 %v9355_v28  ;;  %7107 = vmatprep.subr.bf16.mxu1 %v9366_v49  ;;  %v9433_v28 = vld [vmem:[%s12899_s2 + $0x1460] ss:$8 sps:$4 sm:$0xff]   ;;  %v9444_v49 = vld [vmem:[%s12901_s4 + $0x274] ss:$8 sps:$4 sm:$0xff]  }
 0x2a9   :  { %5804 = vmatprep.subr.bf16.mxu0 %v9363_v44  ;;  %v9441_v44 = vld [vmem:[%s12899_s2 + $0x1474] ss:$8 sps:$4 sm:$0xff]  }
 0x2ab   :  { %7108 = vmatpush1.bf16.msra.mxu1 %v9364_v25  ;;  %v9442_v25 = vld [vmem:[%s12901_s4 + $0x270] ss:$8 sps:$4 sm:$0xff]  }
 0x2ac   :  { %5805 = vmatpush1.bf16.msra.mxu0 %v9361_v50  ;;  %7109 = vmatprep.subr.bf16.mxu1 %v9372_v54  ;;  %v9439_v50 = vld [vmem:[%s12899_s2 + $0x1470] ss:$8 sps:$4 sm:$0xff]   ;;  %v9450_v54 = vld [vmem:[%s12901_s4 + $0x284] ss:$8 sps:$4 sm:$0xff]  }
 0x2ad   :  { %5806 = vmatprep.subr.bf16.mxu0 %v9369_v21  ;;  %v9447_v21 = vld [vmem:[%s12899_s2 + $0x1484] ss:$8 sps:$4 sm:$0xff]  }
 0x2af   :  { %7110 = vmatpush1.bf16.msra.mxu1 %v9370_v56  ;;  %v9448_v56 = vld [vmem:[%s12901_s4 + $0x280] ss:$8 sps:$4 sm:$0xff]  }
 0x2b0   :  { %5807 = vmatpush1.bf16.msra.mxu0 %v9367_v55  ;;  %7111 = vmatprep.subr.bf16.mxu1 %v9378_v39  ;;  %v9445_v55 = vld [vmem:[%s12899_s2 + $0x1480] ss:$8 sps:$4 sm:$0xff]   ;;  %v9456_v39 = vld [vmem:[%s12901_s4 + $0x294] ss:$8 sps:$4 sm:$0xff]  }
 0x2b1   :  { %5808 = vmatprep.subr.bf16.mxu0 %v9375_v17  ;;  %v9453_v17 = vld [vmem:[%s12899_s2 + $0x1494] ss:$8 sps:$4 sm:$0xff]  }
 0x2b3   :  { %7112 = vmatpush1.bf16.msra.mxu1 %v9376_v58  ;;  %v9454_v58 = vld [vmem:[%s12901_s4 + $0x290] ss:$8 sps:$4 sm:$0xff]  }
 0x2b4   :  { %5809 = vmatpush1.bf16.msra.mxu0 %v9373_v57  ;;  %7113 = vmatprep.subr.bf16.mxu1 %v9384_v59  ;;  %v9451_v57 = vld [vmem:[%s12899_s2 + $0x1490] ss:$8 sps:$4 sm:$0xff]   ;;  %v9462_v59 = vld [vmem:[%s12901_s4 + $0x2a4] ss:$8 sps:$4 sm:$0xff]  }
 0x2b5   :  { %5810 = vmatprep.subr.bf16.mxu0 %v9381_v3  ;;  %v9459_v3 = vld [vmem:[%s12899_s2 + $0x14a4] ss:$8 sps:$4 sm:$0xff]  }
 0x2b7   :  { %7114 = vmatpush1.bf16.msra.mxu1 %v9382_v47  ;;  %v9460_v47 = vld [vmem:[%s12901_s4 + $0x2a0] ss:$8 sps:$4 sm:$0xff]  }
 0x2b8   :  { %5811 = vmatpush1.bf16.msra.mxu0 %v9379_v60  ;;  %7115 = vmatprep.subr.bf16.mxu1 %v9390_v1  ;;  %v9457_v60 = vld [vmem:[%s12899_s2 + $0x14a0] ss:$8 sps:$4 sm:$0xff]   ;;  %v9468_v1 = vld [vmem:[%s12901_s4 + $0x2b4] ss:$8 sps:$4 sm:$0xff]  }
 0x2b9   :  { %5812 = vmatprep.subr.bf16.mxu0 %v9387_v0  ;;  %v9465_v0 = vld [vmem:[%s12899_s2 + $0x14b4] ss:$8 sps:$4 sm:$0xff]  }
 0x2bb   :  { %7116 = vmatpush1.bf16.msra.mxu1 %v9388_v30  ;;  %v9471_v30 = vld [vmem:[%s12899_s2 + $0x14c4] ss:$8 sps:$4 sm:$0xff]  }
 0x2bc   :  { %5813 = vmatpush1.bf16.msra.mxu0 %v9385_v5  ;;  %7117 = vmatprep.subr.bf16.mxu1 %v9396_v53  ;;  %v9466_v5 = vld [vmem:[%s12901_s4 + $0x2b0] ss:$8 sps:$4 sm:$0xff]   ;;  %v9469_v53 = vld [vmem:[%s12899_s2 + $0x14c0] ss:$8 sps:$4 sm:$0xff]  }
 0x2bd   :  { %5814 = vmatprep.subr.bf16.mxu0 %v9393_v46  ;;  %v9474_v46 = vld [vmem:[%s12901_s4 + $0x2c4] ss:$8 sps:$4 sm:$0xff]  }
 0x2bf   :  { %7118 = vmatpush1.bf16.msra.mxu1 %v9394_v9  ;;  %v9477_v9 = vld [vmem:[%s12899_s2 + $0x14d4] ss:$8 sps:$4 sm:$0xff]  }
 0x2c0   :  { %5815 = vmatpush1.bf16.msra.mxu0 %v9391_v7  ;;  %7128 = vmatprep.subr.bf16.mxu1 %v9402_v62  ;;  %v9472_v7 = vld [vmem:[%s12901_s4 + $0x2c0] ss:$8 sps:$4 sm:$0xff]   ;;  %v9475_v62 = vld [vmem:[%s12899_s2 + $0x14d0] ss:$8 sps:$4 sm:$0xff]  }
 0x2c1   :  { %5825 = vmatprep.subr.bf16.mxu0 %v9399_v61  ;;  %v9480_v61 = vld [vmem:[%s12901_s4 + $0x2d4] ss:$8 sps:$4 sm:$0xff]  }
 0x2c2   :  { %7120 = vmatmul.mubr.bf16.vlgmr.msra.gmra.mrb[4].mxu1 %v6210_v63  ;;  %v9481_v63 = vld [vmem:[%s12899_s2 + $0x14e0] ss:$8 sps:$4 sm:$0xff]  }
 0x2c3   :  { %5817 = vmatmul.mubr.bf16.vlgmr.msra.gmra.mrb[0].mxu0 %v1065_v29  ;;  %7129 = vmatpush1.bf16.msra.mxu1 %v9400_v16  ;;  %v9486_v29 = vld [vmem:[%s12901_s4 + $0x2e4] ss:$8 sps:$4 sm:$0xff]   ;;  %v9489_v16 = vld [vmem:[%s12899_s2 + $0x14f4] ss:$8 sps:$4 sm:$0xff]  }
 0x2c4   :  { %5826 = vmatpush1.bf16.msra.mxu0 %v9397_v12  ;;  %7130 = vmatprep.subr.bf16.mxu1 %v9408_v15  ;;  %v9484_v12 = vld [vmem:[%s12901_s4 + $0x2e0] ss:$8 sps:$4 sm:$0xff]   ;;  %v9487_v15 = vld [vmem:[%s12899_s2 + $0x14f0] ss:$8 sps:$4 sm:$0xff]  }
 0x2c5   :  { %5827 = vmatprep.subr.bf16.mxu0 %v9405_v2  ;;  %5857 = vmatprep.mubr.bf16.mxu0 %v12167_v38  ;;  %v9492_v2 = vld [vmem:[%s12901_s4 + $0x2f4] ss:$8 sps:$4 sm:$0xff]  }
 0x2c6   :  { %7160 = vmatprep.mubr.bf16.mxu1 %v12170_v18 }
 0x2c7   :  { %7131 = vmatpush1.bf16.msra.mxu1 %v9406_v20  ;;  %v9495_v20 = vld [vmem:[%s12899_s2 + $0x1504] ss:$8 sps:$4 sm:$0xff]  }
 0x2c8   :  { %5828 = vmatpush1.bf16.msra.mxu0 %v9403_v19  ;;  %7132 = vmatprep.subr.bf16.mxu1 %v9414_v23  ;;  %v9490_v19 = vld [vmem:[%s12901_s4 + $0x2f0] ss:$8 sps:$4 sm:$0xff]   ;;  %v12356_v23 = vrot.slane %v12129_v36, %v9928_v51  ;;  %v9502_v36 = vld [vmem:[%s12899_s2 + $0x1514] ss:$8 sps:$4 sm:$0xff]  }
 0x2c9   :  { %5829 = vmatprep.subr.bf16.mxu0 %v9411_v22  ;;  %v9499_v22 = vld [vmem:[%s12901_s4 + $0x304] ss:$8 sps:$4 sm:$0xff]  }
 0x2cb   :  { %7133 = vmatpush1.bf16.msra.mxu1 %v9412_v8  ;;  %v9493_v8 = vld [vmem:[%s12899_s2 + $0x1500] ss:$8 sps:$4 sm:$0xff]  }
 0x2cc   :  { %5830 = vmatpush1.bf16.msra.mxu0 %v9409_v26  ;;  %7134 = vmatprep.subr.bf16.mxu1 %v9420_v52  ;;  %v12360_v26 = vrot.slane %v12132_v6, %v9928_v51  ;;  %v9505_v6 = vld [vmem:[%s12901_s4 + $0x314] ss:$8 sps:$4 sm:$0xff]   ;;  %v1115_v52 = vcombine.high %v12167_v38, %v12167_v38  ;;  %v9508_v38 = vld [vmem:[%s12899_s2 + $0x1524] ss:$8 sps:$4 sm:$0xff]  }
 0x2cd   :  { %5831 = vmatprep.subr.bf16.mxu0 %v9417_v41  ;;  %v9497_v41 = vld [vmem:[%s12901_s4 + $0x300] ss:$8 sps:$4 sm:$0xff]  }
 0x2cf   :  { %7135 = vmatpush1.bf16.msra.mxu1 %v9418_v32  ;;  %v9500_v32 = vld [vmem:[%s12899_s2 + $0x1510] ss:$8 sps:$4 sm:$0xff]  }
 0x2d0   :  { %5832 = vmatpush1.bf16.msra.mxu0 %v9415_v31  ;;  %7136 = vmatprep.subr.bf16.mxu1 %v9426_v33  ;;  %v6213_v31 = vcombine.high %v12170_v18, %v12170_v18  ;;  %v9511_v18 = vld [vmem:[%s12901_s4 + $0x324] ss:$8 sps:$4 sm:$0xff]   ;;  %v9506_v33 = vld [vmem:[%s12899_s2 + $0x1520] ss:$8 sps:$4 sm:$0xff]  }
 0x2d1   :  { %5833 = vmatprep.subr.bf16.mxu0 %v9423_v13  ;;  %v9503_v13 = vld [vmem:[%s12901_s4 + $0x310] ss:$8 sps:$4 sm:$0xff]  }
 0x2d3   :  { %7137 = vmatpush1.bf16.msra.mxu1 %v9424_v35  ;;  %v9514_v35 = vld [vmem:[%s12899_s2 + $0x1534] ss:$8 sps:$4 sm:$0xff]  }
 0x2d4   :  { %5834 = vmatpush1.bf16.msra.mxu0 %v9421_v34  ;;  %7138 = vmatprep.subr.bf16.mxu1 %v9432_v14  ;;  %v9509_v34 = vld [vmem:[%s12901_s4 + $0x320] ss:$8 sps:$4 sm:$0xff]   ;;  %v9512_v14 = vld [vmem:[%s12899_s2 + $0x1530] ss:$8 sps:$4 sm:$0xff]  }
 0x2d5   :  { %5835 = vmatprep.subr.bf16.mxu0 %v9429_v37  ;;  %v9517_v37 = vld [vmem:[%s12901_s4 + $0x334] ss:$8 sps:$4 sm:$0xff]  }
 0x2d7   :  { %7139 = vmatpush1.bf16.msra.mxu1 %v9430_v42  ;;  %v9520_v42 = vld [vmem:[%s12899_s2 + $0x1544] ss:$8 sps:$4 sm:$0xff]  }
 0x2d8   :  { %5836 = vmatpush1.bf16.msra.mxu0 %v9427_v40  ;;  %7140 = vmatprep.subr.bf16.mxu1 %v9438_v24  ;;  %v9515_v40 = vld [vmem:[%s12901_s4 + $0x330] ss:$8 sps:$4 sm:$0xff]   ;;  %v9518_v24 = vld [vmem:[%s12899_s2 + $0x1540] ss:$8 sps:$4 sm:$0xff]  }
 0x2d9   :  { %5837 = vmatprep.subr.bf16.mxu0 %v9435_v43  ;;  %v9523_v43 = vld [vmem:[%s12901_s4 + $0x344] ss:$8 sps:$4 sm:$0xff]  }
 0x2db   :  { %7141 = vmatpush1.bf16.msra.mxu1 %v9436_v27  ;;  %v9526_v27 = vld [vmem:[%s12899_s2 + $0x1554] ss:$8 sps:$4 sm:$0xff]  }
 0x2dc   :  { %5838 = vmatpush1.bf16.msra.mxu0 %v9433_v28  ;;  %7142 = vmatprep.subr.bf16.mxu1 %v9444_v49  ;;  %v9521_v28 = vld [vmem:[%s12901_s4 + $0x340] ss:$8 sps:$4 sm:$0xff]   ;;  %v9524_v49 = vld [vmem:[%s12899_s2 + $0x1550] ss:$8 sps:$4 sm:$0xff]  }
 0x2dd   :  { %5839 = vmatprep.subr.bf16.mxu0 %v9441_v44  ;;  %v9529_v44 = vld [vmem:[%s12901_s4 + $0x354] ss:$8 sps:$4 sm:$0xff]  }
 0x2df   :  { %7143 = vmatpush1.bf16.msra.mxu1 %v9442_v25  ;;  %v9532_v25 = vld [vmem:[%s12899_s2 + $0x1564] ss:$8 sps:$4 sm:$0xff]  }
 0x2e0   :  { %5840 = vmatpush1.bf16.msra.mxu0 %v9439_v50  ;;  %7144 = vmatprep.subr.bf16.mxu1 %v9450_v54  ;;  %v9527_v50 = vld [vmem:[%s12901_s4 + $0x350] ss:$8 sps:$4 sm:$0xff]  }
 0x2e1   :  { %5841 = vmatprep.subr.bf16.mxu0 %v9447_v21  ;;  %v9535_v21 = vld [vmem:[%s12901_s4 + $0x364] ss:$8 sps:$4 sm:$0xff]  }
 0x2e3   :  { %7145 = vmatpush1.bf16.msra.mxu1 %v9448_v56 }
 0x2e4   :  { %5842 = vmatpush1.bf16.msra.mxu0 %v9445_v55  ;;  %7146 = vmatprep.subr.bf16.mxu1 %v9456_v39  ;;  %v9533_v39 = vld [vmem:[%s12901_s4 + $0x360] ss:$8 sps:$4 sm:$0xff]  }
 0x2e5   :  { %5843 = vmatprep.subr.bf16.mxu0 %v9453_v17  ;;  %v9530_v17 = vld [vmem:[%s12899_s2 + $0x1560] ss:$8 sps:$4 sm:$0xff]  }
 0x2e7   :  { %7147 = vmatpush1.bf16.msra.mxu1 %v9454_v58  ;;  %v9538_v58 = vld [vmem:[%s12899_s2 + $0x1574] ss:$8 sps:$4 sm:$0xff]  }
 0x2e8   :  { %5844 = vmatpush1.bf16.msra.mxu0 %v9451_v57  ;;  %7148 = vmatprep.subr.bf16.mxu1 %v9462_v59  ;;  %v9536_v59 = vld [vmem:[%s12899_s2 + $0x1570] ss:$8 sps:$4 sm:$0xff]  }
 0x2e9   :  { %5845 = vmatprep.subr.bf16.mxu0 %v9459_v3  ;;  %v9541_v3 = vld [vmem:[%s12901_s4 + $0x374] ss:$8 sps:$4 sm:$0xff]  }
 0x2eb   :  { %7149 = vmatpush1.bf16.msra.mxu1 %v9460_v47  ;;  %v9544_v47 = vld [vmem:[%s12899_s2 + $0x1584] ss:$8 sps:$4 sm:$0xff]  }
 0x2ec   :  { %5846 = vmatpush1.bf16.msra.mxu0 %v9457_v60  ;;  %7150 = vmatprep.subr.bf16.mxu1 %v9468_v1  ;;  %v9539_v60 = vld [vmem:[%s12901_s4 + $0x370] ss:$8 sps:$4 sm:$0xff]   ;;  %v9542_v1 = vld [vmem:[%s12899_s2 + $0x1580] ss:$8 sps:$4 sm:$0xff]  }
 0x2ed   :  { %5847 = vmatprep.subr.bf16.mxu0 %v9465_v0  ;;  %v9547_v0 = vld [vmem:[%s12901_s4 + $0x384] ss:$8 sps:$4 sm:$0xff]  }
 0x2ef   :  { %7151 = vmatpush1.bf16.msra.mxu1 %v9466_v5  ;;  %v9550_v5 = vld [vmem:[%s12899_s2 + $0x1594] ss:$8 sps:$4 sm:$0xff]  }
 0x2f0   :  { %5848 = vmatpush1.bf16.msra.mxu0 %v9463_v48  ;;  %7152 = vmatprep.subr.bf16.mxu1 %v9474_v46  ;;  %v9545_v48 = vld [vmem:[%s12901_s4 + $0x380] ss:$8 sps:$4 sm:$0xff]   ;;  %v9548_v46 = vld [vmem:[%s12899_s2 + $0x1590] ss:$8 sps:$4 sm:$0xff]  }
 0x2f1   :  { %5849 = vmatprep.subr.bf16.mxu0 %v9471_v30  ;;  %v9553_v30 = vld [vmem:[%s12901_s4 + $0x394] ss:$8 sps:$4 sm:$0xff]  }
 0x2f3   :  { %7153 = vmatpush1.bf16.msra.mxu1 %v9472_v7  ;;  %v9556_v7 = vld [vmem:[%s12899_s2 + $0x15a4] ss:$8 sps:$4 sm:$0xff]  }
 0x2f4   :  { %5850 = vmatpush1.bf16.msra.mxu0 %v9469_v53  ;;  %7154 = vmatprep.subr.bf16.mxu1 %v9480_v61  ;;  %v9551_v53 = vld [vmem:[%s12901_s4 + $0x390] ss:$8 sps:$4 sm:$0xff]   ;;  %v9554_v61 = vld [vmem:[%s12899_s2 + $0x15a0] ss:$8 sps:$4 sm:$0xff]  }
 0x2f5   :  { %5851 = vmatprep.subr.bf16.mxu0 %v9477_v9  ;;  %v9559_v9 = vld [vmem:[%s12901_s4 + $0x3a4] ss:$8 sps:$4 sm:$0xff]  }
 0x2f7   :  { %7155 = vmatpush1.bf16.msra.mxu1 %v9478_v10  ;;  %v9562_v10 = vld [vmem:[%s12899_s2 + $0x15b4] ss:$8 sps:$4 sm:$0xff]  }
 0x2f8   :  { %5852 = vmatpush1.bf16.msra.mxu0 %v9475_v62  ;;  %7156 = vmatprep.subr.bf16.mxu1 %v9486_v29  ;;  %v9557_v62 = vld [vmem:[%s12901_s4 + $0x3a0] ss:$8 sps:$4 sm:$0xff]   ;;  %v9560_v29 = vld [vmem:[%s12899_s2 + $0x15b0] ss:$8 sps:$4 sm:$0xff]  }
 0x2f9   :  { %5853 = vmatprep.subr.bf16.mxu0 %v9483_v11  ;;  %v9565_v11 = vld [vmem:[%s12901_s4 + $0x3b4] ss:$8 sps:$4 sm:$0xff]  }
 0x2fb   :  { %7157 = vmatpush1.bf16.msra.mxu1 %v9484_v12  ;;  %v9568_v12 = vld [vmem:[%s12899_s2 + $0x15c4] ss:$8 sps:$4 sm:$0xff]  }
 0x2fc   :  { %5854 = vmatpush1.bf16.msra.mxu0 %v9481_v63  ;;  %7158 = vmatprep.subr.bf16.mxu1 %v9492_v2  ;;  %v9563_v63 = vld [vmem:[%s12901_s4 + $0x3b0] ss:$8 sps:$4 sm:$0xff]   ;;  %v9566_v2 = vld [vmem:[%s12899_s2 + $0x15c0] ss:$8 sps:$4 sm:$0xff]  }
 0x2fd   :  { %5855 = vmatprep.subr.bf16.mxu0 %v9489_v16  ;;  %v9571_v16 = vld [vmem:[%s12901_s4 + $0x3c4] ss:$8 sps:$4 sm:$0xff]  }
 0x2ff   :  { %7159 = vmatpush1.bf16.msra.mxu1 %v9490_v19  ;;  %v9574_v19 = vld [vmem:[%s12899_s2 + $0x15d4] ss:$8 sps:$4 sm:$0xff]  }
 0x300   :  { %5856 = vmatpush1.bf16.msra.mxu0 %v9487_v15  ;;  %7169 = vmatprep.subr.bf16.mxu1 %v9499_v22  ;;  %v9569_v15 = vld [vmem:[%s12901_s4 + $0x3c0] ss:$8 sps:$4 sm:$0xff]   ;;  %v9572_v22 = vld [vmem:[%s12899_s2 + $0x15d0] ss:$8 sps:$4 sm:$0xff]  }
 0x301   :  { %5866 = vmatprep.subr.bf16.mxu0 %v9495_v20  ;;  %v9577_v20 = vld [vmem:[%s12901_s4 + $0x3d4] ss:$8 sps:$4 sm:$0xff]  }
 0x302   :  { %7161 = vmatmul.mubr.bf16.vlgmr.msra.gmra.mrb[4].mxu1 %v12360_v26 }
 0x303   :  { %5858 = vmatmul.mubr.bf16.vlgmr.msra.gmra.mrb[0].mxu0 %v12356_v23  ;;  %7170 = vmatpush1.bf16.msra.mxu1 %v9497_v41  ;;  %v9580_v41 = vld [vmem:[%s12899_s2 + $0x15e4] ss:$8 sps:$4 sm:$0xff]  }
 0x304   :  { %5867 = vmatpush1.bf16.msra.mxu0 %v9493_v8  ;;  %7171 = vmatprep.subr.bf16.mxu1 %v9505_v6  ;;  %v9575_v8 = vld [vmem:[%s12901_s4 + $0x3d0] ss:$8 sps:$4 sm:$0xff]   ;;  %v1068_v6 = vcombine.high %v12113_v4, %v12113_v4  ;;  %v9589_v4 = vld [vmem:[%s12901_s4 + $0x3f4] ss:$8 sps:$4 sm:$0xff]  }
 0x305   :  { %5868 = vmatprep.subr.bf16.mxu0 %v9502_v36  ;;  %5898 = vmatprep.mubr.bf16.mxu0 %v1115_v52  ;;  %v9583_v36 = vld [vmem:[%s12901_s4 + $0x3e4] ss:$8 sps:$4 sm:$0xff]   ;;  %v9578_v52 = vld [vmem:[%s12899_s2 + $0x15e0] ss:$8 sps:$4 sm:$0xff]  }
 0x306   :  { %7201 = vmatprep.mubr.bf16.mxu1 %v6213_v31  ;;  %v9581_v31 = vld [vmem:[%s12901_s4 + $0x3e0] ss:$8 sps:$4 sm:$0xff]  }
 0x307   :  { %7172 = vmatpush1.bf16.msra.mxu1 %v9503_v13  ;;  %v12555_v13 = vrot.slane %v1068_v6, %v9928_v51  ;;  %v9661_v6 = vld [vmem:[%s12901_s4 + $0x4b4] ss:$8 sps:$4 sm:$0xff]  }
 0x308   :  { %5869 = vmatpush1.bf16.msra.mxu0 %v9500_v32  ;;  %7173 = vmatprep.subr.bf16.mxu1 %v9511_v18  ;;  %v9586_v32 = vld [vmem:[%s12899_s2 + $0x15f4] ss:$8 sps:$4 sm:$0xff]   ;;  %v9584_v18 = vld [vmem:[%s12899_s2 + $0x15f0] ss:$8 sps:$4 sm:$0xff]  }
 0x309   :  { %5870 = vmatprep.subr.bf16.mxu0 %v9508_v38  ;;  %v12560_v38 = vld.sshfl [vmem:[%s12902_s1 + $0x8] sm:$0x11 pattern:$0x75316420] }
 0x30b   :  { %7174 = vmatpush1.bf16.msra.mxu1 %v9509_v34  ;;  %v9592_v34 = vld [vmem:[%s12899_s2 + $0x1604] ss:$8 sps:$4 sm:$0xff]  }
 0x30c   :  { %5871 = vmatpush1.bf16.msra.mxu0 %v9506_v33  ;;  %7175 = vmatprep.subr.bf16.mxu1 %v9517_v37  ;;  %v9587_v33 = vld [vmem:[%s12901_s4 + $0x3f0] ss:$8 sps:$4 sm:$0xff]   ;;  %v6221_v37 = vcombine.high %v12560_v38, %v12560_v38 }
 0x30d   :  { %5872 = vmatprep.subr.bf16.mxu0 %v9514_v35  ;;  %v9595_v35 = vld [vmem:[%s12901_s4 + $0x404] ss:$8 sps:$4 sm:$0xff]  }
 0x30f   :  { %7176 = vmatpush1.bf16.msra.mxu1 %v9515_v40  ;;  %v1113_v40 = vcombine.high %v12356_v23, %v12356_v23  ;;  %v9601_v23 = vld [vmem:[%s12901_s4 + $0x414] ss:$8 sps:$4 sm:$0xff]  }
 0x310   :  { %5873 = vmatpush1.bf16.msra.mxu0 %v9512_v14  ;;  %7177 = vmatprep.subr.bf16.mxu1 %v9523_v43  ;;  %v1084_v14 = vcombine.high %v12555_v13, %v12555_v13  ;;  %v9590_v43 = vld [vmem:[%s12899_s2 + $0x1600] ss:$8 sps:$4 sm:$0xff]  }
 0x311   :  { %5874 = vmatprep.subr.bf16.mxu0 %v9520_v42  ;;  %v6211_v42 = vcombine.high %v12360_v26, %v12360_v26  ;;  %v6235_v26 = vrot.slane %v6221_v37, %v9928_v51  ;;  %v9668_v37 = vld [vmem:[%s12899_s2 + $0x16d0] ss:$8 sps:$4 sm:$0xff]  }
 0x313   :  { %7178 = vmatpush1.bf16.msra.mxu1 %v9521_v28  ;;  %v9598_v28 = vld [vmem:[%s12899_s2 + $0x1614] ss:$8 sps:$4 sm:$0xff]  }
 0x314   :  { %5875 = vmatpush1.bf16.msra.mxu0 %v9518_v24  ;;  %7179 = vmatprep.subr.bf16.mxu1 %v9529_v44  ;;  %v9593_v24 = vld [vmem:[%s12901_s4 + $0x400] ss:$8 sps:$4 sm:$0xff]   ;;  %v9596_v44 = vld [vmem:[%s12899_s2 + $0x1610] ss:$8 sps:$4 sm:$0xff]  }
 0x315   :  { %5876 = vmatprep.subr.bf16.mxu0 %v9526_v27  ;;  %v12440_v54 = vpop.f32.mrb[0].mxu1  ;;  %v12596_v27 = vrot.slane %v1084_v14, %v9928_v51  ;;  %v9671_v14 = vld [vmem:[%s12901_s4 + $0x4d0] ss:$8 sps:$4 sm:$0xff]  }
 0x316   :  { %v12442_v55 = vpop.f32.mrb[1].mxu1 }
 0x317   :  { %v5371_v56 = vpop.f32.mrb[2].mxu1  ;;  %7180 = vmatpush1.bf16.msra.mxu1 %v9527_v50  ;;  %v9604_v50 = vld [vmem:[%s12899_s2 + $0x1624] ss:$8 sps:$4 sm:$0xff]  }
 0x318   :  { %5877 = vmatpush1.bf16.msra.mxu0 %v9524_v49  ;;  %v5372_v57 = vpop.f32.mrb[3].mxu1  ;;  %7181 = vmatprep.subr.bf16.mxu1 %v9535_v21  ;;  %v9599_v49 = vld [vmem:[%s12901_s4 + $0x410] ss:$8 sps:$4 sm:$0xff]   ;;  %v9602_v21 = vld [vmem:[%s12899_s2 + $0x1620] ss:$8 sps:$4 sm:$0xff]  }
 0x319   :  { %5878 = vmatprep.subr.bf16.mxu0 %v9532_v25  ;;  %v9607_v25 = vld [vmem:[%s12901_s4 + $0x424] ss:$8 sps:$4 sm:$0xff]   ;;  %v9605_v56 = vld [vmem:[%s12901_s4 + $0x420] ss:$8 sps:$4 sm:$0xff]   ;;  %v9608_v57 = vld [vmem:[%s12899_s2 + $0x1630] ss:$8 sps:$4 sm:$0xff]  }
 0x31b   :  { %7182 = vmatpush1.bf16.msra.mxu1 %v9533_v39  ;;  %v9613_v39 = vld [vmem:[%s12901_s4 + $0x434] ss:$8 sps:$4 sm:$0xff]  }
 0x31c   :  { %5879 = vmatpush1.bf16.msra.mxu0 %v9530_v17  ;;  %7183 = vmatprep.subr.bf16.mxu1 %v9541_v3  ;;  %v9610_v17 = vld [vmem:[%s12899_s2 + $0x1634] ss:$8 sps:$4 sm:$0xff]   ;;  %v9616_v3 = vld [vmem:[%s12899_s2 + $0x1644] ss:$8 sps:$4 sm:$0xff]  }
 0x31d   :  { %5880 = vmatprep.subr.bf16.mxu0 %v9538_v58  ;;  %v9611_v58 = vld [vmem:[%s12901_s4 + $0x430] ss:$8 sps:$4 sm:$0xff]  }
 0x31f   :  { %7184 = vmatpush1.bf16.msra.mxu1 %v9539_v60  ;;  %v9614_v60 = vld [vmem:[%s12899_s2 + $0x1640] ss:$8 sps:$4 sm:$0xff]  }
 0x320   :  { %5881 = vmatpush1.bf16.msra.mxu0 %v9536_v59  ;;  %7185 = vmatprep.subr.bf16.mxu1 %v9547_v0  ;;  %v9619_v59 = vld [vmem:[%s12901_s4 + $0x444] ss:$8 sps:$4 sm:$0xff]   ;;  %v9622_v0 = vld [vmem:[%s12899_s2 + $0x1654] ss:$8 sps:$4 sm:$0xff]  }
 0x321   :  { %5882 = vmatprep.subr.bf16.mxu0 %v9544_v47  ;;  %v9617_v47 = vld [vmem:[%s12901_s4 + $0x440] ss:$8 sps:$4 sm:$0xff]  }
 0x323   :  { %7186 = vmatpush1.bf16.msra.mxu1 %v9545_v48  ;;  %v9620_v48 = vld [vmem:[%s12899_s2 + $0x1650] ss:$8 sps:$4 sm:$0xff]  }
 0x324   :  { %5883 = vmatpush1.bf16.msra.mxu0 %v9542_v1  ;;  %7187 = vmatprep.subr.bf16.mxu1 %v9553_v30  ;;  %v9625_v1 = vld [vmem:[%s12901_s4 + $0x454] ss:$8 sps:$4 sm:$0xff]   ;;  %v9628_v30 = vld [vmem:[%s12899_s2 + $0x1664] ss:$8 sps:$4 sm:$0xff]  }
 0x325   :  { %5884 = vmatprep.subr.bf16.mxu0 %v9550_v5  ;;  %v9623_v5 = vld [vmem:[%s12901_s4 + $0x450] ss:$8 sps:$4 sm:$0xff]  }
 0x327   :  { %7188 = vmatpush1.bf16.msra.mxu1 %v9551_v53  ;;  %v9626_v53 = vld [vmem:[%s12899_s2 + $0x1660] ss:$8 sps:$4 sm:$0xff]  }
 0x328   :  { %5885 = vmatpush1.bf16.msra.mxu0 %v9548_v46  ;;  %7189 = vmatprep.subr.bf16.mxu1 %v9559_v9  ;;  %v9631_v46 = vld [vmem:[%s12901_s4 + $0x464] ss:$8 sps:$4 sm:$0xff]   ;;  %v9634_v9 = vld [vmem:[%s12899_s2 + $0x1674] ss:$8 sps:$4 sm:$0xff]  }
 0x329   :  { %5886 = vmatprep.subr.bf16.mxu0 %v9556_v7  ;;  %v9629_v7 = vld [vmem:[%s12901_s4 + $0x460] ss:$8 sps:$4 sm:$0xff]  }
 0x32b   :  { %7190 = vmatpush1.bf16.msra.mxu1 %v9557_v62  ;;  %v9632_v62 = vld [vmem:[%s12899_s2 + $0x1670] ss:$8 sps:$4 sm:$0xff]  }
 0x32c   :  { %5887 = vmatpush1.bf16.msra.mxu0 %v9554_v61  ;;  %7191 = vmatprep.subr.bf16.mxu1 %v9565_v11  ;;  %v9637_v61 = vld [vmem:[%s12901_s4 + $0x474] ss:$8 sps:$4 sm:$0xff]   ;;  %v9640_v11 = vld [vmem:[%s12899_s2 + $0x1684] ss:$8 sps:$4 sm:$0xff]  }
 0x32d   :  { %5888 = vmatprep.subr.bf16.mxu0 %v9562_v10  ;;  %v9635_v10 = vld [vmem:[%s12901_s4 + $0x470] ss:$8 sps:$4 sm:$0xff]  }
 0x32f   :  { %7192 = vmatpush1.bf16.msra.mxu1 %v9563_v63  ;;  %v9638_v63 = vld [vmem:[%s12899_s2 + $0x1680] ss:$8 sps:$4 sm:$0xff]  }
 0x330   :  { %5889 = vmatpush1.bf16.msra.mxu0 %v9560_v29  ;;  %7193 = vmatprep.subr.bf16.mxu1 %v9571_v16  ;;  %v9643_v29 = vld [vmem:[%s12901_s4 + $0x484] ss:$8 sps:$4 sm:$0xff]   ;;  %v9646_v16 = vld [vmem:[%s12899_s2 + $0x1694] ss:$8 sps:$4 sm:$0xff]  }
 0x331   :  { %5890 = vmatprep.subr.bf16.mxu0 %v9568_v12  ;;  %v9641_v12 = vld [vmem:[%s12901_s4 + $0x480] ss:$8 sps:$4 sm:$0xff]  }
 0x333   :  { %7194 = vmatpush1.bf16.msra.mxu1 %v9569_v15  ;;  %v9644_v15 = vld [vmem:[%s12899_s2 + $0x1690] ss:$8 sps:$4 sm:$0xff]  }
 0x334   :  { %5891 = vmatpush1.bf16.msra.mxu0 %v9566_v2  ;;  %7195 = vmatprep.subr.bf16.mxu1 %v9577_v20  ;;  %v9649_v2 = vld [vmem:[%s12901_s4 + $0x494] ss:$8 sps:$4 sm:$0xff]   ;;  %v9652_v20 = vld [vmem:[%s12899_s2 + $0x16a4] ss:$8 sps:$4 sm:$0xff]  }
 0x335   :  { %5892 = vmatprep.subr.bf16.mxu0 %v9574_v19  ;;  %v9647_v19 = vld [vmem:[%s12901_s4 + $0x490] ss:$8 sps:$4 sm:$0xff]  }
 0x337   :  { %7196 = vmatpush1.bf16.msra.mxu1 %v9575_v8  ;;  %v9650_v8 = vld [vmem:[%s12899_s2 + $0x16a0] ss:$8 sps:$4 sm:$0xff]  }
 0x338   :  { %5893 = vmatpush1.bf16.msra.mxu0 %v9572_v22  ;;  %7197 = vmatprep.subr.bf16.mxu1 %v9583_v36  ;;  %v9655_v22 = vld [vmem:[%s12901_s4 + $0x4a4] ss:$8 sps:$4 sm:$0xff]   ;;  %v9658_v36 = vld [vmem:[%s12899_s2 + $0x16b4] ss:$8 sps:$4 sm:$0xff]  }
 0x339   :  { %5894 = vmatprep.subr.bf16.mxu0 %v9580_v41  ;;  %v9653_v41 = vld [vmem:[%s12901_s4 + $0x4a0] ss:$8 sps:$4 sm:$0xff]  }
 0x33b   :  { %7198 = vmatpush1.bf16.msra.mxu1 %v9581_v31  ;;  %v9659_v31 = vld [vmem:[%s12901_s4 + $0x4b0] ss:$8 sps:$4 sm:$0xff]  }
 0x33c   :  { %5895 = vmatpush1.bf16.msra.mxu0 %v9578_v52  ;;  %7199 = vmatprep.subr.bf16.mxu1 %v9589_v4  ;;  %v9656_v52 = vld [vmem:[%s12899_s2 + $0x16b0] ss:$8 sps:$4 sm:$0xff]   ;;  %v9667_v4 = vld [vmem:[%s12901_s4 + $0x4c4] ss:$8 sps:$4 sm:$0xff]  }
 0x33d   :  { %5896 = vmatprep.subr.bf16.mxu0 %v9586_v32  ;;  %v9664_v32 = vld [vmem:[%s12899_s2 + $0x16c4] ss:$8 sps:$4 sm:$0xff]  }
 0x33f   :  { %7200 = vmatpush1.bf16.msra.mxu1 %v9587_v33  ;;  %v9665_v33 = vld [vmem:[%s12901_s4 + $0x4c0] ss:$8 sps:$4 sm:$0xff]  }
 0x340   :  { %5897 = vmatpush1.bf16.msra.mxu0 %v9584_v18  ;;  %7210 = vmatprep.subr.bf16.mxu1 %v9595_v35  ;;  %v9662_v18 = vld [vmem:[%s12899_s2 + $0x16c0] ss:$8 sps:$4 sm:$0xff]   ;;  %v9673_v35 = vld [vmem:[%s12901_s4 + $0x4d4] ss:$8 sps:$4 sm:$0xff]  }
 0x341   :  { %5907 = vmatprep.subr.bf16.mxu0 %v9592_v34  ;;  %v9670_v34 = vld [vmem:[%s12899_s2 + $0x16d4] ss:$8 sps:$4 sm:$0xff]  }
 0x342   :  { %7202 = vmatmul.mubr.bf16.vlgmr.msra.gmra.mrb[4].mxu1 %v6211_v42  ;;  %v9679_v42 = vld [vmem:[%s12901_s4 + $0x4e4] ss:$8 sps:$4 sm:$0xff]  }
 0x343   :  { %5899 = vmatmul.mubr.bf16.vlgmr.msra.gmra.mrb[0].mxu0 %v1113_v40  ;;  %7211 = vmatpush1.bf16.msra.mxu1 %v9593_v24  ;;  %v9676_v40 = vld [vmem:[%s12899_s2 + $0x16e4] ss:$8 sps:$4 sm:$0xff]   ;;  %v9677_v24 = vld [vmem:[%s12901_s4 + $0x4e0] ss:$8 sps:$4 sm:$0xff]  }
 0x344   :  { %5908 = vmatpush1.bf16.msra.mxu0 %v9590_v43  ;;  %7212 = vmatprep.subr.bf16.mxu1 %v9601_v23  ;;  %v9674_v43 = vld [vmem:[%s12899_s2 + $0x16e0] ss:$8 sps:$4 sm:$0xff]   ;;  %v9685_v23 = vld [vmem:[%s12901_s4 + $0x4f4] ss:$8 sps:$4 sm:$0xff]  }
 0x345   :  { %5909 = vmatprep.subr.bf16.mxu0 %v9598_v28  ;;  %7242 = vmatprep.mubr.bf16.mxu1 %v6235_v26  ;;  %v9682_v28 = vld [vmem:[%s12899_s2 + $0x16f4] ss:$8 sps:$4 sm:$0xff]   ;;  %v9680_v26 = vld [vmem:[%s12899_s2 + $0x16f0] ss:$8 sps:$4 sm:$0xff]  }
 0x346   :  { %5939 = vmatprep.mubr.bf16.mxu0 %v12596_v27 }
 0x347   :  { %7213 = vmatpush1.bf16.msra.mxu1 %v9599_v49  ;;  %v9689_v49 = vld [vmem:[%s12899_s2 + $0x1704] ss:$8 sps:$4 sm:$0xff]  }
 0x348   :  { %5910 = vmatpush1.bf16.msra.mxu0 %v9596_v44  ;;  %7214 = vmatprep.subr.bf16.mxu1 %v9607_v25  ;;  %v9683_v44 = vld [vmem:[%s12901_s4 + $0x4f0] ss:$8 sps:$4 sm:$0xff]   ;;  %v12780_v25 = vrot.slane %v12555_v13, %v9928_v51  ;;  %v9695_v13 = vld [vmem:[%s12899_s2 + $0x1724] ss:$8 sps:$4 sm:$0xff]  }
 0x349   :  { %5911 = vmatprep.subr.bf16.mxu0 %v9604_v50  ;;  %v6228_v50 = vrot.slane %v12560_v38, %v9928_v51  ;;  %v9690_v51 = vld [vmem:[%s12899_s2 + $0x1710] ss:$8 sps:$4 sm:$0xff]   ;;  %v9693_v38 = vld [vmem:[%s12899_s2 + $0x1720] ss:$8 sps:$4 sm:$0xff]  }
 0x34b   :  { %7215 = vmatpush1.bf16.msra.mxu1 %v9605_v56  ;;  %v1116_v56 = vcombine.high %v12596_v27, %v12596_v27  ;;  %v9698_v27 = vld [vmem:[%s12899_s2 + $0x1734] ss:$8 sps:$4 sm:$0xff]  }
 0x34c   :  { %5912 = vmatpush1.bf16.msra.mxu0 %v9602_v21  ;;  %7216 = vmatprep.subr.bf16.mxu1 %v9613_v39  ;;  %v9687_v21 = vld [vmem:[%s12899_s2 + $0x1700] ss:$8 sps:$4 sm:$0xff]   ;;  %v9696_v39 = vld [vmem:[%s12899_s2 + $0x1730] ss:$8 sps:$4 sm:$0xff]  }
 0x34d   :  { %5913 = vmatprep.subr.bf16.mxu0 %v9610_v17  ;;  %v9692_v17 = vld [vmem:[%s12899_s2 + $0x1714] ss:$8 sps:$4 sm:$0xff]  }
 0x34f   :  { %7217 = vmatpush1.bf16.msra.mxu1 %v9611_v58  ;;  %v9699_v58 = vld [vmem:[%s12899_s2 + $0x1740] ss:$8 sps:$4 sm:$0xff]  }
 0x350   :  { %5914 = vmatpush1.bf16.msra.mxu0 %v9608_v57  ;;  %7218 = vmatprep.subr.bf16.mxu1 %v9619_v59  ;;  %v9701_v57 = vld [vmem:[%s12899_s2 + $0x1744] ss:$8 sps:$4 sm:$0xff]   ;;  %v9702_v59 = vld [vmem:[%s12899_s2 + $0x1750] ss:$8 sps:$4 sm:$0xff]  }
 0x351   :  { %5915 = vmatprep.subr.bf16.mxu0 %v9616_v3  ;;  %v9704_v3 = vld [vmem:[%s12899_s2 + $0x1754] ss:$8 sps:$4 sm:$0xff]  }
 0x353   :  { %7219 = vmatpush1.bf16.msra.mxu1 %v9617_v47  ;;  %v9705_v47 = vld [vmem:[%s12899_s2 + $0x1760] ss:$8 sps:$4 sm:$0xff]  }
 0x354   :  { %5916 = vmatpush1.bf16.msra.mxu0 %v9614_v60  ;;  %7220 = vmatprep.subr.bf16.mxu1 %v9625_v1  ;;  %v9707_v60 = vld [vmem:[%s12899_s2 + $0x1764] ss:$8 sps:$4 sm:$0xff]   ;;  %v9708_v1 = vld [vmem:[%s12899_s2 + $0x1770] ss:$8 sps:$4 sm:$0xff]  }
 0x355   :  { %5917 = vmatprep.subr.bf16.mxu0 %v9622_v0  ;;  %v9710_v0 = vld [vmem:[%s12899_s2 + $0x1774] ss:$8 sps:$4 sm:$0xff]  }
 0x357   :  { %7221 = vmatpush1.bf16.msra.mxu1 %v9623_v5  ;;  %v9711_v5 = vld [vmem:[%s12899_s2 + $0x1780] ss:$8 sps:$4 sm:$0xff]  }
 0x358   :  { %5918 = vmatpush1.bf16.msra.mxu0 %v9620_v48  ;;  %7222 = vmatprep.subr.bf16.mxu1 %v9631_v46  ;;  %v9713_v48 = vld [vmem:[%s12899_s2 + $0x1784] ss:$8 sps:$4 sm:$0xff]   ;;  %v9714_v46 = vld [vmem:[%s12899_s2 + $0x1790] ss:$8 sps:$4 sm:$0xff]  }
 0x359   :  { %5919 = vmatprep.subr.bf16.mxu0 %v9628_v30  ;;  %v9716_v30 = vld [vmem:[%s12899_s2 + $0x1794] ss:$8 sps:$4 sm:$0xff]  }
 0x35b   :  { %7223 = vmatpush1.bf16.msra.mxu1 %v9629_v7  ;;  %v9717_v7 = vld [vmem:[%s12899_s2 + $0x17a0] ss:$8 sps:$4 sm:$0xff]  }
 0x35c   :  { %5920 = vmatpush1.bf16.msra.mxu0 %v9626_v53  ;;  %7224 = vmatprep.subr.bf16.mxu1 %v9637_v61  ;;  %v9719_v53 = vld [vmem:[%s12899_s2 + $0x17a4] ss:$8 sps:$4 sm:$0xff]   ;;  %v9720_v61 = vld [vmem:[%s12899_s2 + $0x17b0] ss:$8 sps:$4 sm:$0xff]  }
 0x35d   :  { %5921 = vmatprep.subr.bf16.mxu0 %v9634_v9  ;;  %v9722_v9 = vld [vmem:[%s12899_s2 + $0x17b4] ss:$8 sps:$4 sm:$0xff]  }
 0x35f   :  { %7225 = vmatpush1.bf16.msra.mxu1 %v9635_v10  ;;  %v9723_v10 = vld [vmem:[%s12899_s2 + $0x17c0] ss:$8 sps:$4 sm:$0xff]  }
 0x360   :  { %5922 = vmatpush1.bf16.msra.mxu0 %v9632_v62  ;;  %7226 = vmatprep.subr.bf16.mxu1 %v9643_v29  ;;  %v9725_v62 = vld [vmem:[%s12899_s2 + $0x17c4] ss:$8 sps:$4 sm:$0xff]   ;;  %v9726_v29 = vld [vmem:[%s12899_s2 + $0x17d0] ss:$8 sps:$4 sm:$0xff]  }
 0x361   :  { %5923 = vmatprep.subr.bf16.mxu0 %v9640_v11  ;;  %v9728_v11 = vld [vmem:[%s12899_s2 + $0x17d4] ss:$8 sps:$4 sm:$0xff]  }
 0x363   :  { %7227 = vmatpush1.bf16.msra.mxu1 %v9641_v12  ;;  %v9729_v12 = vld [vmem:[%s12899_s2 + $0x17e0] ss:$8 sps:$4 sm:$0xff]  }
 0x364   :  { %5924 = vmatpush1.bf16.msra.mxu0 %v9638_v63  ;;  %7228 = vmatprep.subr.bf16.mxu1 %v9649_v2  ;;  %v9731_v63 = vld [vmem:[%s12899_s2 + $0x17e4] ss:$8 sps:$4 sm:$0xff]   ;;  %v9732_v2 = vld [vmem:[%s12899_s2 + $0x17f0] ss:$8 sps:$4 sm:$0xff]  }
 0x365   :  { %5925 = vmatprep.subr.bf16.mxu0 %v9646_v16  ;;  %v9734_v16 = vld [vmem:[%s12899_s2 + $0x17f4] ss:$8 sps:$4 sm:$0xff]  }
 0x367   :  { %7229 = vmatpush1.bf16.msra.mxu1 %v9647_v19  ;;  %v13_v19 = vstv %s12903_s7 }
 0x368   :  { %5926 = vmatpush1.bf16.msra.mxu0 %v9644_v15  ;;  %7230 = vmatprep.subr.bf16.mxu1 %v9655_v22  ;;  %v1114_v15 = vcombine.high %v12780_v25, %v12780_v25  ;;  %14 = vst [vmem:[#allocation2] sm:$0x1] %v13_v19 }
 0x369   :  { %5927 = vmatprep.subr.bf16.mxu0 %v9652_v20 }
 0x36b   :  { %7231 = vmatpush1.bf16.msra.mxu1 %v9653_v41 }
 0x36c   :  { %5928 = vmatpush1.bf16.msra.mxu0 %v9650_v8  ;;  %7232 = vmatprep.subr.bf16.mxu1 %v9661_v6  ;;  %v805_v6 = vld [vmem:[%s12904_s3] sm:$0x3] }
 0x36d   :  { %5929 = vmatprep.subr.bf16.mxu0 %v9658_v36  ;;  %v809_v36 = vsub.s32 0, %v9913_v45 }
 0x36f   :  { %7233 = vmatpush1.bf16.msra.mxu1 %v9659_v31  ;;  %v6151_v31 = vld [vmem:[%s12905_s5] sm:$0x3] }
 0x370   :  { %5930 = vmatpush1.bf16.msra.mxu0 %v9656_v52  ;;  %7234 = vmatprep.subr.bf16.mxu1 %v9667_v4  ;;  %v813_v52 = vsub.s32 1, %v9913_v45 }
 0x371   :  { %5931 = vmatprep.subr.bf16.mxu0 %v9664_v32  ;;  %v810_v32 = vrot.slane %v805_v6, %v809_v36 }
 0x372   :  { %v814_v4 = vrot.slane %v805_v6, %v813_v52 }
 0x373   :  { %7235 = vmatpush1.bf16.msra.mxu1 %v9665_v33  ;;  %v6160_v33 = vrot.slane %v6151_v31, %v813_v52 }
 0x374   :  { %5932 = vmatpush1.bf16.msra.mxu0 %v9662_v18  ;;  %7236 = vmatprep.subr.bf16.mxu1 %v9673_v35  ;;  %v6156_v18 = vrot.slane %v6151_v31, %v809_v36  ;;  %v8227_v35 = vadd.f32 %v12442_v55, %v814_v4 }
 0x375   :  { %5933 = vmatprep.subr.bf16.mxu0 %v9670_v34  ;;  %v8225_v34 = vadd.f32 %v12440_v54, %v810_v32 }
 0x377   :  { %7237 = vmatpush1.bf16.msra.mxu1 %v9671_v14  ;;  %v7255_v14 = vld [vmem:[%s12906_s6] sm:$0x3] }
 0x378   :  { %5934 = vmatpush1.bf16.msra.mxu0 %v9668_v37  ;;  %7238 = vmatprep.subr.bf16.mxu1 %v9679_v42 }
 0x379   :  { %5935 = vmatprep.subr.bf16.mxu0 %v9676_v40 }
 0x37b   :  { %7239 = vmatpush1.bf16.msra.mxu1 %v9677_v24 }
 0x37c   :  { %5936 = vmatpush1.bf16.msra.mxu0 %v9674_v43  ;;  %7240 = vmatprep.subr.bf16.mxu1 %v9685_v23 }
 0x37d   :  { %5937 = vmatprep.subr.bf16.mxu0 %v9682_v28 }
 0x37f   :  { %7241 = vmatpush1.bf16.msra.mxu1 %v9683_v44  ;;  %v7260_v44 = vrot.slane %v7255_v14, %v809_v36 }
 0x380   :  { %5938 = vmatpush1.bf16.msra.mxu0 %v9680_v26 }
 0x381   :  { %5948 = vmatprep.subr.bf16.mxu0 %v9689_v49 }
 0x382   :  { %7243 = vmatmul.mubr.bf16.vlgmr.msra.gmra.mrb[4].mxu1 %v6228_v50  ;;  %v7264_v50 = vrot.slane %v7255_v14, %v813_v52 }
 0x383   :  { %5940 = vmatmul.mubr.bf16.vlgmr.msra.gmra.mrb[0].mxu0 %v12780_v25 }
 0x384   :  { %5949 = vmatpush1.bf16.msra.mxu0 %v9687_v21  ;;  %5980 = vmatprep.mubr.bf16.mxu0 %v1116_v56 }
 0x385   :  { %5950 = vmatprep.subr.bf16.mxu0 %v9692_v17 }
 0x388   :  { %5951 = vmatpush1.bf16.msra.mxu0 %v9690_v51 }
 0x389   :  { %5952 = vmatprep.subr.bf16.mxu0 %v9695_v13  ;;  %v8224_v13 = vld [vmem:[#allocation2] ss:$0 sm:$0xff] }
 0x38c   :  { %5953 = vmatpush1.bf16.msra.mxu0 %v9693_v38 }
 0x38d   :  { %5954 = vmatprep.subr.bf16.mxu0 %v9698_v27 }
 0x390   :  { %5955 = vmatpush1.bf16.msra.mxu0 %v9696_v39 }
 0x391   :  { %5956 = vmatprep.subr.bf16.mxu0 %v9701_v57 }
 0x394   :  { %5957 = vmatpush1.bf16.msra.mxu0 %v9699_v58 }
 0x395   :  { %5958 = vmatprep.subr.bf16.mxu0 %v9704_v3 }
 0x398   :  { %5959 = vmatpush1.bf16.msra.mxu0 %v9702_v59 }
 0x399   :  { %5960 = vmatprep.subr.bf16.mxu0 %v9707_v60 }
 0x39c   :  { %5961 = vmatpush1.bf16.msra.mxu0 %v9705_v47 }
 0x39d   :  { %5962 = vmatprep.subr.bf16.mxu0 %v9710_v0 }
 0x3a0   :  { %5963 = vmatpush1.bf16.msra.mxu0 %v9708_v1 }
 0x3a1   :  { %5964 = vmatprep.subr.bf16.mxu0 %v9713_v48 }
 0x3a4   :  { %5965 = vmatpush1.bf16.msra.mxu0 %v9711_v5 }
 0x3a5   :  { %5966 = vmatprep.subr.bf16.mxu0 %v9716_v30 }
 0x3a8   :  { %5967 = vmatpush1.bf16.msra.mxu0 %v9714_v46 }
 0x3a9   :  { %5968 = vmatprep.subr.bf16.mxu0 %v9719_v53 }
 0x3ac   :  { %5969 = vmatpush1.bf16.msra.mxu0 %v9717_v7 }
 0x3ad   :  { %5970 = vmatprep.subr.bf16.mxu0 %v9722_v9 }
 0x3b0   :  { %5971 = vmatpush1.bf16.msra.mxu0 %v9720_v61 }
 0x3b1   :  { %5972 = vmatprep.subr.bf16.mxu0 %v9725_v62 }
 0x3b4   :  { %5973 = vmatpush1.bf16.msra.mxu0 %v9723_v10 }
 0x3b5   :  { %5974 = vmatprep.subr.bf16.mxu0 %v9728_v11 }
 0x3b8   :  { %5975 = vmatpush1.bf16.msra.mxu0 %v9726_v29 }
 0x3b9   :  { %5976 = vmatprep.subr.bf16.mxu0 %v9731_v63 }
 0x3bc   :  { %5977 = vmatpush1.bf16.msra.mxu0 %v9729_v12 }
 0x3bd   :  { %5978 = vmatprep.subr.bf16.mxu0 %v9734_v16 }
 0x3c0   :  { %5979 = vmatpush1.bf16.msra.mxu0 %v9732_v2 }
 0x3c3   :  { %5981 = vmatmul.mubr.bf16.vlgmr.msra.gmra.mrb[0].mxu0 %v1114_v15 }
 0x455   :  { %v7244_v20 = vpop.f32.mrb[4].mxu1 }
 0x456   :  { %v7246_v22 = vpop.f32.mrb[5].mxu1  ;;  %v8229_v40 = vadd.f32 %v7244_v20, %v6156_v18 }
 0x457   :  { %v7248_v8 = vpop.f32.mrb[6].mxu1  ;;  %v8230_v43 = vadd.f32 %v7246_v22, %v6160_v33 }
 0x458   :  { %v7249_v41 = vpop.f32.mrb[7].mxu1 }
 0x496   :  { %v5982_v37 = vpop.f32.mrb[0].mxu0 }
 0x497   :  { %v8226_v42 = vadd.f32 %v8225_v34, %v5982_v37  ;;  %v5984_v45 = vpop.f32.mrb[1].mxu0 }
 0x498   :  { %v8228_v24 = vadd.f32 %v8227_v35, %v5984_v45  ;;  %v5986_v28 = vpop.f32.mrb[2].mxu0 }
 0x499   :  { %v7251_v23 = vsub.f32 %v8226_v42, %v8229_v40  ;;  %v5987_v26 = vpop.f32.mrb[3].mxu0 }
 0x49a   :  { %v7252_v49 = vsub.f32 %v8228_v24, %v8230_v43 }
 0x49b   :  { %v7253_v25 = vmul.f32 %v7251_v23, %v7251_v23 }
 0x49c   :  { %v7254_v54 = vmul.f32 %v7252_v49, %v7252_v49 }
 0x49d   :  { %v7267_v55 = vmul.f32 %v7260_v44, %v7253_v25 }
 0x49e   :  { %v7268_v21 = vmul.f32 %v7264_v50, %v7254_v54 }
 0x49f   :  { %v7270_v56 = vsel %vm7269_vm0, %v7267_v55, 0.0 }
 0x4a0   :  { %v7271_v17 = vsel %vm7269_vm0, %v7268_v21, 0.0 }
 0x4a1   :  { %v7272_v51 = vadd.f32 %v7271_v17, %v7270_v56 }
 0x4a3   :  { %7273 = vadd.xlane.f32.xlu0 %v7272_v51 }
 0x530   :  { %v7274_v38 = vpop.xlane.xlu0 %7273 }
 0x531   :  { %v7282_v27 = vadd.f32 %v8224_v13, %v7274_v38 }
 0x533   :  { %v7283_v39 = vsub.f32 0.0, %v7282_v27 }
 0x535   :  { %v7284_v57 = vmul.f32 1.442695, %v7283_v39 }
 0x537   :  { %9735 = vpow2.f32 %v7284_v57 }
 0x541   :  { %v9736_v58 = vpop.eup %9735 }
 0x542   :  { %v7286_v3 = vadd.f32 1.0, %v9736_v58 }
 0x544   :  { %9737 = vrcp.f32 %v7286_v3 }
 0x54e   :  { %v9738_v59 = vpop.eup %9737 }
 0x54f   :  { %7290 = vst.msk [vmem:[%s12907_s8] sm:$0x3] %vm7289_vm1, %v9738_v59 }

</bundles_post_ra>
